<compile_context>
chip_gen: v6e
topology: v6e:2x2x1
jax: 0.10.0
libtpu: 0.0.40
codegen_flags: <defaults>
</compile_context>

<pallas_src>
import functools

import jax
import jax.numpy as jnp
from jax import lax
from jax.experimental import pallas as pl
from jax.experimental.pallas import tpu as pltpu


def _round_up(n, m):
    return ((n + m - 1) // m) * m


# ----------------------------- Pallas kernel ------------------------------ #
def _selfattn_rpr_kernel(x_ref, w0_ref, b0_ref, wqkv_ref, bqkv_ref,
                         w1_ref, b1_ref, pek_ref, pev_ref, o_ref,
                         *, depth, kdist, compute_dtype, band_on_mxu):
    bb, T, d_in = x_ref.shape          # one block of `bb` batch elements
    Hp = w0_ref.shape[1]               # padded hidden (multiple of 128)
    Rp = pek_ref.shape[0]              # padded 2k+1 (multiple of 8)
    cd = compute_dtype
    f32 = jnp.float32
    M = bb * T

    # Invariants: weights / pe tables arrive pre-cast to the compute dtype
    # (wrapper-side), biases stay f32.
    w0 = w0_ref[...]
    wqkv = wqkv_ref[...]
    w1 = w1_ref[...]
    b0 = b0_ref[...]
    bqkv = bqkv_ref[...]
    b1 = b1_ref[...]
    pe_k = pek_ref[...]
    pe_v = pev_ref[...]

    # Stacked relative-position band tensor, built once (depth-invariant):
    #   band[m, r, s] = 1  iff  r == clip(k + s - t, 0, 2k),  t = m mod T
    # Rows r >= 2k+1 are all-zero padding.  One tensor serves both band
    # contractions (key term contracts over r, value term over s).
    m_i = lax.broadcasted_iota(jnp.int32, (M, Rp, T), 0)
    r_i = lax.broadcasted_iota(jnp.int32, (M, Rp, T), 1)
    s_i = lax.broadcasted_iota(jnp.int32, (M, Rp, T), 2)
    ids = jnp.clip(kdist + s_i - (m_i % T), 0, 2 * kdist)
    band = (r_i == ids).astype(cd)                        # (M, Rp, T)

    # fc0 on the folded (bb*T, Din) activations
    xf = x_ref[...].reshape(M, d_in).astype(cd)
    hs = jnp.maximum(jnp.dot(xf, w0, preferred_element_type=f32) + b0, 0.0)

    def one_depth(hs):                                    # hs: (M, Hp) f32
        # fused Q/K/V projection: a single MXU pass with N = 3*Hp
        qkv = jnp.tanh(
            jnp.dot(hs.astype(cd), wqkv, preferred_element_type=f32) + bqkv)
        q = qkv[:, 0:Hp]
        k = qkv[:, Hp:2 * Hp]
        v = qkv[:, 2 * Hp:3 * Hp]

        # relative-position key projection on the MXU: (M, Rp)
        qpe = lax.dot_general(q.astype(cd), pe_k, (((1,), (1,)), ((), ())),
                              preferred_element_type=f32)

        q3 = q.reshape(bb, T, Hp).astype(cd)
        k3 = k.reshape(bb, T, Hp).astype(cd)
        v3 = v.reshape(bb, T, Hp).astype(cd)

        # content scores: batched MXU contraction (no explicit transpose)
        a = jnp.einsum("btd,bsd->bts", q3, k3,
                       preferred_element_type=f32).reshape(M, T)

        # key band term:  a[m, s] += sum_r qpe[m, r] * band[m, r, s]
        # (== review's einsum('btr,rts->bts') with (b,t) merged as the batch)
        if band_on_mxu:
            a_pos = lax.dot_general(
                qpe.astype(cd).reshape(M, 1, Rp), band,
                (((2,), (1,)), ((0,), (0,))),
                preferred_element_type=f32).reshape(M, T)
        else:
            a_pos = jnp.sum(qpe[:, :, None] * band, axis=1)
        a = a + a_pos

        # softmax over keys; normalization via the EUP approx reciprocal
        a = a - jnp.max(a, axis=-1, keepdims=True)
        e = jnp.exp(a)
        p = e * pl.reciprocal(jnp.sum(e, axis=-1, keepdims=True), approx=True)

        # context: batched MXU contraction
        p3 = p.reshape(bb, T, T).astype(cd)
        c = jnp.einsum("bts,bsd->btd", p3, v3,
                       preferred_element_type=f32).reshape(M, Hp)

        # value band term:  W[m, r] = sum_s p[m, s] * band[m, r, s]
        # (== review's einsum('bts,rts->btr')), then one 2-D matmul with pe_v
        if band_on_mxu:
            w_band = lax.dot_general(
                p.astype(cd).reshape(M, 1, T), band,
                (((2,), (2,)), ((0,), (0,))),
                preferred_element_type=f32).reshape(M, Rp)
        else:
            w_band = jnp.sum(p[:, None, :] * band, axis=2)
        c = c + jnp.dot(w_band.astype(cd), pe_v, preferred_element_type=f32)

        # fc1
        return jnp.maximum(
            jnp.dot(c.astype(cd), w1, preferred_element_type=f32) + b1, 0.0)

    if depth <= 3:
        # short fixed depth: unrolled for LLO scheduler visibility
        for _ in range(depth):
            hs = one_depth(hs)
    else:
        hs = lax.fori_loop(0, depth, lambda _, h: one_depth(h), hs)

    # lane-dense store (Hp is a multiple of 128)
    o_ref[...] = hs.reshape(bb, T, Hp).astype(o_ref.dtype)


# ------------------------------ wrapper ----------------------------------- #
def selfattention_rpr(x, params, pe_key, pe_value, *, depth=1, block_b=None,
                      compute_dtype=jnp.float32):
    """x: [B, T, Din] f32, pe_key/pe_value: [2k+1, H] -> [B, T, H] f32."""
    B, T, Din = x.shape
    H = params["w0"].shape[1]
    R = pe_key.shape[0]
    kdist = (R - 1) // 2
    cd = compute_dtype

    Hp = _round_up(H, 128)             # lane-dense hidden (exact zero padding)
    Rp = _round_up(R, 8)               # sublane-friendly band size

    def _pad_to(a, rows, cols):
        return jnp.pad(a, ((0, rows - a.shape[0]), (0, cols - a.shape[1])))

    # --- pad + pre-cast parameters (wrapper-side; halves DMA on bf16 path) ---
    w0p = _pad_to(params["w0"], Din, Hp).astype(cd)
    b0p = _pad_to(params["b0"], 1, Hp)
    wqkvp = jnp.concatenate(
        [_pad_to(params[n], Hp, Hp) for n in ("wq", "wk", "wv")],
        axis=1).astype(cd)
    bqkvp = jnp.concatenate(
        [_pad_to(params[n], 1, Hp) for n in ("bq", "bk", "bv")], axis=1)
    w1p = _pad_to(params["w1"], Hp, Hp).astype(cd)
    b1p = _pad_to(params["b1"], 1, Hp)
    pekp = _pad_to(pe_key, Rp, Hp).astype(cd)
    pevp = _pad_to(pe_value, Rp, Hp).astype(cd)

    # --- block_b heuristic: target >=256 matmul rows, cap by VMEM estimate ---
    if block_b is None:
        cd_bytes = jnp.dtype(cd).itemsize
        budget = 24 * 1024 * 1024
        block_b = 1
        for cand in range(1, B + 1):
            if B % cand:
                continue
            m = cand * T
            approx = (m * Rp * T * cd_bytes        # band tensor
                      + 4 * m * T * 4              # scores / softmax temps
                      + m * 3 * Hp * 4             # qkv
                      + 3 * m * Hp * 4)            # hs / context temps
            if (m <= 1024 or cand == 1) and approx <= budget:
                block_b = cand
    assert B % block_b == 0, "block_b must divide B"

    # --- generation-aware VMEM limit (v5e/v6e: 128 MiB, v7x: 64 MiB phys) ---
    try:
        vmem_cap = int(pltpu.get_tpu_info().vmem_capacity_bytes)
    except Exception:
        vmem_cap = 64 * 1024 * 1024
    vmem_limit = int(min(96 * 2**20, max(32 * 2**20, (vmem_cap * 3) // 4)))

    # --- advisory cost estimate for the XLA scheduler -------------------------
    m_all = B * T
    per_depth = (2 * m_all * Hp * 3 * Hp          # fused qkv projection
                 + 2 * m_all * Hp * Rp            # qpe
                 + 4 * B * T * T * Hp             # scores + context
                 + 4 * m_all * Rp * T             # two band contractions
                 + 2 * m_all * Rp * Hp            # W @ pe_v
                 + 2 * m_all * Hp * Hp)           # fc1
    flops = 2 * m_all * Din * Hp + depth * per_depth
    transcendentals = depth * (3 * m_all * Hp + m_all * T)
    param_bytes = sum(int(a.size) * a.dtype.itemsize
                      for a in (w0p, b0p, wqkvp, bqkvp, w1p, b1p, pekp, pevp))
    bytes_accessed = int(x.size * x.dtype.itemsize + B * T * Hp * 4
                         + param_bytes)
    cost = pl.CostEstimate(flops=int(flops),
                           transcendentals=int(transcendentals),
                           bytes_accessed=bytes_accessed)

    args = (x, w0p, b0p, wqkvp, bqkvp, w1p, b1p, pekp, pevp)

    def build(band_on_mxu, single_buffer_consts):
        def const_spec(shape):
            idx = lambda i, _n=len(shape): (0,) * _n
            if single_buffer_consts:
                # constant blocks: no second pipeline buffer (saves VMEM)
                return pl.BlockSpec(shape, idx,
                                    pipeline_mode=pl.Buffered(buffer_count=1))
            return pl.BlockSpec(shape, idx)

        in_specs = [
            pl.BlockSpec((block_b, T, Din), lambda i: (i, 0, 0)),   # x
            const_spec((Din, Hp)), const_spec((1, Hp)),             # w0, b0
            const_spec((Hp, 3 * Hp)), const_spec((1, 3 * Hp)),      # wqkv, bqkv
            const_spec((Hp, Hp)), const_spec((1, Hp)),              # w1, b1
            const_spec((Rp, Hp)), const_spec((Rp, Hp)),             # pe_k, pe_v
        ]
        out_spec = pl.BlockSpec((block_b, T, Hp), lambda i: (i, 0, 0))

        kernel = functools.partial(
            _selfattn_rpr_kernel, depth=depth, kdist=kdist,
            compute_dtype=cd, band_on_mxu=band_on_mxu)

        return pl.pallas_call(
            kernel,
            out_shape=jax.ShapeDtypeStruct((B, T, Hp), jnp.float32),
            grid_spec=pltpu.PrefetchScalarGridSpec(
                num_scalar_prefetch=0,
                grid=(B // block_b,),
                in_specs=in_specs,
                out_specs=out_spec),
            compiler_params=pltpu.CompilerParams(
                dimension_semantics=("parallel",),
                vmem_limit_bytes=vmem_limit),
            cost_estimate=cost)

    # Preferred config first; fall back to more conservative lowerings if the
    # current toolchain rejects single-buffered constants or the batched
    # band matmuls (the fused VPU/XLU band path is semantically identical).
    out = None
    last_err = None
    for band_on_mxu, single_buf in ((True, True), (True, False), (False, False)):
        try:
            out = build(band_on_mxu, single_buf)(*args)
            break
        except Exception as err:          # pragma: no cover - fallback path
            last_err = err
    if out is None:
        raise last_err

    return out[:, :, :H]


# ------------------------- plain-JAX reference ----------------------------- #
def _relative_pos_emb(T, k, pe):
    ids = jnp.clip(k + jnp.arange(T)[None, :] - jnp.arange(T)[:, None], 0, 2 * k)
    return pe[ids]  # [T, T, H]


def _reference(x, params, rpr_key, rpr_value, depth=1):
    hs = jax.nn.relu(x @ params["w0"] + params["b0"])
    for _ in range(depth):
        q = jnp.tanh(hs @ params["wq"] + params["bq"])
        k = jnp.tanh(hs @ params["wk"] + params["bk"])
        v = jnp.tanh(hs @ params["wv"] + params["bv"])
        a = jnp.einsum("btd,bsd->bts", q, k)
        a_pos = jnp.einsum("tsd,btd->bts", rpr_key, q)
        a = jax.nn.softmax(a + a_pos, axis=2)
        c = jnp.einsum("bts,bsd->btd", a, v)
        c_pos = jnp.einsum("bts,tsd->btd", a, rpr_value)
        hs = jax.nn.relu((c + c_pos) @ params["w1"] + params["b1"])
    return hs


# ------------------------------- main -------------------------------------- #
if __name__ == "__main__":
    B, T, INPUT_SIZE, HIDDEN, K, DEPTH = 2, 8, 16, 32, 3, 1

    key = jax.random.PRNGKey(0)
    keys = jax.random.split(key, 16)

    def lin(kw, kb, d_in, d_out):
        w = jax.random.normal(kw, (d_in, d_out), jnp.float32) * 0.1
        b = jax.random.normal(kb, (1, d_out), jnp.float32) * 0.1
        return w, b

    w0, b0 = lin(keys[0], keys[1], INPUT_SIZE, HIDDEN)
    wq, bq = lin(keys[2], keys[3], HIDDEN, HIDDEN)
    wk, bk = lin(keys[4], keys[5], HIDDEN, HIDDEN)
    wv, bv = lin(keys[6], keys[7], HIDDEN, HIDDEN)
    w1, b1 = lin(keys[8], keys[9], HIDDEN, HIDDEN)
    params = dict(w0=w0, b0=b0, wq=wq, bq=bq, wk=wk, bk=bk,
                  wv=wv, bv=bv, w1=w1, b1=b1)

    # pos_size == hidden_size (module default); synthetic init.
    pe_key = jax.random.normal(keys[10], (2 * K + 1, HIDDEN), jnp.float32)
    pe_val = jax.random.normal(keys[11], (2 * K + 1, HIDDEN), jnp.float32)

    x = jax.random.normal(keys[12], (B, T, INPUT_SIZE), jnp.float32)

    # full [T,T,H] tables only for the pure-JAX reference (kernel uses the band trick)
    rpr_key = _relative_pos_emb(T, K, pe_key)
    rpr_value = _relative_pos_emb(T, K, pe_val)
    ref = _reference(x, params, rpr_key, rpr_value, depth=DEPTH)

    # f32 compute (tolerance covers the EUP approx-reciprocal softmax and
    # default-precision MXU contractions, same class as XLA's own einsums)
    out = selfattention_rpr(x, params, pe_key, pe_val, depth=DEPTH)
    out = jax.block_until_ready(out)
    assert out.shape == (B, T, HIDDEN)
    assert jnp.allclose(out, ref, rtol=1e-2, atol=1e-2), "f32 kernel mismatch"

    # bf16 matmul operands (f32 accumulation) -- v6e/v7x MXU fast path
    out_bf16 = selfattention_rpr(x, params, pe_key, pe_val, depth=DEPTH,
                                 compute_dtype=jnp.bfloat16)
    out_bf16 = jax.block_until_ready(out_bf16)
    assert jnp.allclose(out_bf16, ref, rtol=5e-2, atol=5e-2), "bf16 kernel mismatch"

    print("KERNEL_OK")
</pallas_src>

<mosaic_0001>
module attributes {stable_mosaic.version = 11 : i64} {
  func.func @_selfattn_rpr_kernel(%arg0: i32, %arg1: memref<2x8x16xf32, #tpu.memory_space<vmem>>, %arg2: memref<16x128xf32, #tpu.memory_space<vmem>>, %arg3: memref<1x128xf32, #tpu.memory_space<vmem>>, %arg4: memref<128x384xf32, #tpu.memory_space<vmem>>, %arg5: memref<1x384xf32, #tpu.memory_space<vmem>>, %arg6: memref<128x128xf32, #tpu.memory_space<vmem>>, %arg7: memref<1x128xf32, #tpu.memory_space<vmem>>, %arg8: memref<8x128xf32, #tpu.memory_space<vmem>>, %arg9: memref<8x128xf32, #tpu.memory_space<vmem>>, %arg10: memref<2x8x128xf32, #tpu.memory_space<vmem>>) attributes {dimension_semantics = [#tpu.dimension_semantics<parallel>], iteration_bounds = array<i64: 1>, scalar_prefetch = 0 : i64, scratch_operands = 0 : i64, tpu.core_type = #tpu.core_type<tc>, window_params = [{transform_indices = @transform_0, window_bounds = array<i64: 2, 8, 16>}, {pipeline_mode = #tpu.pipeline_mode<synchronous>, transform_indices = @transform_1, window_bounds = array<i64: 16, 128>}, {pipeline_mode = #tpu.pipeline_mode<synchronous>, transform_indices = @transform_2, window_bounds = array<i64: 1, 128>}, {pipeline_mode = #tpu.pipeline_mode<synchronous>, transform_indices = @transform_3, window_bounds = array<i64: 128, 384>}, {pipeline_mode = #tpu.pipeline_mode<synchronous>, transform_indices = @transform_4, window_bounds = array<i64: 1, 384>}, {pipeline_mode = #tpu.pipeline_mode<synchronous>, transform_indices = @transform_5, window_bounds = array<i64: 128, 128>}, {pipeline_mode = #tpu.pipeline_mode<synchronous>, transform_indices = @transform_6, window_bounds = array<i64: 1, 128>}, {pipeline_mode = #tpu.pipeline_mode<synchronous>, transform_indices = @transform_7, window_bounds = array<i64: 8, 128>}, {pipeline_mode = #tpu.pipeline_mode<synchronous>, transform_indices = @transform_8, window_bounds = array<i64: 8, 128>}, {transform_indices = @transform_9, window_bounds = array<i64: 2, 8, 128>}]} {
    %c0 = arith.constant 0 : index
    %c0_0 = arith.constant 0 : index
    %0 = vector.load %arg2[%c0, %c0_0] : memref<16x128xf32, #tpu.memory_space<vmem>>, vector<16x128xf32>
    %c0_1 = arith.constant 0 : index
    %c0_2 = arith.constant 0 : index
    %1 = vector.load %arg4[%c0_1, %c0_2] : memref<128x384xf32, #tpu.memory_space<vmem>>, vector<128x384xf32>
    %c0_3 = arith.constant 0 : index
    %c0_4 = arith.constant 0 : index
    %2 = vector.load %arg6[%c0_3, %c0_4] : memref<128x128xf32, #tpu.memory_space<vmem>>, vector<128x128xf32>
    %c0_5 = arith.constant 0 : index
    %c0_6 = arith.constant 0 : index
    %3 = vector.load %arg3[%c0_5, %c0_6] : memref<1x128xf32, #tpu.memory_space<vmem>>, vector<1x128xf32>
    %c0_7 = arith.constant 0 : index
    %c0_8 = arith.constant 0 : index
    %4 = vector.load %arg5[%c0_7, %c0_8] : memref<1x384xf32, #tpu.memory_space<vmem>>, vector<1x384xf32>
    %c0_9 = arith.constant 0 : index
    %c0_10 = arith.constant 0 : index
    %5 = vector.load %arg7[%c0_9, %c0_10] : memref<1x128xf32, #tpu.memory_space<vmem>>, vector<1x128xf32>
    %c0_11 = arith.constant 0 : index
    %c0_12 = arith.constant 0 : index
    %6 = vector.load %arg8[%c0_11, %c0_12] : memref<8x128xf32, #tpu.memory_space<vmem>>, vector<8x128xf32>
    %c0_13 = arith.constant 0 : index
    %c0_14 = arith.constant 0 : index
    %7 = vector.load %arg9[%c0_13, %c0_14] : memref<8x128xf32, #tpu.memory_space<vmem>>, vector<8x128xf32>
    %8 = tpu.iota {dimensions = array<i32: 0>} : vector<16x8x8xi32>
    %9 = tpu.iota {dimensions = array<i32: 1>} : vector<16x8x8xi32>
    %10 = tpu.iota {dimensions = array<i32: 2>} : vector<16x8x8xi32>
    %c3_i32 = arith.constant 3 : i32
    %11 = vector.broadcast %c3_i32 : i32 to vector<16x8x8xi32>
    %12 = arith.addi %11, %10 : vector<16x8x8xi32>
    %c8_i32 = arith.constant 8 : i32
    %c0_i32 = arith.constant 0 : i32
    %13 = arith.cmpi eq, %c8_i32, %c0_i32 : i32
    %c1_i32 = arith.constant 1 : i32
    %14 = arith.select %13, %c1_i32, %c8_i32 : i32
    %15 = vector.broadcast %14 : i32 to vector<16x8x8xi32>
    %16 = arith.remsi %8, %15 : vector<16x8x8xi32>
    %c0_i32_15 = arith.constant 0 : i32
    %17 = vector.broadcast %c0_i32_15 : i32 to vector<16x8x8xi32>
    %18 = arith.cmpi ne, %16, %17 : vector<16x8x8xi32>
    %c0_i32_16 = arith.constant 0 : i32
    %19 = vector.broadcast %c0_i32_16 : i32 to vector<16x8x8xi32>
    %20 = arith.cmpi slt, %16, %19 : vector<16x8x8xi32>
    %c0_i32_17 = arith.constant 0 : i32
    %21 = arith.cmpi slt, %14, %c0_i32_17 : i32
    %22 = vector.broadcast %21 : i1 to vector<16x8x8xi1>
    %23 = vector.broadcast %22 : vector<16x8x8xi1> to vector<16x8x8xi1>
    %24 = arith.xori %20, %23 : vector<16x8x8xi1>
    %25 = arith.andi %24, %18 : vector<16x8x8xi1>
    %26 = vector.broadcast %14 : i32 to vector<16x8x8xi32>
    %27 = arith.addi %16, %26 : vector<16x8x8xi32>
    %28 = arith.select %25, %27, %16 : vector<16x8x8xi1>, vector<16x8x8xi32>
    %29 = arith.subi %12, %28 : vector<16x8x8xi32>
    %c0_i32_18 = arith.constant 0 : i32
    %c6_i32 = arith.constant 6 : i32
    %30 = vector.broadcast %c0_i32_18 : i32 to vector<16x8x8xi32>
    %31 = arith.maxsi %30, %29 : vector<16x8x8xi32>
    %32 = vector.broadcast %c6_i32 : i32 to vector<16x8x8xi32>
    %33 = arith.minsi %32, %31 : vector<16x8x8xi32>
    %34 = arith.cmpi eq, %9, %33 : vector<16x8x8xi32>
    %35 = arith.extui %34 : vector<16x8x8xi1> to vector<16x8x8xi32>
    %36 = arith.sitofp %35 : vector<16x8x8xi32> to vector<16x8x8xf32>
    %c0_19 = arith.constant 0 : index
    %c0_20 = arith.constant 0 : index
    %c0_21 = arith.constant 0 : index
    %37 = vector.load %arg1[%c0_19, %c0_20, %c0_21] : memref<2x8x16xf32, #tpu.memory_space<vmem>>, vector<2x8x16xf32>
    %38 = vector.shape_cast %37 : vector<2x8x16xf32> to vector<16x16xf32>
    %cst = arith.constant dense<0.000000e+00> : vector<16x128xf32>
    %39 = tpu.matmul %38, %0, %cst {dimension_numbers = #tpu.dot_dimension_numbers<[1], [0], [0], [1], [0, 0, 1, 1], [], []>} : vector<16x16xf32>, vector<16x128xf32>, vector<16x128xf32> -> vector<16x128xf32>
    %40 = vector.broadcast %3 : vector<1x128xf32> to vector<16x128xf32>
    %41 = arith.addf %39, %40 : vector<16x128xf32>
    %cst_22 = arith.constant 0.000000e+00 : f32
    %42 = vector.broadcast %cst_22 : f32 to vector<16x128xf32>
    %43 = arith.maximumf %41, %42 : vector<16x128xf32>
    %cst_23 = arith.constant dense<0.000000e+00> : vector<16x384xf32>
    %44 = tpu.matmul %43, %1, %cst_23 {dimension_numbers = #tpu.dot_dimension_numbers<[1], [0], [0], [1], [0, 0, 1, 1], [], []>} : vector<16x128xf32>, vector<128x384xf32>, vector<16x384xf32> -> vector<16x384xf32>
    %45 = vector.broadcast %4 : vector<1x384xf32> to vector<16x384xf32>
    %46 = arith.addf %44, %45 : vector<16x384xf32>
    %47 = math.tanh %46 : vector<16x384xf32>
    %48 = vector.extract_strided_slice %47 {offsets = [0, 0], sizes = [16, 128], strides = [1, 1]} : vector<16x384xf32> to vector<16x128xf32>
    %49 = vector.extract_strided_slice %47 {offsets = [0, 128], sizes = [16, 128], strides = [1, 1]} : vector<16x384xf32> to vector<16x128xf32>
    %50 = vector.extract_strided_slice %47 {offsets = [0, 256], sizes = [16, 128], strides = [1, 1]} : vector<16x384xf32> to vector<16x128xf32>
    %cst_24 = arith.constant dense<0.000000e+00> : vector<16x8xf32>
    %51 = tpu.matmul %48, %6, %cst_24 {dimension_numbers = #tpu.dot_dimension_numbers<[1], [1], [0], [0], [0, 0, 1, 0], [], []>} : vector<16x128xf32>, vector<8x128xf32>, vector<16x8xf32> -> vector<16x8xf32>
    %52 = vector.shape_cast %48 : vector<16x128xf32> to vector<2x8x128xf32>
    %53 = vector.shape_cast %49 : vector<16x128xf32> to vector<2x8x128xf32>
    %54 = vector.shape_cast %50 : vector<16x128xf32> to vector<2x8x128xf32>
    "tpu.trace_start"() <{level = 10 : i32, message = "btd,bsd->bts"}> : () -> ()
    %cst_25 = arith.constant dense<0.000000e+00> : vector<2x8x8xf32>
    %55 = tpu.matmul %52, %53, %cst_25 {dimension_numbers = #tpu.dot_dimension_numbers<[2], [2], [1], [1], [0, 0, 0, 1, 1, 1], [0], [0]>} : vector<2x8x128xf32>, vector<2x8x128xf32>, vector<2x8x8xf32> -> vector<2x8x8xf32>
    "tpu.trace_stop"() : () -> ()
    %56 = vector.shape_cast %55 : vector<2x8x8xf32> to vector<16x8xf32>
    %57 = vector.shape_cast %51 : vector<16x8xf32> to vector<16x1x8xf32>
    %cst_26 = arith.constant dense<0.000000e+00> : vector<16x1x8xf32>
    %58 = tpu.matmul %57, %36, %cst_26 {dimension_numbers = #tpu.dot_dimension_numbers<[2], [1], [1], [2], [0, 0, 0, 1, 1, 2], [0], [0]>} : vector<16x1x8xf32>, vector<16x8x8xf32>, vector<16x1x8xf32> -> vector<16x1x8xf32>
    %59 = vector.shape_cast %58 : vector<16x1x8xf32> to vector<16x8xf32>
    %60 = arith.addf %56, %59 : vector<16x8xf32>
    %cst_27 = arith.constant dense<0xFF800000> : vector<16xf32>
    %61 = vector.multi_reduction <maximumf>, %60, %cst_27 [1] : vector<16x8xf32> to vector<16xf32>
    %62 = vector.shape_cast %61 : vector<16xf32> to vector<16x1xf32>
    %63 = vector.broadcast %62 : vector<16x1xf32> to vector<16x8xf32>
    %64 = arith.subf %60, %63 : vector<16x8xf32>
    %65 = math.exp %64 : vector<16x8xf32>
    %cst_28 = arith.constant dense<0.000000e+00> : vector<16xf32>
    %66 = vector.multi_reduction <add>, %65, %cst_28 [1] : vector<16x8xf32> to vector<16xf32>
    %67 = vector.shape_cast %66 : vector<16xf32> to vector<16x1xf32>
    %68 = tpu.reciprocal %67 {approx = true} : vector<16x1xf32> -> vector<16x1xf32>
    %69 = vector.broadcast %68 : vector<16x1xf32> to vector<16x8xf32>
    %70 = arith.mulf %65, %69 : vector<16x8xf32>
    %71 = vector.shape_cast %70 : vector<16x8xf32> to vector<2x8x8xf32>
    "tpu.trace_start"() <{level = 10 : i32, message = "bts,bsd->btd"}> : () -> ()
    %cst_29 = arith.constant dense<0.000000e+00> : vector<2x8x128xf32>
    %72 = tpu.matmul %71, %54, %cst_29 {dimension_numbers = #tpu.dot_dimension_numbers<[2], [1], [1], [2], [0, 0, 0, 1, 1, 2], [0], [0]>} : vector<2x8x8xf32>, vector<2x8x128xf32>, vector<2x8x128xf32> -> vector<2x8x128xf32>
    "tpu.trace_stop"() : () -> ()
    %73 = vector.shape_cast %72 : vector<2x8x128xf32> to vector<16x128xf32>
    %74 = vector.shape_cast %70 : vector<16x8xf32> to vector<16x1x8xf32>
    %cst_30 = arith.constant dense<0.000000e+00> : vector<16x1x8xf32>
    %75 = tpu.matmul %74, %36, %cst_30 {dimension_numbers = #tpu.dot_dimension_numbers<[2], [2], [1], [1], [0, 0, 0, 1, 1, 1], [0], [0]>} : vector<16x1x8xf32>, vector<16x8x8xf32>, vector<16x1x8xf32> -> vector<16x1x8xf32>
    %76 = vector.shape_cast %75 : vector<16x1x8xf32> to vector<16x8xf32>
    %cst_31 = arith.constant dense<0.000000e+00> : vector<16x128xf32>
    %77 = tpu.matmul %76, %7, %cst_31 {dimension_numbers = #tpu.dot_dimension_numbers<[1], [0], [0], [1], [0, 0, 1, 1], [], []>} : vector<16x8xf32>, vector<8x128xf32>, vector<16x128xf32> -> vector<16x128xf32>
    %78 = arith.addf %73, %77 : vector<16x128xf32>
    %cst_32 = arith.constant dense<0.000000e+00> : vector<16x128xf32>
    %79 = tpu.matmul %78, %2, %cst_32 {dimension_numbers = #tpu.dot_dimension_numbers<[1], [0], [0], [1], [0, 0, 1, 1], [], []>} : vector<16x128xf32>, vector<128x128xf32>, vector<16x128xf32> -> vector<16x128xf32>
    %80 = vector.broadcast %5 : vector<1x128xf32> to vector<16x128xf32>
    %81 = arith.addf %79, %80 : vector<16x128xf32>
    %cst_33 = arith.constant 0.000000e+00 : f32
    %82 = vector.broadcast %cst_33 : f32 to vector<16x128xf32>
    %83 = arith.maximumf %81, %82 : vector<16x128xf32>
    %84 = vector.shape_cast %83 : vector<16x128xf32> to vector<2x8x128xf32>
    %c0_34 = arith.constant 0 : index
    %c0_35 = arith.constant 0 : index
    %c0_36 = arith.constant 0 : index
    %85 = vector.load %arg10[%c0_34, %c0_35, %c0_36] : memref<2x8x128xf32, #tpu.memory_space<vmem>>, vector<2x8x128xf32>
    tpu.vector_store %arg10[%c0_34, %c0_35, %c0_36], %84 {strides = array<i32>} : memref<2x8x128xf32, #tpu.memory_space<vmem>>, vector<2x8x128xf32>,
    return
  }
  func.func @transform_0(%arg0: i32) -> (i32, i32, i32) {
    %c0_i32 = arith.constant 0 : i32
    %c0_i32_0 = arith.constant 0 : i32
    %c0_i32_1 = arith.constant 0 : i32
    return %arg0, %c0_i32, %c0_i32_0 : i32, i32, i32
  }
  func.func @transform_1(%arg0: i32) -> (i32, i32) {
    %c0_i32 = arith.constant 0 : i32
    %c0_i32_0 = arith.constant 0 : i32
    %c0_i32_1 = arith.constant 0 : i32
    return %c0_i32, %c0_i32_0 : i32, i32
  }
  func.func @transform_2(%arg0: i32) -> (i32, i32) {
    %c0_i32 = arith.constant 0 : i32
    %c0_i32_0 = arith.constant 0 : i32
    %c0_i32_1 = arith.constant 0 : i32
    return %c0_i32, %c0_i32_0 : i32, i32
  }
  func.func @transform_3(%arg0: i32) -> (i32, i32) {
    %c0_i32 = arith.constant 0 : i32
    %c0_i32_0 = arith.constant 0 : i32
    %c0_i32_1 = arith.constant 0 : i32
    return %c0_i32, %c0_i32_0 : i32, i32
  }
  func.func @transform_4(%arg0: i32) -> (i32, i32) {
    %c0_i32 = arith.constant 0 : i32
    %c0_i32_0 = arith.constant 0 : i32
    %c0_i32_1 = arith.constant 0 : i32
    return %c0_i32, %c0_i32_0 : i32, i32
  }
  func.func @transform_5(%arg0: i32) -> (i32, i32) {
    %c0_i32 = arith.constant 0 : i32
    %c0_i32_0 = arith.constant 0 : i32
    %c0_i32_1 = arith.constant 0 : i32
    return %c0_i32, %c0_i32_0 : i32, i32
  }
  func.func @transform_6(%arg0: i32) -> (i32, i32) {
    %c0_i32 = arith.constant 0 : i32
    %c0_i32_0 = arith.constant 0 : i32
    %c0_i32_1 = arith.constant 0 : i32
    return %c0_i32, %c0_i32_0 : i32, i32
  }
  func.func @transform_7(%arg0: i32) -> (i32, i32) {
    %c0_i32 = arith.constant 0 : i32
    %c0_i32_0 = arith.constant 0 : i32
    %c0_i32_1 = arith.constant 0 : i32
    return %c0_i32, %c0_i32_0 : i32, i32
  }
  func.func @transform_8(%arg0: i32) -> (i32, i32) {
    %c0_i32 = arith.constant 0 : i32
    %c0_i32_0 = arith.constant 0 : i32
    %c0_i32_1 = arith.constant 0 : i32
    return %c0_i32, %c0_i32_0 : i32, i32
  }
  func.func @transform_9(%arg0: i32) -> (i32, i32, i32) {
    %c0_i32 = arith.constant 0 : i32
    %c0_i32_0 = arith.constant 0 : i32
    %c0_i32_1 = arith.constant 0 : i32
    return %arg0, %c0_i32, %c0_i32_0 : i32, i32, i32
  }
}

module attributes {stable_mosaic.version = 11 : i64} {
  func.func @_selfattn_rpr_kernel(%arg0: i32, %arg1: memref<2x8x16xf32, #tpu.memory_space<vmem>>, %arg2: memref<16x128xf32, #tpu.memory_space<vmem>>, %arg3: memref<1x128xf32, #tpu.memory_space<vmem>>, %arg4: memref<128x384xf32, #tpu.memory_space<vmem>>, %arg5: memref<1x384xf32, #tpu.memory_space<vmem>>, %arg6: memref<128x128xf32, #tpu.memory_space<vmem>>, %arg7: memref<1x128xf32, #tpu.memory_space<vmem>>, %arg8: memref<8x128xf32, #tpu.memory_space<vmem>>, %arg9: memref<8x128xf32, #tpu.memory_space<vmem>>, %arg10: memref<2x8x128xf32, #tpu.memory_space<vmem>>) attributes {dimension_semantics = [#tpu.dimension_semantics<parallel>], iteration_bounds = array<i64: 1>, scalar_prefetch = 0 : i64, scratch_operands = 0 : i64, tpu.core_type = #tpu.core_type<tc>, window_params = [{transform_indices = @transform_0, window_bounds = array<i64: 2, 8, 16>}, {pipeline_mode = #tpu.pipeline_mode<synchronous>, transform_indices = @transform_1, window_bounds = array<i64: 16, 128>}, {pipeline_mode = #tpu.pipeline_mode<synchronous>, transform_indices = @transform_2, window_bounds = array<i64: 1, 128>}, {pipeline_mode = #tpu.pipeline_mode<synchronous>, transform_indices = @transform_3, window_bounds = array<i64: 128, 384>}, {pipeline_mode = #tpu.pipeline_mode<synchronous>, transform_indices = @transform_4, window_bounds = array<i64: 1, 384>}, {pipeline_mode = #tpu.pipeline_mode<synchronous>, transform_indices = @transform_5, window_bounds = array<i64: 128, 128>}, {pipeline_mode = #tpu.pipeline_mode<synchronous>, transform_indices = @transform_6, window_bounds = array<i64: 1, 128>}, {pipeline_mode = #tpu.pipeline_mode<synchronous>, transform_indices = @transform_7, window_bounds = array<i64: 8, 128>}, {pipeline_mode = #tpu.pipeline_mode<synchronous>, transform_indices = @transform_8, window_bounds = array<i64: 8, 128>}, {transform_indices = @transform_9, window_bounds = array<i64: 2, 8, 128>}]} {
    %c0 = arith.constant 0 : index
    %c0_0 = arith.constant 0 : index
    %0 = vector.load %arg2[%c0, %c0_0] : memref<16x128xf32, #tpu.memory_space<vmem>>, vector<16x128xf32>
    %c0_1 = arith.constant 0 : index
    %c0_2 = arith.constant 0 : index
    %1 = vector.load %arg4[%c0_1, %c0_2] : memref<128x384xf32, #tpu.memory_space<vmem>>, vector<128x384xf32>
    %c0_3 = arith.constant 0 : index
    %c0_4 = arith.constant 0 : index
    %2 = vector.load %arg6[%c0_3, %c0_4] : memref<128x128xf32, #tpu.memory_space<vmem>>, vector<128x128xf32>
    %c0_5 = arith.constant 0 : index
    %c0_6 = arith.constant 0 : index
    %3 = vector.load %arg3[%c0_5, %c0_6] : memref<1x128xf32, #tpu.memory_space<vmem>>, vector<1x128xf32>
    %c0_7 = arith.constant 0 : index
    %c0_8 = arith.constant 0 : index
    %4 = vector.load %arg5[%c0_7, %c0_8] : memref<1x384xf32, #tpu.memory_space<vmem>>, vector<1x384xf32>
    %c0_9 = arith.constant 0 : index
    %c0_10 = arith.constant 0 : index
    %5 = vector.load %arg7[%c0_9, %c0_10] : memref<1x128xf32, #tpu.memory_space<vmem>>, vector<1x128xf32>
    %c0_11 = arith.constant 0 : index
    %c0_12 = arith.constant 0 : index
    %6 = vector.load %arg8[%c0_11, %c0_12] : memref<8x128xf32, #tpu.memory_space<vmem>>, vector<8x128xf32>
    %c0_13 = arith.constant 0 : index
    %c0_14 = arith.constant 0 : index
    %7 = vector.load %arg9[%c0_13, %c0_14] : memref<8x128xf32, #tpu.memory_space<vmem>>, vector<8x128xf32>
    %8 = tpu.iota {dimensions = array<i32: 0>} : vector<16x8x8xi32>
    %9 = tpu.iota {dimensions = array<i32: 1>} : vector<16x8x8xi32>
    %10 = tpu.iota {dimensions = array<i32: 2>} : vector<16x8x8xi32>
    %c3_i32 = arith.constant 3 : i32
    %11 = vector.broadcast %c3_i32 : i32 to vector<16x8x8xi32>
    %12 = arith.addi %11, %10 : vector<16x8x8xi32>
    %c8_i32 = arith.constant 8 : i32
    %c0_i32 = arith.constant 0 : i32
    %13 = arith.cmpi eq, %c8_i32, %c0_i32 : i32
    %c1_i32 = arith.constant 1 : i32
    %14 = arith.select %13, %c1_i32, %c8_i32 : i32
    %15 = vector.broadcast %14 : i32 to vector<16x8x8xi32>
    %16 = arith.remsi %8, %15 : vector<16x8x8xi32>
    %c0_i32_15 = arith.constant 0 : i32
    %17 = vector.broadcast %c0_i32_15 : i32 to vector<16x8x8xi32>
    %18 = arith.cmpi ne, %16, %17 : vector<16x8x8xi32>
    %c0_i32_16 = arith.constant 0 : i32
    %19 = vector.broadcast %c0_i32_16 : i32 to vector<16x8x8xi32>
    %20 = arith.cmpi slt, %16, %19 : vector<16x8x8xi32>
    %c0_i32_17 = arith.constant 0 : i32
    %21 = arith.cmpi slt, %14, %c0_i32_17 : i32
    %22 = vector.broadcast %21 : i1 to vector<16x8x8xi1>
    %23 = vector.broadcast %22 : vector<16x8x8xi1> to vector<16x8x8xi1>
    %24 = arith.xori %20, %23 : vector<16x8x8xi1>
    %25 = arith.andi %24, %18 : vector<16x8x8xi1>
    %26 = vector.broadcast %14 : i32 to vector<16x8x8xi32>
    %27 = arith.addi %16, %26 : vector<16x8x8xi32>
    %28 = arith.select %25, %27, %16 : vector<16x8x8xi1>, vector<16x8x8xi32>
    %29 = arith.subi %12, %28 : vector<16x8x8xi32>
    %c0_i32_18 = arith.constant 0 : i32
    %c6_i32 = arith.constant 6 : i32
    %30 = vector.broadcast %c0_i32_18 : i32 to vector<16x8x8xi32>
    %31 = arith.maxsi %30, %29 : vector<16x8x8xi32>
    %32 = vector.broadcast %c6_i32 : i32 to vector<16x8x8xi32>
    %33 = arith.minsi %32, %31 : vector<16x8x8xi32>
    %34 = arith.cmpi eq, %9, %33 : vector<16x8x8xi32>
    %35 = arith.extui %34 : vector<16x8x8xi1> to vector<16x8x8xi32>
    %36 = arith.sitofp %35 : vector<16x8x8xi32> to vector<16x8x8xf32>
    %c0_19 = arith.constant 0 : index
    %c0_20 = arith.constant 0 : index
    %c0_21 = arith.constant 0 : index
    %37 = vector.load %arg1[%c0_19, %c0_20, %c0_21] : memref<2x8x16xf32, #tpu.memory_space<vmem>>, vector<2x8x16xf32>
    %38 = vector.shape_cast %37 : vector<2x8x16xf32> to vector<16x16xf32>
    %cst = arith.constant dense<0.000000e+00> : vector<16x128xf32>
    %39 = tpu.matmul %38, %0, %cst {dimension_numbers = #tpu.dot_dimension_numbers<[1], [0], [0], [1], [0, 0, 1, 1], [], []>} : vector<16x16xf32>, vector<16x128xf32>, vector<16x128xf32> -> vector<16x128xf32>
    %40 = vector.broadcast %3 : vector<1x128xf32> to vector<16x128xf32>
    %41 = arith.addf %39, %40 : vector<16x128xf32>
    %cst_22 = arith.constant 0.000000e+00 : f32
    %42 = vector.broadcast %cst_22 : f32 to vector<16x128xf32>
    %43 = arith.maximumf %41, %42 : vector<16x128xf32>
    %cst_23 = arith.constant dense<0.000000e+00> : vector<16x384xf32>
    %44 = tpu.matmul %43, %1, %cst_23 {dimension_numbers = #tpu.dot_dimension_numbers<[1], [0], [0], [1], [0, 0, 1, 1], [], []>} : vector<16x128xf32>, vector<128x384xf32>, vector<16x384xf32> -> vector<16x384xf32>
    %45 = vector.broadcast %4 : vector<1x384xf32> to vector<16x384xf32>
    %46 = arith.addf %44, %45 : vector<16x384xf32>
    %47 = math.tanh %46 : vector<16x384xf32>
    %48 = vector.extract_strided_slice %47 {offsets = [0, 0], sizes = [16, 128], strides = [1, 1]} : vector<16x384xf32> to vector<16x128xf32>
    %49 = vector.extract_strided_slice %47 {offsets = [0, 128], sizes = [16, 128], strides = [1, 1]} : vector<16x384xf32> to vector<16x128xf32>
    %50 = vector.extract_strided_slice %47 {offsets = [0, 256], sizes = [16, 128], strides = [1, 1]} : vector<16x384xf32> to vector<16x128xf32>
    %cst_24 = arith.constant dense<0.000000e+00> : vector<16x8xf32>
    %51 = tpu.matmul %48, %6, %cst_24 {dimension_numbers = #tpu.dot_dimension_numbers<[1], [1], [0], [0], [0, 0, 1, 0], [], []>} : vector<16x128xf32>, vector<8x128xf32>, vector<16x8xf32> -> vector<16x8xf32>
    %52 = vector.shape_cast %48 : vector<16x128xf32> to vector<2x8x128xf32>
    %53 = vector.shape_cast %49 : vector<16x128xf32> to vector<2x8x128xf32>
    %54 = vector.shape_cast %50 : vector<16x128xf32> to vector<2x8x128xf32>
    "tpu.trace_start"() <{level = 10 : i32, message = "btd,bsd->bts"}> : () -> ()
    %cst_25 = arith.constant dense<0.000000e+00> : vector<2x8x8xf32>
    %55 = tpu.matmul %52, %53, %cst_25 {dimension_numbers = #tpu.dot_dimension_numbers<[2], [2], [1], [1], [0, 0, 0, 1, 1, 1], [0], [0]>} : vector<2x8x128xf32>, vector<2x8x128xf32>, vector<2x8x8xf32> -> vector<2x8x8xf32>
    "tpu.trace_stop"() : () -> ()
    %56 = vector.shape_cast %55 : vector<2x8x8xf32> to vector<16x8xf32>
    %57 = vector.shape_cast %51 : vector<16x8xf32> to vector<16x1x8xf32>
    %cst_26 = arith.constant dense<0.000000e+00> : vector<16x1x8xf32>
    %58 = tpu.matmul %57, %36, %cst_26 {dimension_numbers = #tpu.dot_dimension_numbers<[2], [1], [1], [2], [0, 0, 0, 1, 1, 2], [0], [0]>} : vector<16x1x8xf32>, vector<16x8x8xf32>, vector<16x1x8xf32> -> vector<16x1x8xf32>
    %59 = vector.shape_cast %58 : vector<16x1x8xf32> to vector<16x8xf32>
    %60 = arith.addf %56, %59 : vector<16x8xf32>
    %cst_27 = arith.constant dense<0xFF800000> : vector<16xf32>
    %61 = vector.multi_reduction <maximumf>, %60, %cst_27 [1] : vector<16x8xf32> to vector<16xf32>
    %62 = vector.shape_cast %61 : vector<16xf32> to vector<16x1xf32>
    %63 = vector.broadcast %62 : vector<16x1xf32> to vector<16x8xf32>
    %64 = arith.subf %60, %63 : vector<16x8xf32>
    %65 = math.exp %64 : vector<16x8xf32>
    %cst_28 = arith.constant dense<0.000000e+00> : vector<16xf32>
    %66 = vector.multi_reduction <add>, %65, %cst_28 [1] : vector<16x8xf32> to vector<16xf32>
    %67 = vector.shape_cast %66 : vector<16xf32> to vector<16x1xf32>
    %68 = tpu.reciprocal %67 {approx = true} : vector<16x1xf32> -> vector<16x1xf32>
    %69 = vector.broadcast %68 : vector<16x1xf32> to vector<16x8xf32>
    %70 = arith.mulf %65, %69 : vector<16x8xf32>
    %71 = vector.shape_cast %70 : vector<16x8xf32> to vector<2x8x8xf32>
    "tpu.trace_start"() <{level = 10 : i32, message = "bts,bsd->btd"}> : () -> ()
    %cst_29 = arith.constant dense<0.000000e+00> : vector<2x8x128xf32>
    %72 = tpu.matmul %71, %54, %cst_29 {dimension_numbers = #tpu.dot_dimension_numbers<[2], [1], [1], [2], [0, 0, 0, 1, 1, 2], [0], [0]>} : vector<2x8x8xf32>, vector<2x8x128xf32>, vector<2x8x128xf32> -> vector<2x8x128xf32>
    "tpu.trace_stop"() : () -> ()
    %73 = vector.shape_cast %72 : vector<2x8x128xf32> to vector<16x128xf32>
    %74 = vector.shape_cast %70 : vector<16x8xf32> to vector<16x1x8xf32>
    %cst_30 = arith.constant dense<0.000000e+00> : vector<16x1x8xf32>
    %75 = tpu.matmul %74, %36, %cst_30 {dimension_numbers = #tpu.dot_dimension_numbers<[2], [2], [1], [1], [0, 0, 0, 1, 1, 1], [0], [0]>} : vector<16x1x8xf32>, vector<16x8x8xf32>, vector<16x1x8xf32> -> vector<16x1x8xf32>
    %76 = vector.shape_cast %75 : vector<16x1x8xf32> to vector<16x8xf32>
    %cst_31 = arith.constant dense<0.000000e+00> : vector<16x128xf32>
    %77 = tpu.matmul %76, %7, %cst_31 {dimension_numbers = #tpu.dot_dimension_numbers<[1], [0], [0], [1], [0, 0, 1, 1], [], []>} : vector<16x8xf32>, vector<8x128xf32>, vector<16x128xf32> -> vector<16x128xf32>
    %78 = arith.addf %73, %77 : vector<16x128xf32>
    %cst_32 = arith.constant dense<0.000000e+00> : vector<16x128xf32>
    %79 = tpu.matmul %78, %2, %cst_32 {dimension_numbers = #tpu.dot_dimension_numbers<[1], [0], [0], [1], [0, 0, 1, 1], [], []>} : vector<16x128xf32>, vector<128x128xf32>, vector<16x128xf32> -> vector<16x128xf32>
    %80 = vector.broadcast %5 : vector<1x128xf32> to vector<16x128xf32>
    %81 = arith.addf %79, %80 : vector<16x128xf32>
    %cst_33 = arith.constant 0.000000e+00 : f32
    %82 = vector.broadcast %cst_33 : f32 to vector<16x128xf32>
    %83 = arith.maximumf %81, %82 : vector<16x128xf32>
    %84 = vector.shape_cast %83 : vector<16x128xf32> to vector<2x8x128xf32>
    %c0_34 = arith.constant 0 : index
    %c0_35 = arith.constant 0 : index
    %c0_36 = arith.constant 0 : index
    %85 = vector.load %arg10[%c0_34, %c0_35, %c0_36] : memref<2x8x128xf32, #tpu.memory_space<vmem>>, vector<2x8x128xf32>
    tpu.vector_store %arg10[%c0_34, %c0_35, %c0_36], %84 {strides = array<i32>} : memref<2x8x128xf32, #tpu.memory_space<vmem>>, vector<2x8x128xf32>,
    return
  }
  func.func @transform_0(%arg0: i32) -> (i32, i32, i32) {
    %c0_i32 = arith.constant 0 : i32
    %c0_i32_0 = arith.constant 0 : i32
    %c0_i32_1 = arith.constant 0 : i32
    return %arg0, %c0_i32, %c0_i32_0 : i32, i32, i32
  }
  func.func @transform_1(%arg0: i32) -> (i32, i32) {
    %c0_i32 = arith.constant 0 : i32
    %c0_i32_0 = arith.constant 0 : i32
    %c0_i32_1 = arith.constant 0 : i32
    return %c0_i32, %c0_i32_0 : i32, i32
  }
  func.func @transform_2(%arg0: i32) -> (i32, i32) {
    %c0_i32 = arith.constant 0 : i32
    %c0_i32_0 = arith.constant 0 : i32
    %c0_i32_1 = arith.constant 0 : i32
    return %c0_i32, %c0_i32_0 : i32, i32
  }
  func.func @transform_3(%arg0: i32) -> (i32, i32) {
    %c0_i32 = arith.constant 0 : i32
    %c0_i32_0 = arith.constant 0 : i32
    %c0_i32_1 = arith.constant 0 : i32
    return %c0_i32, %c0_i32_0 : i32, i32
  }
  func.func @transform_4(%arg0: i32) -> (i32, i32) {
    %c0_i32 = arith.constant 0 : i32
    %c0_i32_0 = arith.constant 0 : i32
    %c0_i32_1 = arith.constant 0 : i32
    return %c0_i32, %c0_i32_0 : i32, i32
  }
  func.func @transform_5(%arg0: i32) -> (i32, i32) {
    %c0_i32 = arith.constant 0 : i32
    %c0_i32_0 = arith.constant 0 : i32
    %c0_i32_1 = arith.constant 0 : i32
    return %c0_i32, %c0_i32_0 : i32, i32
  }
  func.func @transform_6(%arg0: i32) -> (i32, i32) {
    %c0_i32 = arith.constant 0 : i32
    %c0_i32_0 = arith.constant 0 : i32
    %c0_i32_1 = arith.constant 0 : i32
    return %c0_i32, %c0_i32_0 : i32, i32
  }
  func.func @transform_7(%arg0: i32) -> (i32, i32) {
    %c0_i32 = arith.constant 0 : i32
    %c0_i32_0 = arith.constant 0 : i32
    %c0_i32_1 = arith.constant 0 : i32
    return %c0_i32, %c0_i32_0 : i32, i32
  }
  func.func @transform_8(%arg0: i32) -> (i32, i32) {
    %c0_i32 = arith.constant 0 : i32
    %c0_i32_0 = arith.constant 0 : i32
    %c0_i32_1 = arith.constant 0 : i32
    return %c0_i32, %c0_i32_0 : i32, i32
  }
  func.func @transform_9(%arg0: i32) -> (i32, i32, i32) {
    %c0_i32 = arith.constant 0 : i32
    %c0_i32_0 = arith.constant 0 : i32
    %c0_i32_1 = arith.constant 0 : i32
    return %arg0, %c0_i32, %c0_i32_0 : i32, i32, i32
  }
}

module attributes {stable_mosaic.version = 11 : i64} {
  func.func @_selfattn_rpr_kernel(%arg0: i32, %arg1: memref<2x8x16xf32, #tpu.memory_space<vmem>>, %arg2: memref<16x128xf32, #tpu.memory_space<vmem>>, %arg3: memref<1x128xf32, #tpu.memory_space<vmem>>, %arg4: memref<128x384xf32, #tpu.memory_space<vmem>>, %arg5: memref<1x384xf32, #tpu.memory_space<vmem>>, %arg6: memref<128x128xf32, #tpu.memory_space<vmem>>, %arg7: memref<1x128xf32, #tpu.memory_space<vmem>>, %arg8: memref<8x128xf32, #tpu.memory_space<vmem>>, %arg9: memref<8x128xf32, #tpu.memory_space<vmem>>, %arg10: memref<2x8x128xf32, #tpu.memory_space<vmem>>) attributes {dimension_semantics = [#tpu.dimension_semantics<parallel>], iteration_bounds = array<i64: 1>, scalar_prefetch = 0 : i64, scratch_operands = 0 : i64, tpu.core_type = #tpu.core_type<tc>, window_params = [{transform_indices = @transform_0, window_bounds = array<i64: 2, 8, 16>}, {pipeline_mode = #tpu.pipeline_mode<synchronous>, transform_indices = @transform_1, window_bounds = array<i64: 16, 128>}, {pipeline_mode = #tpu.pipeline_mode<synchronous>, transform_indices = @transform_2, window_bounds = array<i64: 1, 128>}, {pipeline_mode = #tpu.pipeline_mode<synchronous>, transform_indices = @transform_3, window_bounds = array<i64: 128, 384>}, {pipeline_mode = #tpu.pipeline_mode<synchronous>, transform_indices = @transform_4, window_bounds = array<i64: 1, 384>}, {pipeline_mode = #tpu.pipeline_mode<synchronous>, transform_indices = @transform_5, window_bounds = array<i64: 128, 128>}, {pipeline_mode = #tpu.pipeline_mode<synchronous>, transform_indices = @transform_6, window_bounds = array<i64: 1, 128>}, {pipeline_mode = #tpu.pipeline_mode<synchronous>, transform_indices = @transform_7, window_bounds = array<i64: 8, 128>}, {pipeline_mode = #tpu.pipeline_mode<synchronous>, transform_indices = @transform_8, window_bounds = array<i64: 8, 128>}, {transform_indices = @transform_9, window_bounds = array<i64: 2, 8, 128>}]} {
    %c0 = arith.constant 0 : index
    %c0_0 = arith.constant 0 : index
    %0 = vector.load %arg2[%c0, %c0_0] : memref<16x128xf32, #tpu.memory_space<vmem>>, vector<16x128xf32>
    %c0_1 = arith.constant 0 : index
    %c0_2 = arith.constant 0 : index
    %1 = vector.load %arg4[%c0_1, %c0_2] : memref<128x384xf32, #tpu.memory_space<vmem>>, vector<128x384xf32>
    %c0_3 = arith.constant 0 : index
    %c0_4 = arith.constant 0 : index
    %2 = vector.load %arg6[%c0_3, %c0_4] : memref<128x128xf32, #tpu.memory_space<vmem>>, vector<128x128xf32>
    %c0_5 = arith.constant 0 : index
    %c0_6 = arith.constant 0 : index
    %3 = vector.load %arg3[%c0_5, %c0_6] : memref<1x128xf32, #tpu.memory_space<vmem>>, vector<1x128xf32>
    %c0_7 = arith.constant 0 : index
    %c0_8 = arith.constant 0 : index
    %4 = vector.load %arg5[%c0_7, %c0_8] : memref<1x384xf32, #tpu.memory_space<vmem>>, vector<1x384xf32>
    %c0_9 = arith.constant 0 : index
    %c0_10 = arith.constant 0 : index
    %5 = vector.load %arg7[%c0_9, %c0_10] : memref<1x128xf32, #tpu.memory_space<vmem>>, vector<1x128xf32>
    %c0_11 = arith.constant 0 : index
    %c0_12 = arith.constant 0 : index
    %6 = vector.load %arg8[%c0_11, %c0_12] : memref<8x128xf32, #tpu.memory_space<vmem>>, vector<8x128xf32>
    %c0_13 = arith.constant 0 : index
    %c0_14 = arith.constant 0 : index
    %7 = vector.load %arg9[%c0_13, %c0_14] : memref<8x128xf32, #tpu.memory_space<vmem>>, vector<8x128xf32>
    %8 = tpu.iota {dimensions = array<i32: 0>} : vector<16x8x8xi32>
    %9 = tpu.iota {dimensions = array<i32: 1>} : vector<16x8x8xi32>
    %10 = tpu.iota {dimensions = array<i32: 2>} : vector<16x8x8xi32>
    %c3_i32 = arith.constant 3 : i32
    %11 = vector.broadcast %c3_i32 : i32 to vector<16x8x8xi32>
    %12 = arith.addi %11, %10 : vector<16x8x8xi32>
    %c8_i32 = arith.constant 8 : i32
    %c0_i32 = arith.constant 0 : i32
    %13 = arith.cmpi eq, %c8_i32, %c0_i32 : i32
    %c1_i32 = arith.constant 1 : i32
    %14 = arith.select %13, %c1_i32, %c8_i32 : i32
    %15 = vector.broadcast %14 : i32 to vector<16x8x8xi32>
    %16 = arith.remsi %8, %15 : vector<16x8x8xi32>
    %c0_i32_15 = arith.constant 0 : i32
    %17 = vector.broadcast %c0_i32_15 : i32 to vector<16x8x8xi32>
    %18 = arith.cmpi ne, %16, %17 : vector<16x8x8xi32>
    %c0_i32_16 = arith.constant 0 : i32
    %19 = vector.broadcast %c0_i32_16 : i32 to vector<16x8x8xi32>
    %20 = arith.cmpi slt, %16, %19 : vector<16x8x8xi32>
    %c0_i32_17 = arith.constant 0 : i32
    %21 = arith.cmpi slt, %14, %c0_i32_17 : i32
    %22 = vector.broadcast %21 : i1 to vector<16x8x8xi1>
    %23 = vector.broadcast %22 : vector<16x8x8xi1> to vector<16x8x8xi1>
    %24 = arith.xori %20, %23 : vector<16x8x8xi1>
    %25 = arith.andi %24, %18 : vector<16x8x8xi1>
    %26 = vector.broadcast %14 : i32 to vector<16x8x8xi32>
    %27 = arith.addi %16, %26 : vector<16x8x8xi32>
    %28 = arith.select %25, %27, %16 : vector<16x8x8xi1>, vector<16x8x8xi32>
    %29 = arith.subi %12, %28 : vector<16x8x8xi32>
    %c0_i32_18 = arith.constant 0 : i32
    %c6_i32 = arith.constant 6 : i32
    %30 = vector.broadcast %c0_i32_18 : i32 to vector<16x8x8xi32>
    %31 = arith.maxsi %30, %29 : vector<16x8x8xi32>
    %32 = vector.broadcast %c6_i32 : i32 to vector<16x8x8xi32>
    %33 = arith.minsi %32, %31 : vector<16x8x8xi32>
    %34 = arith.cmpi eq, %9, %33 : vector<16x8x8xi32>
    %35 = arith.extui %34 : vector<16x8x8xi1> to vector<16x8x8xi32>
    %36 = arith.sitofp %35 : vector<16x8x8xi32> to vector<16x8x8xf32>
    %c0_19 = arith.constant 0 : index
    %c0_20 = arith.constant 0 : index
    %c0_21 = arith.constant 0 : index
    %37 = vector.load %arg1[%c0_19, %c0_20, %c0_21] : memref<2x8x16xf32, #tpu.memory_space<vmem>>, vector<2x8x16xf32>
    %38 = vector.shape_cast %37 : vector<2x8x16xf32> to vector<16x16xf32>
    %cst = arith.constant dense<0.000000e+00> : vector<16x128xf32>
    %39 = tpu.matmul %38, %0, %cst {dimension_numbers = #tpu.dot_dimension_numbers<[1], [0], [0], [1], [0, 0, 1, 1], [], []>} : vector<16x16xf32>, vector<16x128xf32>, vector<16x128xf32> -> vector<16x128xf32>
    %40 = vector.broadcast %3 : vector<1x128xf32> to vector<16x128xf32>
    %41 = arith.addf %39, %40 : vector<16x128xf32>
    %cst_22 = arith.constant 0.000000e+00 : f32
    %42 = vector.broadcast %cst_22 : f32 to vector<16x128xf32>
    %43 = arith.maximumf %41, %42 : vector<16x128xf32>
    %cst_23 = arith.constant dense<0.000000e+00> : vector<16x384xf32>
    %44 = tpu.matmul %43, %1, %cst_23 {dimension_numbers = #tpu.dot_dimension_numbers<[1], [0], [0], [1], [0, 0, 1, 1], [], []>} : vector<16x128xf32>, vector<128x384xf32>, vector<16x384xf32> -> vector<16x384xf32>
    %45 = vector.broadcast %4 : vector<1x384xf32> to vector<16x384xf32>
    %46 = arith.addf %44, %45 : vector<16x384xf32>
    %47 = math.tanh %46 : vector<16x384xf32>
    %48 = vector.extract_strided_slice %47 {offsets = [0, 0], sizes = [16, 128], strides = [1, 1]} : vector<16x384xf32> to vector<16x128xf32>
    %49 = vector.extract_strided_slice %47 {offsets = [0, 128], sizes = [16, 128], strides = [1, 1]} : vector<16x384xf32> to vector<16x128xf32>
    %50 = vector.extract_strided_slice %47 {offsets = [0, 256], sizes = [16, 128], strides = [1, 1]} : vector<16x384xf32> to vector<16x128xf32>
    %cst_24 = arith.constant dense<0.000000e+00> : vector<16x8xf32>
    %51 = tpu.matmul %48, %6, %cst_24 {dimension_numbers = #tpu.dot_dimension_numbers<[1], [1], [0], [0], [0, 0, 1, 0], [], []>} : vector<16x128xf32>, vector<8x128xf32>, vector<16x8xf32> -> vector<16x8xf32>
    %52 = vector.shape_cast %48 : vector<16x128xf32> to vector<2x8x128xf32>
    %53 = vector.shape_cast %49 : vector<16x128xf32> to vector<2x8x128xf32>
    %54 = vector.shape_cast %50 : vector<16x128xf32> to vector<2x8x128xf32>
    "tpu.trace_start"() <{level = 10 : i32, message = "btd,bsd->bts"}> : () -> ()
    %cst_25 = arith.constant dense<0.000000e+00> : vector<2x8x8xf32>
    %55 = tpu.matmul %52, %53, %cst_25 {dimension_numbers = #tpu.dot_dimension_numbers<[2], [2], [1], [1], [0, 0, 0, 1, 1, 1], [0], [0]>} : vector<2x8x128xf32>, vector<2x8x128xf32>, vector<2x8x8xf32> -> vector<2x8x8xf32>
    "tpu.trace_stop"() : () -> ()
    %56 = vector.shape_cast %55 : vector<2x8x8xf32> to vector<16x8xf32>
    %57 = vector.shape_cast %51 : vector<16x8xf32> to vector<16x8x1xf32>
    %58 = vector.broadcast %57 : vector<16x8x1xf32> to vector<16x8x8xf32>
    %59 = arith.mulf %58, %36 : vector<16x8x8xf32>
    %cst_26 = arith.constant dense<0.000000e+00> : vector<16x8xf32>
    %60 = vector.multi_reduction <add>, %59, %cst_26 [1] : vector<16x8x8xf32> to vector<16x8xf32>
    %61 = arith.addf %56, %60 : vector<16x8xf32>
    %cst_27 = arith.constant dense<0xFF800000> : vector<16xf32>
    %62 = vector.multi_reduction <maximumf>, %61, %cst_27 [1] : vector<16x8xf32> to vector<16xf32>
    %63 = vector.shape_cast %62 : vector<16xf32> to vector<16x1xf32>
    %64 = vector.broadcast %63 : vector<16x1xf32> to vector<16x8xf32>
    %65 = arith.subf %61, %64 : vector<16x8xf32>
    %66 = math.exp %65 : vector<16x8xf32>
    %cst_28 = arith.constant dense<0.000000e+00> : vector<16xf32>
    %67 = vector.multi_reduction <add>, %66, %cst_28 [1] : vector<16x8xf32> to vector<16xf32>
    %68 = vector.shape_cast %67 : vector<16xf32> to vector<16x1xf32>
    %69 = tpu.reciprocal %68 {approx = true} : vector<16x1xf32> -> vector<16x1xf32>
    %70 = vector.broadcast %69 : vector<16x1xf32> to vector<16x8xf32>
    %71 = arith.mulf %66, %70 : vector<16x8xf32>
    %72 = vector.shape_cast %71 : vector<16x8xf32> to vector<2x8x8xf32>
    "tpu.trace_start"() <{level = 10 : i32, message = "bts,bsd->btd"}> : () -> ()
    %cst_29 = arith.constant dense<0.000000e+00> : vector<2x8x128xf32>
    %73 = tpu.matmul %72, %54, %cst_29 {dimension_numbers = #tpu.dot_dimension_numbers<[2], [1], [1], [2], [0, 0, 0, 1, 1, 2], [0], [0]>} : vector<2x8x8xf32>, vector<2x8x128xf32>, vector<2x8x128xf32> -> vector<2x8x128xf32>
    "tpu.trace_stop"() : () -> ()
    %74 = vector.shape_cast %73 : vector<2x8x128xf32> to vector<16x128xf32>
    %75 = vector.shape_cast %71 : vector<16x8xf32> to vector<16x1x8xf32>
    %76 = vector.broadcast %75 : vector<16x1x8xf32> to vector<16x8x8xf32>
    %77 = arith.mulf %76, %36 : vector<16x8x8xf32>
    %cst_30 = arith.constant dense<0.000000e+00> : vector<16x8xf32>
    %78 = vector.multi_reduction <add>, %77, %cst_30 [2] : vector<16x8x8xf32> to vector<16x8xf32>
    %cst_31 = arith.constant dense<0.000000e+00> : vector<16x128xf32>
    %79 = tpu.matmul %78, %7, %cst_31 {dimension_numbers = #tpu.dot_dimension_numbers<[1], [0], [0], [1], [0, 0, 1, 1], [], []>} : vector<16x8xf32>, vector<8x128xf32>, vector<16x128xf32> -> vector<16x128xf32>
    %80 = arith.addf %74, %79 : vector<16x128xf32>
    %cst_32 = arith.constant dense<0.000000e+00> : vector<16x128xf32>
    %81 = tpu.matmul %80, %2, %cst_32 {dimension_numbers = #tpu.dot_dimension_numbers<[1], [0], [0], [1], [0, 0, 1, 1], [], []>} : vector<16x128xf32>, vector<128x128xf32>, vector<16x128xf32> -> vector<16x128xf32>
    %82 = vector.broadcast %5 : vector<1x128xf32> to vector<16x128xf32>
    %83 = arith.addf %81, %82 : vector<16x128xf32>
    %cst_33 = arith.constant 0.000000e+00 : f32
    %84 = vector.broadcast %cst_33 : f32 to vector<16x128xf32>
    %85 = arith.maximumf %83, %84 : vector<16x128xf32>
    %86 = vector.shape_cast %85 : vector<16x128xf32> to vector<2x8x128xf32>
    %c0_34 = arith.constant 0 : index
    %c0_35 = arith.constant 0 : index
    %c0_36 = arith.constant 0 : index
    %87 = vector.load %arg10[%c0_34, %c0_35, %c0_36] : memref<2x8x128xf32, #tpu.memory_space<vmem>>, vector<2x8x128xf32>
    tpu.vector_store %arg10[%c0_34, %c0_35, %c0_36], %86 {strides = array<i32>} : memref<2x8x128xf32, #tpu.memory_space<vmem>>, vector<2x8x128xf32>,
    return
  }
  func.func @transform_0(%arg0: i32) -> (i32, i32, i32) {
    %c0_i32 = arith.constant 0 : i32
    %c0_i32_0 = arith.constant 0 : i32
    %c0_i32_1 = arith.constant 0 : i32
    return %arg0, %c0_i32, %c0_i32_0 : i32, i32, i32
  }
  func.func @transform_1(%arg0: i32) -> (i32, i32) {
    %c0_i32 = arith.constant 0 : i32
    %c0_i32_0 = arith.constant 0 : i32
    %c0_i32_1 = arith.constant 0 : i32
    return %c0_i32, %c0_i32_0 : i32, i32
  }
  func.func @transform_2(%arg0: i32) -> (i32, i32) {
    %c0_i32 = arith.constant 0 : i32
    %c0_i32_0 = arith.constant 0 : i32
    %c0_i32_1 = arith.constant 0 : i32
    return %c0_i32, %c0_i32_0 : i32, i32
  }
  func.func @transform_3(%arg0: i32) -> (i32, i32) {
    %c0_i32 = arith.constant 0 : i32
    %c0_i32_0 = arith.constant 0 : i32
    %c0_i32_1 = arith.constant 0 : i32
    return %c0_i32, %c0_i32_0 : i32, i32
  }
  func.func @transform_4(%arg0: i32) -> (i32, i32) {
    %c0_i32 = arith.constant 0 : i32
    %c0_i32_0 = arith.constant 0 : i32
    %c0_i32_1 = arith.constant 0 : i32
    return %c0_i32, %c0_i32_0 : i32, i32
  }
  func.func @transform_5(%arg0: i32) -> (i32, i32) {
    %c0_i32 = arith.constant 0 : i32
    %c0_i32_0 = arith.constant 0 : i32
    %c0_i32_1 = arith.constant 0 : i32
    return %c0_i32, %c0_i32_0 : i32, i32
  }
  func.func @transform_6(%arg0: i32) -> (i32, i32) {
    %c0_i32 = arith.constant 0 : i32
    %c0_i32_0 = arith.constant 0 : i32
    %c0_i32_1 = arith.constant 0 : i32
    return %c0_i32, %c0_i32_0 : i32, i32
  }
  func.func @transform_7(%arg0: i32) -> (i32, i32) {
    %c0_i32 = arith.constant 0 : i32
    %c0_i32_0 = arith.constant 0 : i32
    %c0_i32_1 = arith.constant 0 : i32
    return %c0_i32, %c0_i32_0 : i32, i32
  }
  func.func @transform_8(%arg0: i32) -> (i32, i32) {
    %c0_i32 = arith.constant 0 : i32
    %c0_i32_0 = arith.constant 0 : i32
    %c0_i32_1 = arith.constant 0 : i32
    return %c0_i32, %c0_i32_0 : i32, i32
  }
  func.func @transform_9(%arg0: i32) -> (i32, i32, i32) {
    %c0_i32 = arith.constant 0 : i32
    %c0_i32_0 = arith.constant 0 : i32
    %c0_i32_1 = arith.constant 0 : i32
    return %arg0, %c0_i32, %c0_i32_0 : i32, i32, i32
  }
}

</mosaic_0001>

<bundles_post_ra>
// kernel: tpu_custom_call.1
= control target key start
LH: loop header
LB: loop body
LE: loop exit
PB: predicated region body
PF: predicated region fallthrough
CT: control target
= control target key end

     0   :  { %14 = vsyncpa [#allocation3], 0  ;;  %s4851_s0 = inlined_call_operand.hbm [shape: f32[2,8,16], index: 0, kind: input, shape index: {}]   ;;  %s4852_s1 = inlined_call_operand.hbm [shape: f32[16,128], index: 1, kind: input, shape index: {}]   ;;  %s4853_s2 = inlined_call_operand.vmem [shape: f32[1,128], index: 2, kind: input, shape index: {}]   ;;  %s4854_s3 = inlined_call_operand.hbm [shape: f32[128,384], index: 3, kind: input, shape index: {}]   ;;  %s4855_s4 = inlined_call_operand.vmem [shape: f32[1,384], index: 4, kind: input, shape index: {}]   ;;  %s4856_s5 = inlined_call_operand.hbm [shape: f32[128,128], index: 5, kind: input, shape index: {}]   ;;  %s4857_s6 = inlined_call_operand.hbm [shape: f32[1,128], index: 6, kind: input, shape index: {}]   ;;  %s4858_s7 = inlined_call_operand.vmem [shape: f32[8,128], index: 7, kind: input, shape index: {}]   ;;  %s4859_s8 = inlined_call_operand.hbm [shape: f32[8,128], index: 8, kind: input, shape index: {}]   ;;  %s4860_s9 = inlined_call_operand.hbm [shape: f32[2,8,128], index: 9, kind: output, shape index: {}]  }
   0x1   :  { %15 = vsyncpa [#allocation6], 0 }
   0x2   :  { %16 = vsyncpa [#allocation9], 0 }
   0x3   :  { %17 = vsyncpa [#allocation12], 0 }
   0x4   :  { %18 = vsyncpa [#allocation4], 0  ;;  %s4366_s30 = smov [#allocation5]   ;;  %s4367_s11 = smov [#allocation8]  }
   0x5   :  { %s36_s10 = sshll.u32 %s4366_s30, 4  ;;  %s64_s12 = sshll.u32 %s4367_s11, 4  ;;  %s37_s10 = int_to_ptr.vmem [resolvable:$true] %s36_s10  ;;  %s65_s12 = int_to_ptr.vmem [resolvable:$true] %s64_s12 }
   0x6   :  { %s4224_s13 = scalar_lea.vmem %s37_s10, 256  ;;  %p4229_p1 = scmp.lt.s32.totalorder %s37_s10, %s37_s10 }
   0x7   :  { %p4225_p0 = scmp.ne.s32.totalorder %s37_s10, %s4224_s13  ;;  %p4230_p2 = scmp.lt.s32.totalorder %s4224_s13, %s4224_s13 }
   0x9   :  { %p4231_p3 = por %p4230_p2, %p4229_p1 }
   0xb   :  { %p4232_p4 = pnand %p4231_p3, %p4225_p0 }
   0xd   :  { %4235 = shalt.err (!%p4232_p4)
}
   0xe   :  { %s4368_s14 = smov 128   ;;  %s4369_s15 = smov 8  }
   0xf   :  { %42 = dma.hbm_to_vmem [thread:$0]  %s4852_s1, 256, %s37_s10, [#allocation6], %s4368_s14, %s4368_s14, %s4369_s15  }
  0x10   :  { %s4244_s18 = scalar_lea.vmem %s65_s12, 2048  ;;  %p4249_p6 = scmp.lt.s32.totalorder %s65_s12, %s65_s12 }
  0x11   :  { %p4245_p5 = scmp.ne.s32.totalorder %s65_s12, %s4244_s18  ;;  %p4250_p7 = scmp.lt.s32.totalorder %s4244_s18, %s4244_s18 }
  0x13   :  { %p4251_p8 = por %p4250_p7, %p4249_p6 }
  0x15   :  { %p4252_p9 = pnand %p4251_p8, %p4245_p5 }
  0x17   :  { %4255 = shalt.err (!%p4252_p9)
}
  0x18   :  { %70 = dma.hbm_to_vmem [thread:$0]  %s4856_s5, 2048, %s65_s12, [#allocation9], %s4368_s14, %s4368_s14, %s4369_s15  }
  0x19   :  { %s4370_s21 = smov [#allocation2]   ;;  %s4371_s23 = smov [#allocation7]  }
  0x1a   :  { %s24_s22 = sshll.u32 %s4370_s21, 4  ;;  %s50_s24 = sshll.u32 %s4371_s23, 4  ;;  %s25_s22 = int_to_ptr.vmem [resolvable:$true] %s24_s22  ;;  %s51_s24 = int_to_ptr.vmem [resolvable:$true] %s50_s24 }
  0x1b   :  { %s4264_s1 = scalar_lea.vmem %s25_s22, 256  ;;  %p4269_p11 = scmp.lt.s32.totalorder %s25_s22, %s25_s22 }
  0x1c   :  { %p4265_p10 = scmp.ne.s32.totalorder %s25_s22, %s4264_s1  ;;  %p4270_p12 = scmp.lt.s32.totalorder %s4264_s1, %s4264_s1 }
  0x1e   :  { %p4271_p13 = por %p4270_p12, %p4269_p11 }
  0x20   :  { %p4272_p0 = pnand %p4271_p13, %p4265_p10 }
  0x22   :  { %4275 = shalt.err (!%p4272_p0)
}
  0x23   :  { %30 = dma.hbm_to_vmem [thread:$0]  %s4851_s0, 256, %s25_s22, [#allocation3], %s4368_s14, %s4368_s14, %s4369_s15  }
  0x24   :  { %s4284_s5 = scalar_lea.vmem %s51_s24, 6144  ;;  %p4289_p2 = scmp.lt.s32.totalorder %s51_s24, %s51_s24 }
  0x25   :  { %p4285_p1 = scmp.ne.s32.totalorder %s51_s24, %s4284_s5  ;;  %p4290_p3 = scmp.lt.s32.totalorder %s4284_s5, %s4284_s5 }
  0x27   :  { %p4291_p4 = por %p4290_p3, %p4289_p2 }
  0x29   :  { %p4292_p5 = pnand %p4291_p4, %p4285_p1 }
  0x2b   :  { %4295 = shalt.err (!%p4292_p5)
}
  0x2c   :  { %s4372_s27 = smov 384   ;;  %s4373_s28 = smov 24  }
  0x2d   :  { %56 = dma.hbm_to_vmem [thread:$0]  %s4854_s3, 6144, %s51_s24, [#allocation6], %s4372_s27, %s4372_s27, %s4373_s28  }
  0x2e   :  { %s4374_s10 = smov [#allocation10]   ;;  %s4375_s12 = smov [#allocation11]  }
  0x2f   :  { %s77_s11 = sshll.u32 %s4374_s10, 4  ;;  %s89_s13 = sshll.u32 %s4375_s12, 4  ;;  %s78_s11 = int_to_ptr.vmem [resolvable:$true] %s77_s11  ;;  %s90_s13 = int_to_ptr.vmem [resolvable:$true] %s89_s13 }
  0x30   :  { %s4304_s0 = scalar_lea.vmem %s78_s11, 16  ;;  %s4308_s16 = scalar_lea.vmem %s78_s11, 32 }
  0x31   :  { %p4305_p6 = scmp.ne.s32.totalorder %s78_s11, %s4304_s0  ;;  %p4309_p7 = scmp.lt.s32.totalorder %s78_s11, %s78_s11 }
  0x32   :  { %p4310_p8 = scmp.lt.s32.totalorder %s4308_s16, %s4304_s0 }
  0x34   :  { %p4311_p9 = por %p4310_p8, %p4309_p7 }
  0x36   :  { %p4312_p10 = pnand %p4311_p9, %p4305_p6 }
  0x38   :  { %4315 = shalt.err (!%p4312_p10)
}
  0x39   :  { %80 = dma.hbm_to_vmem [thread:$0]  %s4857_s6, 16, %s78_s11, [#allocation9]  }
  0x3a   :  { %s4324_s19 = scalar_lea.vmem %s90_s13, 128  ;;  %p4329_p12 = scmp.lt.s32.totalorder %s90_s13, %s90_s13 }
  0x3b   :  { %p4325_p11 = scmp.ne.s32.totalorder %s90_s13, %s4324_s19  ;;  %p4330_p13 = scmp.lt.s32.totalorder %s4324_s19, %s4324_s19 }
  0x3d   :  { %p4331_p0 = por %p4330_p13, %p4329_p12 }
  0x3f   :  { %p4332_p1 = pnand %p4331_p0, %p4325_p11 }
  0x41   :  { %4335 = shalt.err (!%p4332_p1)
}
  0x42   :  { %92 = dma.hbm_to_vmem [thread:$0]  %s4859_s8, 128, %s90_s13, [#allocation12]  }
  0x43   :  { %4356 = dma.done.wait [#allocation3], 256  }
  0x44   :  { %4357 = vsyncadd [#allocation3], 4294967040 }
  0x45   :  { %4358 = dma.done.wait [#allocation6], 6400  }
  0x46   :  { %4359 = vsyncadd [#allocation6], 4294960896 }
  0x47   :  { %4360 = dma.done.wait [#allocation9], 2064  }
  0x48   :  { %4361 = vsyncadd [#allocation9], 4294965232 }
  0x49   :  { %4362 = dma.done.wait [#allocation12], 128  }
  0x4a   :  { %4363 = vsyncadd [#allocation12], 4294967168  ;;  %vm257_vm0 = vcmask 130048   ;;  %v112_v0 = vld [vmem:[#allocation5 + $0x8] sm:$0xff]  ;;  %v111_v1 = vld [vmem:[#allocation5] sm:$0xff]  ;;  %v4376_v52 = vmov 0.0   ;;  %v182_v61 = vlaneseq }
  0x4b   :  { %v249_v2 = vld [vmem:[#allocation2] sm:$0xff]  ;;  %3914 = vmatprep.subr.mxu1 %v112_v0  ;;  %v250_v3 = vld [vmem:[#allocation2 + $0x8] sm:$0xff]  ;;  %v159_v4 = vld [vmem:[#allocation7 + $0x170] sm:$0xff]  ;;  %vm4377_vm1 = vmmov 0   ;;  %vm830_vm12 = vcmask 64512  }
  0x4c   :  { %3918 = vmatprep.mubr.msk.f32.mxu1 %vm257_vm0, %v249_v2  ;;  %3915 = vmatpush3.msra.mxu1 %v112_v0  ;;  %v160_v5 = vld [vmem:[#allocation7 + $0x178] sm:$0xff]  ;;  %v158_v6 = vld [vmem:[#allocation7 + $0x168] sm:$0xff]  ;;  %v157_v7 = vld [vmem:[#allocation7 + $0x160] sm:$0xff]  ;;  %v4472_v62 = vshrl.u32 %v182_v61, 7 }
  0x4d   :  { %3916 = vmatprep.subr.mxu1 %v111_v1  ;;  %3921 = vmatprep.subr.mxu0 %v160_v5  ;;  %v156_v8 = vld [vmem:[#allocation7 + $0x158] sm:$0xff]  ;;  %v155_v9 = vld [vmem:[#allocation7 + $0x150] sm:$0xff]  ;;  %v154_v10 = vld [vmem:[#allocation7 + $0x148] sm:$0xff] }
  0x4e   :  { %3917 = vmatpush3.msra.mxu1 %v111_v1  ;;  %3922 = vmatpush3.msra.mxu0 %v160_v5  ;;  %v153_v11 = vld [vmem:[#allocation7 + $0x140] sm:$0xff]  ;;  %v152_v12 = vld [vmem:[#allocation7 + $0x138] sm:$0xff]  ;;  %v151_v13 = vld [vmem:[#allocation7 + $0x130] sm:$0xff]  ;;  %v344_v63 = vsub.s32 0, %v4472_v62  ;;  %v348_v1 = vsub.s32 1, %v4472_v62 }
  0x4f   :  { %3919 = vmatmul.mubr.msk.f32.vlgmr.msra.gmra.mxu1 %vm257_vm0, %v250_v3  ;;  %357 = vmatprep.subr.mxu1 %v159_v4  ;;  %v150_v14 = vld [vmem:[#allocation7 + $0x128] sm:$0xff]  ;;  %v149_v15 = vld [vmem:[#allocation7 + $0x120] sm:$0xff]  ;;  %v148_v16 = vld [vmem:[#allocation7 + $0x118] sm:$0xff] }
  0x50   :  { %358 = vmatpush1.msra.mxu1 %v158_v6  ;;  %3923 = vmatprep.subr.mxu0 %v157_v7  ;;  %v147_v17 = vld [vmem:[#allocation7 + $0x110] sm:$0xff]  ;;  %v146_v18 = vld [vmem:[#allocation7 + $0x108] sm:$0xff]  ;;  %v145_v19 = vld [vmem:[#allocation7 + $0x100] sm:$0xff] }
  0x51   :  { %359 = vmatprep.subr.mxu1 %v156_v8  ;;  %3924 = vmatpush3.msra.mxu0 %v157_v7  ;;  %v144_v20 = vld [vmem:[#allocation7 + $0xf8] sm:$0xff]  ;;  %v143_v21 = vld [vmem:[#allocation7 + $0xf0] sm:$0xff]  ;;  %v142_v22 = vld [vmem:[#allocation7 + $0xe8] sm:$0xff] }
  0x52   :  { %360 = vmatpush1.msra.mxu1 %v155_v9  ;;  %3925 = vmatprep.subr.mxu0 %v154_v10  ;;  %v141_v23 = vld [vmem:[#allocation7 + $0xe0] sm:$0xff]  ;;  %v140_v24 = vld [vmem:[#allocation7 + $0xd8] sm:$0xff]  ;;  %v139_v25 = vld [vmem:[#allocation7 + $0xd0] sm:$0xff] }
  0x53   :  { %361 = vmatprep.subr.mxu1 %v153_v11  ;;  %3926 = vmatpush3.msra.mxu0 %v154_v10  ;;  %v138_v26 = vld [vmem:[#allocation7 + $0xc8] sm:$0xff]  ;;  %v137_v27 = vld [vmem:[#allocation7 + $0xc0] sm:$0xff]  ;;  %v136_v28 = vld [vmem:[#allocation7 + $0xb8] sm:$0xff] }
  0x54   :  { %362 = vmatpush1.msra.mxu1 %v152_v12  ;;  %3927 = vmatprep.subr.mxu0 %v151_v13  ;;  %v135_v29 = vld [vmem:[#allocation7 + $0xb0] sm:$0xff]  ;;  %v134_v30 = vld [vmem:[#allocation7 + $0xa8] sm:$0xff]  ;;  %v133_v31 = vld [vmem:[#allocation7 + $0xa0] sm:$0xff] }
  0x55   :  { %363 = vmatprep.subr.mxu1 %v150_v14  ;;  %3928 = vmatpush3.msra.mxu0 %v151_v13  ;;  %v132_v32 = vld [vmem:[#allocation7 + $0x98] sm:$0xff]  ;;  %v131_v33 = vld [vmem:[#allocation7 + $0x90] sm:$0xff]  ;;  %v130_v34 = vld [vmem:[#allocation7 + $0x88] sm:$0xff] }
  0x56   :  { %364 = vmatpush1.msra.mxu1 %v149_v15  ;;  %3929 = vmatprep.subr.mxu0 %v148_v16  ;;  %v129_v35 = vld [vmem:[#allocation7 + $0x80] sm:$0xff]  ;;  %v128_v36 = vld [vmem:[#allocation7 + $0x78] sm:$0xff]  ;;  %v127_v37 = vld [vmem:[#allocation7 + $0x70] sm:$0xff] }
  0x57   :  { %365 = vmatprep.subr.mxu1 %v147_v17  ;;  %3930 = vmatpush3.msra.mxu0 %v148_v16  ;;  %v126_v38 = vld [vmem:[#allocation7 + $0x68] sm:$0xff]  ;;  %v125_v39 = vld [vmem:[#allocation7 + $0x60] sm:$0xff]  ;;  %v123_v40 = vld [vmem:[#allocation7 + $0x50] sm:$0xff]  ;;  %v185_v16 = vand.u32 127, %v182_v61 }
  0x58   :  { %366 = vmatpush1.msra.mxu1 %v146_v18  ;;  %3931 = vmatprep.subr.mxu0 %v145_v19  ;;  %v122_v41 = vld [vmem:[#allocation7 + $0x48] sm:$0xff]  ;;  %v124_v42 = vld [vmem:[#allocation7 + $0x58] sm:$0xff]  ;;  %v119_v44 = vld [vmem:[#allocation7 + $0x30] sm:$0xff] }
  0x59   :  { %367 = vmatprep.subr.mxu1 %v144_v20  ;;  %3932 = vmatpush3.msra.mxu0 %v145_v19  ;;  %v120_v43 = vld [vmem:[#allocation7 + $0x38] sm:$0xff]  ;;  %v121_v45 = vld [vmem:[#allocation7 + $0x40] sm:$0xff]  ;;  %v118_v48 = vld [vmem:[#allocation7 + $0x28] sm:$0xff]  ;;  %v186_v17 = vadd.s32 3, %v185_v16  ;;  %vm199_vm4 = vcmp.gt.s32.totalorder %v185_v16, 0  ;;  %v4378_v19 = vmov 1.0  }
  0x5a   :  { %368 = vmatpush1.msra.mxu1 %v143_v21  ;;  %3933 = vmatprep.subr.mxu0 %v142_v22  ;;  %v117_v46 = vld [vmem:[#allocation7 + $0x20] sm:$0xff]  ;;  %v116_v47 = vld [vmem:[#allocation7 + $0x18] sm:$0xff]  ;;  %v114_v49 = vld [vmem:[#allocation7 + $0x8] sm:$0xff]  ;;  %v200_v20 = vsel %vm199_vm4, %v185_v16, 0 }
  0x5b   :  { %369 = vmatprep.subr.mxu1 %v141_v23  ;;  %3934 = vmatpush3.msra.mxu0 %v142_v22  ;;  %v113_v50 = vld [vmem:[#allocation7] sm:$0xff]  ;;  %v115_v51 = vld [vmem:[#allocation7 + $0x10] sm:$0xff]  ;;  %vm209_vm2 = vcmp.lt.s32.totalorder %v186_v17, 6  ;;  %vm215_vm5 = vcmp.lt.s32.totalorder %v200_v20, 6  ;;  %v4379_v22 = vmov 1966171168  }
  0x5c   :  { %370 = vmatpush1.msra.mxu1 %v140_v24  ;;  %3935 = vmatprep.subr.mxu0 %v139_v25  ;;  %v3724_v53 = vld [vmem:[%s4853_s2] ss:$0 sm:$0xff]  ;;  %v4491_v18 = vsel %vm209_vm2, %v186_v17, 6  ;;  %v4500_v21 = vsel %vm215_vm5, %v200_v20, 6  ;;  %v734_v23 = vunpack.c.l.s4 %v4379_v22  ;;  %v3710_v24 = vadd.s32 4294967295, %v186_v17 }
  0x5d   :  { %371 = vmatprep.subr.mxu1 %v138_v26  ;;  %3936 = vmatpush3.msra.mxu0 %v139_v25  ;;  %v180_v60 = vld [vmem:[%s4858_s7] sm:$0xff]  ;;  %vm225_vm3 = vcmp.eq.s32.totalorder %v4472_v62, %v4491_v18  ;;  %vm228_vm6 = vcmp.eq.s32.totalorder %v4472_v62, %v4500_v21  ;;  %v3713_v25 = vadd.s32 4294967291, %v186_v17  ;;  %v3712_v26 = vadd.s32 4294967292, %v186_v17 }
  0x5e   :  { %372 = vmatpush1.msra.mxu1 %v137_v27  ;;  %3937 = vmatprep.subr.mxu0 %v136_v28  ;;  %v4478_v0 = vld [vmem:[%s4855_s4] sm:$0x7]  ;;  %v735_v27 = vunpack.c.0.s8 %v734_v23  ;;  %vm211_vm7 = vcmp.lt.s32.totalorder %v3710_v24, 6  ;;  %s4380_s4 = smov [#allocation13]  }
  0x5f   :  { %373 = vmatprep.subr.mxu1 %v135_v29  ;;  %3938 = vmatpush3.msra.mxu0 %v136_v28  ;;  %v345_v2 = vrot.slane %v4478_v0, %v344_v63  ;;  %v349_v4 = vrot.slane %v4478_v0, %v348_v1  ;;  %vm203_vm8 = vcmp.gt.s32.totalorder %v3713_v25, 0  ;;  %v3715_v28 = vadd.s32 4294967289, %v186_v17  ;;  %s3695_s7 = sshll.u32 %s4380_s4, 4  ;;  %s3696_s7 = int_to_ptr.vmem [resolvable:$true] %s3695_s7 }
  0x60   :  { %374 = vmatpush1.msra.mxu1 %v134_v30  ;;  %3939 = vmatprep.subr.mxu0 %v133_v31  ;;  %v3711_v30 = vadd.s32 4294967294, %v186_v17  ;;  %vm201_vm9 = vcmp.gt.s32.totalorder %v3712_v26, 0  ;;  %s4336_s24 = scalar_lea.vmem %s3696_s7, 256  ;;  %p4341_p3 = scmp.lt.s32.totalorder %s3696_s7, %s3696_s7 }
  0x61   :  { %375 = vmatprep.subr.mxu1 %v132_v32  ;;  %3940 = vmatpush3.msra.mxu0 %v133_v31  ;;  %v3714_v31 = vadd.s32 4294967290, %v186_v17  ;;  %v4512_v32 = vsub.s32 %v735_v27, %v4472_v62  ;;  %vm207_vm10 = vcmp.gt.s32.totalorder %v3715_v28, 0  ;;  %p4337_p2 = scmp.ne.s32.totalorder %s3696_s7, %s4336_s24  ;;  %p4342_p4 = scmp.lt.s32.totalorder %s4336_s24, %s4336_s24 }
  0x62   :  { %376 = vmatpush1.msra.mxu1 %v131_v33  ;;  %3941 = vmatprep.subr.mxu0 %v130_v34  ;;  %vm213_vm11 = vcmp.lt.s32.totalorder %v3711_v30, 6 }
  0x63   :  { %377 = vmatprep.subr.mxu1 %v129_v35  ;;  %3942 = vmatpush3.msra.mxu0 %v130_v34  ;;  %v4514_v34 = vsel %vm211_vm7, %v3710_v24, 6  ;;  %v204_v35 = vsel %vm203_vm8, %v3713_v25, 0  ;;  %vm205_vm15 = vcmp.gt.s32.totalorder %v3714_v31, 0  ;;  %p4343_p5 = por %p4342_p4, %p4341_p3 }
  0x64   :  { %378 = vmatpush1.msra.mxu1 %v128_v36  ;;  %3943 = vmatprep.subr.mxu0 %v127_v37  ;;  %vm226_vm13 = vcmp.eq.s32.totalorder %v4472_v62, %v4514_v34  ;;  %vm219_vm14 = vcmp.lt.s32.totalorder %v204_v35, 6 }
  0x65   :  { %379 = vmatprep.subr.mxu1 %v126_v38  ;;  %3944 = vmatpush3.msra.mxu0 %v127_v37  ;;  %p4344_p6 = pnand %p4343_p5, %p4337_p2 }
  0x66   :  { %380 = vmatpush1.msra.mxu1 %v125_v39  ;;  %3945 = vmatprep.subr.mxu0 %v124_v42  ;;  %v202_v39 = vsel %vm201_vm9, %v3712_v26, 0 }
  0x67   :  { %381 = vmatprep.subr.mxu1 %v123_v40  ;;  %3946 = vmatpush3.msra.mxu0 %v124_v42  ;;  %vm217_vm0 = vcmp.lt.s32.totalorder %v202_v39, 6 }
  0x68   :  { %382 = vmatpush1.msra.mxu1 %v122_v41  ;;  %3947 = vmatprep.subr.mxu0 %v121_v45 }
  0x69   :  { %383 = vmatprep.subr.mxu1 %v120_v43  ;;  %3948 = vmatpush3.msra.mxu0 %v121_v45  ;;  %v4523_v45 = vsel %vm213_vm11, %v3711_v30, 6  ;;  %vm2000_vm11 = vcmask 1041409  }
  0x6a   :  { %384 = vmatpush1.msra.mxu1 %v119_v44  ;;  %3949 = vmatprep.subr.mxu0 %v118_v48  ;;  %v208_v44 = vsel %vm207_vm10, %v3715_v28, 0  ;;  %vm227_vm4 = vcmp.eq.s32.totalorder %v4472_v62, %v4523_v45 }
  0x6b   :  { %385 = vmatprep.subr.mxu1 %v117_v46  ;;  %3950 = vmatpush3.msra.mxu0 %v118_v48  ;;  %v4529_v48 = vsel %vm219_vm14, %v204_v35, 6  ;;  %vm223_vm2 = vcmp.lt.s32.totalorder %v208_v44, 6  ;;  %vm2003_vm14 = vcmask 1042434   ;;  %v3718_v18 = vsel %vm227_vm4, 1.0, %v4376_v52 }
  0x6c   :  { %386 = vmatpush1.msra.mxu1 %v116_v47  ;;  %421 = vmatprep.mubr.f32.mxu1 %v4376_v52  ;;  %vm230_vm5 = vcmp.eq.s32.totalorder %v4472_v62, %v4529_v48 }
  0x6d   :  { %387 = vmatprep.subr.mxu1 %v114_v49  ;;  %3951 = vmatprep.subr.mxu0 %v115_v51  ;;  %v206_v49 = vsel %vm205_vm15, %v3714_v31, 0  ;;  %vm2006_vm15 = vcmask 1043459  }
  0x6e   :  { %388 = vmatpush1.msra.mxu1 %v113_v50  ;;  %3952 = vmatpush3.msra.mxu0 %v115_v51  ;;  %vm221_vm7 = vcmp.lt.s32.totalorder %v206_v49, 6 }
  0x6f   :  { %3986 = vmatprep.subr.mxu0 %v4376_v52  ;;  %3956 = vmatprep.subr.mxu1 %v180_v60 }
 0x10f   :  { %v3920_v54 = vpop.f32.mrf.mxu1 }
 0x110   :  { %v336_v55 = vadd.f32 %v3920_v54, %v3724_v53  ;;  %v4540_v54 = vsel %vm217_vm0, %v202_v39, 6  ;;  %vm2009_vm0 = vcmask 1044484  }
 0x111   :  { %v330_v56 = vpop.f32.mrf.mxu1  ;;  %vm229_vm8 = vcmp.eq.s32.totalorder %v4472_v62, %v4540_v54 }
 0x112   :  { %v331_v57 = vadd.f32 %v3724_v53, %v330_v56  ;;  %v340_v59 = vmax.f32 %v336_v55, 0.0  ;;  %v352_v55 = vsub.s32 2, %v4472_v62  ;;  %v4547_v56 = vsel %vm223_vm2, %v208_v44, 6 }
 0x113   :  { %vm4861_vm9 = vcmp.eq.s32.totalorder %v4472_v62, %v4547_v56  ;;  %vm2012_vm2 = vcmask 1045509  }
 0x114   :  { %v339_v58 = vmax.f32 %v331_v57, 0.0  ;;  %v353_v61 = vrot.slane %v4478_v0, %v352_v55 }
 0x116   :  { %422 = vmatmul.mubr.f32.vlgmr.msra.gmra.mxu1 %v339_v58  ;;  %3953 = vmatprep.mubr.f32.mxu0 %v339_v58 }
 0x117   :  { %3954 = vmatmul.mubr.f32.vlgmr.msra.gmra.mxu0 %v340_v59  ;;  %427 = vmatprep.mubr.f32.mxu1 %v4376_v52 }
 0x118   :  { %3957 = vmatpush3.xpose.msra.mxu1 %v180_v60  ;;  %3988 = vmatprep.mubr.msk.f32.mxu0 %vm4377_vm1, %v4376_v52  ;;  %v4565_v60 = vsel %vm221_vm7, %v206_v49, 6  ;;  %vm2015_vm7 = vcmask 1046534  }
 0x119   :  { %3961 = vmatprep.subr.mxu1 %v4376_v52  ;;  %3987 = vmatpush3.msk.msra.mxu0 %vm228_vm6, %v4378_v19  ;;  %vm231_vm10 = vcmp.eq.s32.totalorder %v4472_v62, %v4565_v60 }
 0x11a   :  { %428 = vmatmul.mubr.f32.gmra.mxu1 %v340_v59  ;;  %3996 = vmatprep.subr.mxu0 %v4376_v52 }
 0x1d6   :  { %v423_v3 = vpop.f32.mrf.mxu1 }
 0x1d7   :  { %v424_v5 = vadd.f32 %v423_v3, %v345_v2  ;;  %v3955_v63 = vpop.f32.mrf.mxu0 }
 0x1d8   :  { %v425_v6 = vpop.f32.mrf.mxu1 }
 0x1d9   :  { %4196 = vtanh.f32 %v424_v5  ;;  %v426_v7 = vadd.f32 %v425_v6, %v349_v4  ;;  %v500_v5 = vpop.f32.mrf.mxu0 }
 0x1da   :  { %v429_v8 = vpop.f32.mrf.mxu1 }
 0x1db   :  { %v430_v9 = vadd.f32 %v429_v8, %v345_v2 }
 0x1dc   :  { %v431_v10 = vpop.f32.mrf.mxu1 }
 0x1dd   :  { %4198 = vtanh.f32 %v430_v9  ;;  %v432_v11 = vadd.f32 %v431_v10, %v349_v4  ;;  %v506_v4 = vadd.f32 %v3955_v63, %v353_v61  ;;  %v501_v9 = vadd.f32 %v500_v5, %v353_v61 }
 0x1de   :  { %4200 = vtanh.f32 %v426_v7 }
 0x1df   :  { %4202 = vtanh.f32 %v432_v11 }
 0x1e0   :  { %4204 = vtanh.f32 %v506_v4 }
 0x1e1   :  { %4206 = vtanh.f32 %v501_v9 }
 0x1e6   :  { %v4197_v12 = vpop.eup %4196 }
 0x1e7   :  { %3958 = vmatprep.mubr.f32.mxu1 %v4197_v12 }
 0x1ea   :  { %v4199_v13 = vpop.eup %4198 }
 0x1eb   :  { %v4201_v14 = vpop.eup %4200  ;;  %3959 = vmatmul.mubr.f32.vlgmr.msra.gmra.mxu1 %v4199_v13 }
 0x1ec   :  { %3962 = vmatpush3.xpose.msra.mxu1 %v4201_v14  ;;  %3963 = vmatprep.mubr.msk.f32.mxu1 %vm4377_vm1, %v4376_v52  ;;  %v4203_v15 = vpop.eup %4202 }
 0x1ed   :  { %3966 = vmatprep.subr.mxu1 %v4376_v52  ;;  %v4205_v17 = vpop.eup %4204 }
 0x1ee   :  { %v4207_v22 = vpop.eup %4206 }
 0x1ef   :  { %3964 = vmatmul.mubr.f32.vlgmr.msra.gmra.mxu1 %v4197_v12 }
 0x1f0   :  { %3967 = vmatpush3.xpose.msra.mxu1 %v4203_v15  ;;  %3968 = vmatprep.mubr.msk.f32.mxu1 %vm4377_vm1, %v4376_v52 }
 0x1f1   :  { %3971 = vmatprep.subr.mxu1 %v4376_v52 }
 0x1f3   :  { %3969 = vmatmul.mubr.f32.vlgmr.msra.gmra.mxu1 %v4199_v13 }
 0x1f4   :  { %3973 = vmatprep.mubr.msk.f32.mxu1 %vm4377_vm1, %v4376_v52  ;;  %3972 = vmatpush3.msk.msra.mxu1 %vm225_vm3, %v4378_v19 }
 0x1f5   :  { %3976 = vmatprep.subr.mxu1 %v4376_v52 }
 0x2ab   :  { %v4509_v29 = vpop.f32.mrf.mxu1 }
 0x2ac   :  { %v788_v57 = vrot.slane %v4509_v29, %v4512_v32  ;;  %v781_v1 = vcombine.high %v4509_v29, %v4509_v29 }
 0x2ad   :  { %v581_v33 = vpop.f32.mrf.mxu1 }
 0x2ae   :  { %v732_v36 = vcombine.high %v581_v33, %v581_v33  ;;  %v739_v37 = vrot.slane %v581_v33, %v4512_v32  ;;  %v796_v0 = vcombine.high %v788_v57, %v788_v57  ;;  %v795_v6 = vrot.slane %v781_v1, %v4512_v32 }
 0x2af   :  { %v4517_v38 = vpop.f32.mrf.mxu1  ;;  %v804_v11 = vrot.slane %v788_v57, %v4512_v32 }
 0x2b0   :  { %v746_v40 = vrot.slane %v732_v36, %v4512_v32  ;;  %v747_v41 = vcombine.high %v739_v37, %v739_v37  ;;  %v755_v42 = vrot.slane %v739_v37, %v4512_v32  ;;  %v818_v7 = vrot.slane %v796_v0, %v4512_v32 }
 0x2b1   :  { %v3965_v43 = vpop.f32.mrf.mxu1  ;;  %v797_v10 = vcombine.high %v795_v6, %v795_v6  ;;  %v826_v14 = vcombine.high %v804_v11, %v804_v11  ;;  %v811_v15 = vrot.slane %v795_v6, %v4512_v32 }
 0x2b2   :  { %v769_v46 = vrot.slane %v747_v41, %v4512_v32  ;;  %3974 = vmatmul.mubr.msk.f32.vlgmr.msra.gmra.mxu1 %vm830_vm12, %v755_v42  ;;  %v748_v50 = vcombine.high %v746_v40, %v746_v40  ;;  %v777_v59 = vcombine.high %v755_v42, %v755_v42  ;;  %v762_v2 = vrot.slane %v746_v40, %v4512_v32 }
 0x2b3   :  { %v4527_v47 = vpop.f32.mrf.mxu1  ;;  %3977 = vmatpush3.msk.msra.mxu1 %vm226_vm13, %v4378_v19  ;;  %3978 = vmatprep.mubr.msk.f32.mxu1 %vm4377_vm1, %v4376_v52  ;;  %v828_v12 = vcombine.high %v818_v7, %v818_v7  ;;  %v825_v13 = vrot.slane %v797_v10, %v4512_v32  ;;  %v827_v20 = vcombine.high %v811_v15, %v811_v15 }
 0x2b4   :  { %v779_v51 = vcombine.high %v769_v46, %v769_v46  ;;  %3981 = vmatprep.subr.mxu1 %v4376_v52  ;;  %v776_v58 = vrot.slane %v748_v50, %v4512_v32  ;;  %v778_v8 = vcombine.high %v762_v2, %v762_v2 }
 0x2b5   :  { %v3970_v53 = vpop.f32.mrf.mxu1  ;;  %v829_v16 = vcombine.high %v825_v13, %v825_v13 }
 0x2b6   :  { %3979 = vmatmul.mubr.msk.f32.vlgmr.msra.gmra.mxu1 %vm830_vm12, %v769_v46  ;;  %3989 = vmatmul.mubr.msk.f32.vlgmr.msra.gmra.mxu0 %vm830_vm12, %v779_v51  ;;  %v780_v3 = vcombine.high %v776_v58, %v776_v58 }
 0x2b7   :  { %3982 = vmatpush3.msk.msra.mxu1 %vm227_vm4, %v4378_v19  ;;  %3983 = vmatprep.mubr.msk.f32.mxu1 %vm4377_vm1, %v4376_v52 }
 0x2b8   :  { %3991 = vmatprep.subr.mxu1 %v4376_v52  ;;  %3997 = vmatpush3.msk.msra.mxu0 %vm230_vm5, %v4378_v19 }
 0x2b9   :  { %3998 = vmatprep.mubr.msk.f32.mxu0 %vm4377_vm1, %v4376_v52  ;;  %4006 = vmatprep.subr.mxu0 %v4376_v52 }
 0x2ba   :  { %3984 = vmatmul.mubr.msk.f32.vlgmr.msra.gmra.mxu1 %vm830_vm12, %v777_v59  ;;  %3999 = vmatmul.mubr.msk.f32.vlgmr.msra.gmra.mxu0 %vm830_vm12, %v776_v58 }
 0x2bb   :  { %3992 = vmatpush3.msk.msra.mxu1 %vm229_vm8, %v4378_v19  ;;  %3993 = vmatprep.mubr.msk.f32.mxu1 %vm4377_vm1, %v4376_v52 }
 0x2bc   :  { %4001 = vmatprep.subr.mxu1 %v4376_v52  ;;  %4007 = vmatpush3.msk.msra.mxu0 %vm4861_vm9, %v4378_v19 }
 0x2bd   :  { %4008 = vmatprep.mubr.msk.f32.mxu0 %vm4377_vm1, %v4376_v52  ;;  %4016 = vmatprep.subr.mxu0 %v4376_v52 }
 0x2be   :  { %3994 = vmatmul.mubr.msk.f32.vlgmr.msra.gmra.mxu1 %vm830_vm12, %v762_v2  ;;  %4009 = vmatmul.mubr.msk.f32.vlgmr.msra.gmra.mxu0 %vm830_vm12, %v780_v3 }
 0x2bf   :  { %4002 = vmatpush3.msk.msra.mxu1 %vm231_vm10, %v4378_v19  ;;  %4003 = vmatprep.mubr.msk.f32.mxu1 %vm4377_vm1, %v4376_v52 }
 0x2c0   :  { %4011 = vmatprep.subr.mxu1 %v4376_v52  ;;  %4017 = vmatpush3.msk.msra.mxu0 %vm226_vm13, %v4378_v19 }
 0x2c1   :  { %4018 = vmatprep.mubr.msk.f32.mxu0 %vm4377_vm1, %v4376_v52  ;;  %4026 = vmatprep.subr.mxu0 %v4376_v52 }
 0x2c2   :  { %4004 = vmatmul.mubr.msk.f32.vlgmr.msra.gmra.mxu1 %vm830_vm12, %v778_v8  ;;  %4019 = vmatmul.mubr.msk.f32.vlgmr.msra.gmra.mxu0 %vm830_vm12, %v818_v7 }
 0x2c3   :  { %4012 = vmatpush3.msk.msra.mxu1 %vm225_vm3, %v4378_v19  ;;  %4013 = vmatprep.mubr.msk.f32.mxu1 %vm4377_vm1, %v4376_v52 }
 0x2c4   :  { %4021 = vmatprep.subr.mxu1 %v4376_v52  ;;  %4027 = vmatpush3.msk.msra.mxu0 %vm228_vm6, %v4378_v19 }
 0x2c5   :  { %4028 = vmatprep.mubr.msk.f32.mxu0 %vm4377_vm1, %v4376_v52  ;;  %4036 = vmatprep.subr.mxu0 %v4376_v52 }
 0x2c6   :  { %4014 = vmatmul.mubr.msk.f32.vlgmr.msra.gmra.mxu1 %vm830_vm12, %v804_v11  ;;  %4029 = vmatmul.mubr.msk.f32.vlgmr.msra.gmra.mxu0 %vm830_vm12, %v828_v12 }
 0x2c7   :  { %4022 = vmatpush3.msk.msra.mxu1 %vm227_vm4, %v4378_v19  ;;  %4023 = vmatprep.mubr.msk.f32.mxu1 %vm4377_vm1, %v4376_v52 }
 0x2c8   :  { %4031 = vmatprep.subr.mxu1 %v4376_v52  ;;  %4037 = vmatpush3.msk.msra.mxu0 %vm230_vm5, %v4378_v19 }
 0x2c9   :  { %4038 = vmatprep.mubr.msk.f32.mxu0 %vm4377_vm1, %v4376_v52  ;;  %4046 = vmatprep.subr.mxu0 %v4376_v52 }
 0x2ca   :  { %4024 = vmatmul.mubr.msk.f32.vlgmr.msra.gmra.mxu1 %vm830_vm12, %v826_v14  ;;  %4039 = vmatmul.mubr.msk.f32.vlgmr.msra.gmra.mxu0 %vm830_vm12, %v825_v13 }
 0x2cb   :  { %4032 = vmatpush3.msk.msra.mxu1 %vm229_vm8, %v4378_v19  ;;  %4047 = vmatpush3.msk.msra.mxu0 %vm4861_vm9, %v4378_v19  ;;  %vm2018_vm9 = vcmask 1047559  }
 0x2cc   :  { %4033 = vmatprep.mubr.msk.f32.mxu1 %vm4377_vm1, %v4376_v52  ;;  %4041 = vmatprep.subr.mxu1 %v4376_v52 }
 0x2cd   :  { %4048 = vmatprep.mubr.msk.f32.mxu0 %vm4377_vm1, %v4376_v52  ;;  %4056 = vmatprep.subr.mxu0 %v4376_v52 }
 0x2ce   :  { %4034 = vmatmul.mubr.msk.f32.vlgmr.msra.gmra.mxu1 %vm830_vm12, %v811_v15  ;;  %4049 = vmatmul.mubr.msk.f32.vlgmr.msra.gmra.mxu0 %vm830_vm12, %v829_v16 }
 0x2cf   :  { %4042 = vmatpush3.msk.msra.mxu1 %vm231_vm10, %v4378_v19  ;;  %4057 = vmatpush3.msra.mxu0 %v4205_v17 }
 0x2d0   :  { %4043 = vmatprep.mubr.msk.f32.mxu1 %vm4377_vm1, %v4376_v52  ;;  %4051 = vmatprep.subr.mxu1 %v4376_v52 }
 0x2d1   :  { %4058 = vmatprep.mubr.msk.f32.mxu0 %vm4377_vm1, %v4376_v52  ;;  %4066 = vmatprep.subr.mxu0 %v4376_v52 }
 0x2d2   :  { %4044 = vmatmul.mubr.msk.f32.vlgmr.msra.gmra.mxu1 %vm830_vm12, %v827_v20 }
 0x2d3   :  { %4052 = vmatpush3.msra.mxu1 %v4207_v22  ;;  %4053 = vmatprep.mubr.msk.f32.mxu1 %vm4377_vm1, %v4376_v52 }
 0x2d4   :  { %4061 = vmatprep.subr.mxu1 %v4376_v52 }
 0x372   :  { %v899_v19 = vpop.f32.mrf.mxu1 }
 0x374   :  { %v3975_v23 = vpop.f32.mrf.mxu1 }
 0x376   :  { %v971_v24 = vpop.f32.mrf.mxu1  ;;  %v1115_v25 = vpop.f32.mrf.mxu0 }
 0x377   :  { %v1999_v26 = vrot.slane %v971_v24, 7  ;;  %v2005_v39 = vrot.slane %v1115_v25, 5 }
 0x378   :  { %v3980_v27 = vpop.f32.mrf.mxu1  ;;  %v3990_v28 = vpop.f32.mrf.mxu0 }
 0x379   :  { %v2001_v33 = vsel %vm2000_vm11, %v1999_v26, %v899_v19 }
 0x37a   :  { %v1043_v29 = vpop.f32.mrf.mxu1  ;;  %v1259_v30 = vpop.f32.mrf.mxu0 }
 0x37b   :  { %v2002_v31 = vrot.slane %v1043_v29, 6  ;;  %v2011_v50 = vrot.slane %v1259_v30, 3 }
 0x37c   :  { %v3985_v35 = vpop.f32.mrf.mxu1  ;;  %v4000_v36 = vpop.f32.mrf.mxu0 }
 0x37d   :  { %v2004_v37 = vsel %vm2003_vm14, %v2002_v31, %v2001_v33 }
 0x37e   :  { %v1187_v40 = vpop.f32.mrf.mxu1  ;;  %v1403_v41 = vpop.f32.mrf.mxu0  ;;  %v2007_v43 = vsel %vm2006_vm15, %v2005_v39, %v2004_v37 }
 0x37f   :  { %v2008_v42 = vrot.slane %v1187_v40, 4  ;;  %v2017_v57 = vrot.slane %v1403_v41, 1 }
 0x380   :  { %v3995_v44 = vpop.f32.mrf.mxu1  ;;  %v4010_v46 = vpop.f32.mrf.mxu0 }
 0x381   :  { %v2010_v49 = vsel %vm2009_vm0, %v2008_v42, %v2007_v43 }
 0x382   :  { %v1331_v51 = vpop.f32.mrf.mxu1  ;;  %v1547_v53 = vpop.f32.mrf.mxu0  ;;  %v2013_v61 = vsel %vm2012_vm2, %v2011_v50, %v2010_v49 }
 0x383   :  { %v2014_v55 = vrot.slane %v1331_v51, 2  ;;  %v2020_v7 = vrot.slane %v1547_v53, 7  ;;  %v3716_v53 = vsel %vm225_vm3, 1.0, %v4376_v52  ;;  %vm4862_vm3 = vcmp.eq.s32.totalorder %v4472_v62, %v4547_v56 }
 0x384   :  { %v4005_v58 = vpop.f32.mrf.mxu1  ;;  %v4020_v59 = vpop.f32.mrf.mxu0 }
 0x385   :  { %v2016_v63 = vsel %vm2015_vm7, %v2014_v55, %v2013_v61 }
 0x386   :  { %v1475_v1 = vpop.f32.mrf.mxu1  ;;  %v1691_v0 = vpop.f32.mrf.mxu0  ;;  %v2019_v2 = vsel %vm2018_vm9, %v2017_v57, %v2016_v63  ;;  %v3720_v63 = vsel %vm229_vm8, 1.0, %v4376_v52 }
 0x387   :  { %v2036_v3 = vadd.f32 %v2019_v2, %v4517_v38  ;;  %v2021_v11 = vsel %vm2000_vm11, %v2020_v7, %v1475_v1  ;;  %v2024_v15 = vrot.slane %v1691_v0, 5  ;;  %v3722_v0 = vsel %vm231_vm10, 1.0, %v4376_v52 }
 0x388   :  { %v4015_v4 = vpop.f32.mrf.mxu1  ;;  %v4030_v5 = vpop.f32.mrf.mxu0 }
 0x389   :  { %v2038_v6 = vsel %vm830_vm12, %v2036_v3, -inf }
 0x38a   :  { %v1835_v8 = vpop.f32.mrf.mxu0  ;;  %2039 = vmax.xlane.f32.xlu0 %v2038_v6  ;;  %v1619_v9 = vpop.f32.mrf.mxu1  ;;  %v3719_v6 = vsel %vm228_vm6, 1.0, %v4376_v52 }
 0x38b   :  { %v2022_v10 = vrot.slane %v1619_v9, 6  ;;  %v2028_v24 = vrot.slane %v1835_v8, 3 }
 0x38c   :  { %v4025_v12 = vpop.f32.mrf.mxu1  ;;  %v4040_v13 = vpop.f32.mrf.mxu0 }
 0x38d   :  { %v2023_v14 = vsel %vm2003_vm14, %v2022_v10, %v2021_v11  ;;  %v3721_v10 = vsel %vm230_vm5, 1.0, %v4376_v52  ;;  %v3723_v13 = vsel %vm4862_vm3, 1.0, %v4376_v52 }
 0x38e   :  { %v1763_v16 = vpop.f32.mrf.mxu1  ;;  %v1979_v17 = vpop.f32.mrf.mxu0  ;;  %v2025_v38 = vsel %vm2006_vm15, %v2024_v15, %v2023_v14 }
 0x38f   :  { %v2026_v20 = vrot.slane %v1763_v16, 4  ;;  %v2032_v27 = vrot.slane %v1979_v17, 1 }
 0x390   :  { %v4035_v22 = vpop.f32.mrf.mxu1  ;;  %v4050_v19 = vpop.f32.mrf.mxu0 }
 0x391   :  { %v2027_v23 = vsel %vm2009_vm0, %v2026_v20, %v2025_v38  ;;  %v181_v19 = vld [vmem:[#allocation11] sm:$0xff] }
 0x392   :  { %v1907_v25 = vpop.f32.mrf.mxu1  ;;  %v2029_v28 = vsel %vm2012_vm2, %v2028_v24, %v2027_v23  ;;  %v176_v23 = vld [vmem:[#allocation8 + $0x78] sm:$0xff]  ;;  %v175_v24 = vld [vmem:[#allocation8 + $0x70] sm:$0xff] }
 0x393   :  { %v2030_v26 = vrot.slane %v1907_v25, 2  ;;  %v174_v25 = vld [vmem:[#allocation8 + $0x68] sm:$0xff] }
 0x394   :  { %v4045_v29 = vpop.f32.mrf.mxu1 }
 0x395   :  { %v2031_v30 = vsel %vm2015_vm7, %v2030_v26, %v2029_v28  ;;  %v172_v26 = vld [vmem:[#allocation8 + $0x58] sm:$0xff]  ;;  %v169_v28 = vld [vmem:[#allocation8 + $0x40] sm:$0xff] }
 0x396   :  { %v2033_v31 = vsel %vm2018_vm9, %v2032_v27, %v2031_v30  ;;  %v170_v27 = vld [vmem:[#allocation8 + $0x48] sm:$0xff]  ;;  %v168_v29 = vld [vmem:[#allocation8 + $0x38] sm:$0xff]  ;;  %v167_v30 = vld [vmem:[#allocation8 + $0x30] sm:$0xff] }
 0x397   :  { %v2037_v33 = vadd.f32 %v2033_v31, %v4527_v47  ;;  %v166_v31 = vld [vmem:[#allocation8 + $0x28] sm:$0xff] }
 0x399   :  { %v2041_v35 = vsel %vm830_vm12, %v2037_v33, -inf }
 0x39a   :  { %2042 = vmax.xlane.f32.xlu0 %v2041_v35  ;;  %v164_v35 = vld [vmem:[#allocation8 + $0x18] sm:$0xff] }
 0x413   :  { %v2040_v36 = vpop.xlane.xlu0 %2039 }
 0x414   :  { %v2044_v37 = vsub.f32 %v2036_v3, %v2040_v36  ;;  %v3717_v3 = vsel %vm226_vm13, 1.0, %v4376_v52 }
 0x416   :  { %v2046_v39 = vmul.f32 1.442695, %v2044_v37 }
 0x418   :  { %4208 = vpow2.f32 %v2046_v39 }
 0x423   :  { %v2043_v40 = vpop.xlane.xlu0 %2042 }
 0x424   :  { %v2045_v41 = vsub.f32 %v2037_v33, %v2043_v40  ;;  %v165_v33 = vld [vmem:[#allocation8 + $0x20] sm:$0xff] }
 0x425   :  { %v4209_v42 = vpop.eup %4208 }
 0x426   :  { %v2048_v43 = vmul.f32 1.442695, %v2045_v41  ;;  %v2050_v44 = vsel %vm830_vm12, %v4209_v42, 0.0 }
 0x427   :  { %2051 = vadd.xlane.f32.xlu1 %v2050_v44 }
 0x428   :  { %4210 = vpow2.f32 %v2048_v43 }
 0x435   :  { %v4211_v46 = vpop.eup %4210 }
 0x436   :  { %v2053_v49 = vsel %vm830_vm12, %v4211_v46, 0.0 }
 0x437   :  { %2054 = vadd.xlane.f32.xlu1 %v2053_v49 }
 0x4b0   :  { %v2052_v47 = vpop.xlane.xlu1 %2051 }
 0x4b1   :  { %4212 = vrcp.f32 %v2052_v47 }
 0x4be   :  { %v4213_v50 = vpop.eup %4212 }
 0x4bf   :  { %v2058_v51 = vmul.f32 %v4213_v50, %v4209_v42 }
 0x4c0   :  { %v2055_v55 = vpop.xlane.xlu1 %2054 }
 0x4c1   :  { %4214 = vrcp.f32 %v2055_v55  ;;  %4054 = vmatmul.mubr.msk.f32.vlgmr.msra.gmra.mxu1 %vm830_vm12, %v2058_v51  ;;  %v2213_v57 = vrot.slane %v2058_v51, %v4512_v32  ;;  %v2206_v59 = vcombine.high %v2058_v51, %v2058_v51 }
 0x4c2   :  { %4062 = vmatpush3.xpose.msk.msra.mxu1 %vm830_vm12, %v3716_v53  ;;  %4063 = vmatprep.mubr.msk.f32.mxu1 %vm4377_vm1, %v4376_v52 }
 0x4c3   :  { %v2229_v58 = vrot.slane %v2213_v57, %v4512_v32  ;;  %4071 = vmatprep.subr.mxu1 %v4376_v52  ;;  %v2220_v1 = vrot.slane %v2206_v59, %v4512_v32  ;;  %v2221_v5 = vcombine.high %v2213_v57, %v2213_v57 }
 0x4c5   :  { %4064 = vmatmul.mubr.msk.f32.vlgmr.msra.gmra.mxu1 %vm830_vm12, %v2229_v58  ;;  %v2251_v61 = vcombine.high %v2229_v58, %v2229_v58  ;;  %v2236_v45 = vrot.slane %v2220_v1, %v4512_v32  ;;  %v2243_v34 = vrot.slane %v2221_v5, %v4512_v32  ;;  %v2222_v9 = vcombine.high %v2220_v1, %v2220_v1 }
 0x4c6   :  { %4072 = vmatpush3.xpose.msk.msra.mxu1 %vm830_vm12, %v3718_v18  ;;  %4073 = vmatprep.mubr.msk.f32.mxu1 %vm4377_vm1, %v4376_v52 }
 0x4c7   :  { %4081 = vmatprep.subr.mxu1 %v4376_v52  ;;  %v2252_v4 = vcombine.high %v2236_v45, %v2236_v45  ;;  %v2253_v21 = vcombine.high %v2243_v34, %v2243_v34  ;;  %v2250_v48 = vrot.slane %v2222_v9, %v4512_v32 }
 0x4c9   :  { %4074 = vmatmul.mubr.msk.f32.vlgmr.msra.gmra.mxu1 %vm830_vm12, %v2251_v61  ;;  %v2254_v62 = vcombine.high %v2250_v48, %v2250_v48 }
 0x4ca   :  { %4082 = vmatpush3.xpose.msk.msra.mxu1 %vm830_vm12, %v3720_v63  ;;  %4083 = vmatprep.mubr.msk.f32.mxu1 %vm4377_vm1, %v4376_v52 }
 0x4cb   :  { %4091 = vmatprep.subr.mxu1 %v4376_v52 }
 0x4cd   :  { %4084 = vmatmul.mubr.msk.f32.vlgmr.msra.gmra.mxu1 %vm830_vm12, %v2236_v45 }
 0x4ce   :  { %v4215_v54 = vpop.eup %4214  ;;  %4092 = vmatpush3.xpose.msk.msra.mxu1 %vm830_vm12, %v3722_v0  ;;  %4093 = vmatprep.mubr.msk.f32.mxu1 %vm4377_vm1, %v4376_v52 }
 0x4cf   :  { %v2059_v2 = vmul.f32 %v4215_v54, %v4211_v46  ;;  %4101 = vmatprep.subr.mxu1 %v4376_v52 }
 0x4d1   :  { %4059 = vmatmul.mubr.msk.f32.vlgmr.msra.gmra.mxu0 %vm830_vm12, %v2059_v2  ;;  %4094 = vmatmul.mubr.msk.f32.vlgmr.msra.gmra.mxu1 %vm830_vm12, %v2252_v4  ;;  %v2262_v60 = vrot.slane %v2059_v2, %v4512_v32  ;;  %v2255_v8 = vcombine.high %v2059_v2, %v2059_v2 }
 0x4d2   :  { %4067 = vmatpush3.xpose.msk.msra.mxu0 %vm830_vm12, %v3717_v3  ;;  %4102 = vmatpush3.xpose.msk.msra.mxu1 %vm830_vm12, %v3716_v53 }
 0x4d3   :  { %4068 = vmatprep.mubr.msk.f32.mxu0 %vm4377_vm1, %v4376_v52  ;;  %4076 = vmatprep.subr.mxu0 %v4376_v52  ;;  %v2278_v7 = vrot.slane %v2262_v60, %v4512_v32  ;;  %v2269_v12 = vrot.slane %v2255_v8, %v4512_v32  ;;  %v2270_v15 = vcombine.high %v2262_v60, %v2262_v60 }
 0x4d4   :  { %4103 = vmatprep.mubr.msk.f32.mxu1 %vm4377_vm1, %v4376_v52  ;;  %4111 = vmatprep.subr.mxu1 %v4376_v52 }
 0x4d5   :  { %4069 = vmatmul.mubr.msk.f32.vlgmr.msra.gmra.mxu0 %vm830_vm12, %v2243_v34  ;;  %4104 = vmatmul.mubr.msk.f32.vlgmr.msra.gmra.mxu1 %vm830_vm12, %v2278_v7  ;;  %v2300_v11 = vcombine.high %v2278_v7, %v2278_v7  ;;  %v2285_v14 = vrot.slane %v2269_v12, %v4512_v32  ;;  %v2292_v16 = vrot.slane %v2270_v15, %v4512_v32 }
 0x4d6   :  { %4077 = vmatpush3.xpose.msk.msra.mxu0 %vm830_vm12, %v3719_v6  ;;  %4112 = vmatpush3.xpose.msk.msra.mxu1 %vm830_vm12, %v3718_v18  ;;  %v2271_v20 = vcombine.high %v2269_v12, %v2269_v12 }
 0x4d7   :  { %4078 = vmatprep.mubr.msk.f32.mxu0 %vm4377_vm1, %v4376_v52  ;;  %4086 = vmatprep.subr.mxu0 %v4376_v52  ;;  %v2301_v56 = vcombine.high %v2285_v14, %v2285_v14  ;;  %v2302_v17 = vcombine.high %v2292_v16, %v2292_v16 }
 0x4d8   :  { %4113 = vmatprep.mubr.msk.f32.mxu1 %vm4377_vm1, %v4376_v52  ;;  %4121 = vmatprep.subr.mxu1 %v4376_v52  ;;  %v2299_v38 = vrot.slane %v2271_v20, %v4512_v32  ;;  %v173_v32 = vld [vmem:[#allocation8 + $0x60] sm:$0xff] }
 0x4d9   :  { %4079 = vmatmul.mubr.msk.f32.vlgmr.msra.gmra.mxu0 %vm830_vm12, %v2253_v21  ;;  %4114 = vmatmul.mubr.msk.f32.vlgmr.msra.gmra.mxu1 %vm830_vm12, %v2300_v11 }
 0x4da   :  { %4087 = vmatpush3.xpose.msk.msra.mxu0 %vm830_vm12, %v3721_v10  ;;  %4122 = vmatpush3.xpose.msk.msra.mxu1 %vm830_vm12, %v3720_v63  ;;  %v2303_v22 = vcombine.high %v2299_v38, %v2299_v38 }
 0x4db   :  { %4088 = vmatprep.mubr.msk.f32.mxu0 %vm4377_vm1, %v4376_v52  ;;  %4096 = vmatprep.subr.mxu0 %v4376_v52 }
 0x4dc   :  { %4123 = vmatprep.mubr.msk.f32.mxu1 %vm4377_vm1, %v4376_v52  ;;  %4131 = vmatprep.subr.mxu1 %v4376_v52 }
 0x4dd   :  { %4089 = vmatmul.mubr.msk.f32.vlgmr.msra.gmra.mxu0 %vm830_vm12, %v2250_v48  ;;  %4124 = vmatmul.mubr.msk.f32.vlgmr.msra.gmra.mxu1 %vm830_vm12, %v2285_v14 }
 0x4de   :  { %4097 = vmatpush3.xpose.msk.msra.mxu0 %vm830_vm12, %v3723_v13  ;;  %4132 = vmatpush3.xpose.msk.msra.mxu1 %vm830_vm12, %v3722_v0 }
 0x4df   :  { %4098 = vmatprep.mubr.msk.f32.mxu0 %vm4377_vm1, %v4376_v52  ;;  %4106 = vmatprep.subr.mxu0 %v4376_v52 }
 0x4e0   :  { %4133 = vmatprep.mubr.msk.f32.mxu1 %vm4377_vm1, %v4376_v52  ;;  %4141 = vmatprep.subr.mxu1 %v181_v19 }
 0x4e1   :  { %4099 = vmatmul.mubr.msk.f32.vlgmr.msra.gmra.mxu0 %vm830_vm12, %v2254_v62  ;;  %4134 = vmatmul.mubr.msk.f32.vlgmr.msra.gmra.mxu1 %vm830_vm12, %v2301_v56 }
 0x4e2   :  { %4107 = vmatpush3.xpose.msk.msra.mxu0 %vm830_vm12, %v3717_v3  ;;  %4108 = vmatprep.mubr.msk.f32.mxu0 %vm4377_vm1, %v4376_v52 }
 0x4e3   :  { %4116 = vmatprep.subr.mxu0 %v4376_v52  ;;  %4142 = vmatpush3.msra.mxu1 %v181_v19 }
 0x4e5   :  { %4109 = vmatmul.mubr.msk.f32.vlgmr.msra.gmra.mxu0 %vm830_vm12, %v2292_v16 }
 0x4e6   :  { %4117 = vmatpush3.xpose.msk.msra.mxu0 %vm830_vm12, %v3719_v6  ;;  %4118 = vmatprep.mubr.msk.f32.mxu0 %vm4377_vm1, %v4376_v52 }
 0x4e7   :  { %4126 = vmatprep.subr.mxu0 %v4376_v52 }
 0x4e9   :  { %4119 = vmatmul.mubr.msk.f32.vlgmr.msra.gmra.mxu0 %vm830_vm12, %v2302_v17 }
 0x4ea   :  { %4127 = vmatpush3.xpose.msk.msra.mxu0 %vm830_vm12, %v3721_v10  ;;  %4128 = vmatprep.mubr.msk.f32.mxu0 %vm4377_vm1, %v4376_v52 }
 0x4eb   :  { %4136 = vmatprep.subr.mxu0 %v4376_v52 }
 0x4ed   :  { %4129 = vmatmul.mubr.msk.f32.vlgmr.msra.gmra.mxu0 %vm830_vm12, %v2299_v38 }
 0x4ee   :  { %4137 = vmatpush3.xpose.msk.msra.mxu0 %vm830_vm12, %v3723_v13  ;;  %4138 = vmatprep.mubr.msk.f32.mxu0 %vm4377_vm1, %v4376_v52  ;;  %v171_v52 = vld [vmem:[#allocation8 + $0x50] sm:$0xff] }
 0x4ef   :  { %4146 = vmatprep.subr.mxu0 %v176_v23 }
 0x4f1   :  { %4139 = vmatmul.mubr.msk.f32.vlgmr.msra.gmra.mxu0 %vm830_vm12, %v2303_v22 }
 0x4f2   :  { %4147 = vmatpush3.msra.mxu0 %v176_v23 }
 0x4f3   :  { %4148 = vmatprep.subr.mxu0 %v175_v24 }
 0x4f4   :  { %4149 = vmatpush3.msra.mxu0 %v175_v24 }
 0x4f5   :  { %4150 = vmatprep.subr.mxu0 %v174_v25 }
 0x4f6   :  { %4151 = vmatpush3.msra.mxu0 %v174_v25 }
 0x4f7   :  { %4152 = vmatprep.subr.mxu0 %v173_v32 }
 0x4f8   :  { %4153 = vmatpush3.msra.mxu0 %v173_v32 }
 0x4f9   :  { %4154 = vmatprep.subr.mxu0 %v172_v26 }
 0x4fa   :  { %4155 = vmatpush3.msra.mxu0 %v172_v26 }
 0x4fb   :  { %4156 = vmatprep.subr.mxu0 %v171_v52 }
 0x4fc   :  { %4157 = vmatpush3.msra.mxu0 %v171_v52 }
 0x4fd   :  { %4158 = vmatprep.subr.mxu0 %v170_v27 }
 0x4fe   :  { %4159 = vmatpush3.msra.mxu0 %v170_v27 }
 0x4ff   :  { %4160 = vmatprep.subr.mxu0 %v169_v28 }
 0x500   :  { %4161 = vmatpush3.msra.mxu0 %v169_v28 }
 0x501   :  { %4162 = vmatprep.subr.mxu0 %v168_v29 }
 0x502   :  { %4163 = vmatpush3.msra.mxu0 %v168_v29 }
 0x503   :  { %4164 = vmatprep.subr.mxu0 %v167_v30 }
 0x504   :  { %4165 = vmatpush3.msra.mxu0 %v167_v30 }
 0x505   :  { %4166 = vmatprep.subr.mxu0 %v166_v31 }
 0x506   :  { %4167 = vmatpush3.msra.mxu0 %v166_v31 }
 0x507   :  { %4168 = vmatprep.subr.mxu0 %v165_v33 }
 0x508   :  { %4169 = vmatpush3.msra.mxu0 %v165_v33 }
 0x509   :  { %4170 = vmatprep.subr.mxu0 %v164_v35 }
 0x50a   :  { %4171 = vmatpush3.msra.mxu0 %v164_v35 }
 0x581   :  { %v4823_v36 = vpop.f32.mrf.mxu1 }
 0x583   :  { %v4055_v37 = vpop.f32.mrf.mxu1 }
 0x584   :  { %v163_v37 = vld [vmem:[#allocation8 + $0x10] sm:$0xff] }
 0x585   :  { %v2375_v39 = vpop.f32.mrf.mxu1  ;;  %4172 = vmatprep.subr.mxu0 %v163_v37 }
 0x586   :  { %4173 = vmatpush3.msra.mxu0 %v163_v37 }
 0x587   :  { %v4065_v40 = vpop.f32.mrf.mxu1 }
 0x588   :  { %v161_v40 = vld [vmem:[#allocation8] sm:$0xff] }
 0x589   :  { %v2525_v41 = vpop.f32.mrf.mxu1 }
 0x58a   :  { %v3498_v59 = vrot.slane %v2525_v41, 6 }
 0x58b   :  { %v4075_v42 = vpop.f32.mrf.mxu1 }
 0x58d   :  { %v2675_v43 = vpop.f32.mrf.mxu1 }
 0x58e   :  { %v3502_v3 = vrot.slane %v2675_v43, 4 }
 0x58f   :  { %v4085_v44 = vpop.f32.mrf.mxu1 }
 0x591   :  { %v4825_v46 = vpop.f32.mrf.mxu0  ;;  %v2825_v49 = vpop.f32.mrf.mxu1 }
 0x592   :  { %v3506_v9 = vrot.slane %v2825_v49, 2  ;;  %v3795_v49 = vld [vmem:[#allocation10] ss:$0 sm:$0xff] }
 0x593   :  { %v4060_v47 = vpop.f32.mrf.mxu0  ;;  %v4095_v50 = vpop.f32.mrf.mxu1 }
 0x595   :  { %v2450_v51 = vpop.f32.mrf.mxu0  ;;  %v2972_v53 = vpop.f32.mrf.mxu1 }
 0x596   :  { %v3496_v55 = vrot.slane %v2450_v51, 7 }
 0x597   :  { %v4070_v57 = vpop.f32.mrf.mxu0  ;;  %v4105_v58 = vpop.f32.mrf.mxu1 }
 0x598   :  { %v3497_v18 = vsel %vm2000_vm11, %v3496_v55, %v2375_v39  ;;  %v162_v39 = vld [vmem:[#allocation8 + $0x8] sm:$0xff] }
 0x599   :  { %v2600_v61 = vpop.f32.mrf.mxu0  ;;  %v3116_v63 = vpop.f32.mrf.mxu1  ;;  %v3499_v45 = vsel %vm2003_vm14, %v3498_v59, %v3497_v18  ;;  %4174 = vmatprep.subr.mxu0 %v162_v39 }
 0x59a   :  { %v3500_v1 = vrot.slane %v2600_v61, 5  ;;  %v3512_v17 = vrot.slane %v3116_v63, 6  ;;  %4175 = vmatpush3.msra.mxu0 %v162_v39 }
 0x59b   :  { %v4080_v0 = vpop.f32.mrf.mxu0  ;;  %v4115_v54 = vpop.f32.mrf.mxu1  ;;  %4176 = vmatprep.subr.mxu0 %v161_v40 }
 0x59c   :  { %v3501_v2 = vsel %vm2006_vm15, %v3500_v1, %v3499_v45  ;;  %4177 = vmatpush3.msra.mxu0 %v161_v40 }
 0x59d   :  { %v2750_v4 = vpop.f32.mrf.mxu0  ;;  %v3260_v5 = vpop.f32.mrf.mxu1  ;;  %v3503_v34 = vsel %vm2009_vm0, %v3502_v3, %v3501_v2 }
 0x59e   :  { %v3504_v60 = vrot.slane %v2750_v4, 3  ;;  %v3516_v24 = vrot.slane %v3260_v5, 4 }
 0x59f   :  { %v4090_v6 = vpop.f32.mrf.mxu0  ;;  %v4125_v7 = vpop.f32.mrf.mxu1 }
 0x5a0   :  { %v3505_v8 = vsel %vm2012_vm2, %v3504_v60, %v3503_v34 }
 0x5a1   :  { %v2900_v21 = vpop.f32.mrf.mxu0  ;;  %v3404_v10 = vpop.f32.mrf.mxu1  ;;  %v3507_v13 = vsel %vm2015_vm7, %v3506_v9, %v3505_v8 }
 0x5a2   :  { %v3508_v11 = vrot.slane %v2900_v21, 1  ;;  %v3520_v28 = vrot.slane %v3404_v10, 2 }
 0x5a3   :  { %v4100_v12 = vpop.f32.mrf.mxu0  ;;  %v4135_v48 = vpop.f32.mrf.mxu1 }
 0x5a4   :  { %v3509_v14 = vsel %vm2018_vm9, %v3508_v11, %v3507_v13 }
 0x5a5   :  { %v3044_v62 = vpop.f32.mrf.mxu0  ;;  %4143 = vmatprep.mubr.msk.f32.mxu1 %vm830_vm12, %v3509_v14 }
 0x5a6   :  { %v3510_v56 = vrot.slane %v3044_v62, 7 }
 0x5a7   :  { %v4110_v15 = vpop.f32.mrf.mxu0 }
 0x5a8   :  { %v3511_v16 = vsel %vm2000_vm11, %v3510_v56, %v2972_v53 }
 0x5a9   :  { %v3188_v20 = vpop.f32.mrf.mxu0  ;;  %v3513_v22 = vsel %vm2003_vm14, %v3512_v17, %v3511_v16 }
 0x5aa   :  { %v3514_v38 = vrot.slane %v3188_v20, 5 }
 0x5ab   :  { %v4120_v19 = vpop.f32.mrf.mxu0 }
 0x5ac   :  { %v3515_v23 = vsel %vm2006_vm15, %v3514_v38, %v3513_v22 }
 0x5ad   :  { %v3332_v25 = vpop.f32.mrf.mxu0  ;;  %v3517_v26 = vsel %vm2009_vm0, %v3516_v24, %v3515_v23 }
 0x5ae   :  { %v3518_v32 = vrot.slane %v3332_v25, 3 }
 0x5af   :  { %v4130_v52 = vpop.f32.mrf.mxu0 }
 0x5b0   :  { %v3519_v27 = vsel %vm2012_vm2, %v3518_v32, %v3517_v26 }
 0x5b1   :  { %v3476_v29 = vpop.f32.mrf.mxu0  ;;  %v3521_v31 = vsel %vm2015_vm7, %v3520_v28, %v3519_v27 }
 0x5b2   :  { %v3522_v30 = vrot.slane %v3476_v29, 1 }
 0x5b3   :  { %v4140_v33 = vpop.f32.mrf.mxu0 }
 0x5b4   :  { %v3523_v35 = vsel %vm2018_vm9, %v3522_v30, %v3521_v31 }
 0x5b5   :  { %4144 = vmatmul.mubr.msk.f32.vlgmr.msra.gmra.mxu1 %vm830_vm12, %v3523_v35 }
 0x675   :  { %v4145_v41 = vpop.f32.mrf.mxu1 }
 0x676   :  { %v3604_v44 = vadd.f32 %v4145_v41, %v4825_v46 }
 0x677   :  { %v3594_v42 = vpop.f32.mrf.mxu1 }
 0x678   :  { %v3603_v43 = vadd.f32 %v3594_v42, %v4823_v36 }
 0x67a   :  { %4178 = vmatprep.mubr.f32.mxu0 %v3603_v43 }
 0x67b   :  { %4179 = vmatmul.mubr.f32.vlgmr.msra.gmra.mxu0 %v3604_v44 }
 0x73b   :  { %v4180_v47 = vpop.f32.mrf.mxu0 }
 0x73c   :  { %v3683_v50 = vadd.f32 %v4180_v47, %v3795_v49 }
 0x73d   :  { %v3677_v51 = vpop.f32.mrf.mxu0 }
 0x73e   :  { %v3687_v53 = vmax.f32 %v3683_v50, 0.0  ;;  %v3678_v55 = vadd.f32 %v3795_v49, %v3677_v51 }
 0x740   :  { %3689 = vst [vmem:[#allocation13 + $0x8] sm:$0xff] %v3687_v53  ;;  %v3686_v57 = vmax.f32 %v3678_v55, 0.0 }
 0x742   :  { %3688 = vst [vmem:[#allocation13] sm:$0xff] %v3686_v57 }
 0x743   :  { %4347 = shalt.err (!%p4344_p6)
}
 0x744   :  { %3701 = dma.vmem_to_hbm [thread:$0]  %s3696_s7, 256, %s4860_s9, [#allocation4], %s4368_s14, %s4368_s14, %s4369_s15  }
 0x745   :  { %4364 = dma.done.wait [#allocation4], 256  }
 0x746   :  { %4365 = vsyncadd [#allocation4], 4294967040 }
 0x747   :  { %3705 = vsyncpa [#allocation3], 1 }
 0x748   :  { %3706 = vsyncpa [#allocation6], 1 }
 0x749   :  { %3707 = vsyncpa [#allocation9], 1 }
 0x74a   :  { %3708 = vsyncpa [#allocation12], 1 }
 0x74b   :  { %3709 = vsyncpa [#allocation4], 1 }

// kernel: tpu_custom_call.1
= control target key start
LH: loop header
LB: loop body
LE: loop exit
PB: predicated region body
PF: predicated region fallthrough
CT: control target
= control target key end

     0   :  { %14 = vsyncpa [#allocation3], 0  ;;  %s4851_s0 = inlined_call_operand.hbm [shape: f32[2,8,16], index: 0, kind: input, shape index: {}]   ;;  %s4852_s1 = inlined_call_operand.hbm [shape: f32[16,128], index: 1, kind: input, shape index: {}]   ;;  %s4853_s2 = inlined_call_operand.vmem [shape: f32[1,128], index: 2, kind: input, shape index: {}]   ;;  %s4854_s3 = inlined_call_operand.hbm [shape: f32[128,384], index: 3, kind: input, shape index: {}]   ;;  %s4855_s4 = inlined_call_operand.vmem [shape: f32[1,384], index: 4, kind: input, shape index: {}]   ;;  %s4856_s5 = inlined_call_operand.hbm [shape: f32[128,128], index: 5, kind: input, shape index: {}]   ;;  %s4857_s6 = inlined_call_operand.hbm [shape: f32[1,128], index: 6, kind: input, shape index: {}]   ;;  %s4858_s7 = inlined_call_operand.vmem [shape: f32[8,128], index: 7, kind: input, shape index: {}]   ;;  %s4859_s8 = inlined_call_operand.hbm [shape: f32[8,128], index: 8, kind: input, shape index: {}]   ;;  %s4860_s9 = inlined_call_operand.hbm [shape: f32[2,8,128], index: 9, kind: output, shape index: {}]  }
   0x1   :  { %15 = vsyncpa [#allocation6], 0 }
   0x2   :  { %16 = vsyncpa [#allocation9], 0 }
   0x3   :  { %17 = vsyncpa [#allocation12], 0 }
   0x4   :  { %18 = vsyncpa [#allocation4], 0  ;;  %s4366_s30 = smov [#allocation5]   ;;  %s4367_s11 = smov [#allocation8]  }
   0x5   :  { %s36_s10 = sshll.u32 %s4366_s30, 4  ;;  %s64_s12 = sshll.u32 %s4367_s11, 4  ;;  %s37_s10 = int_to_ptr.vmem [resolvable:$true] %s36_s10  ;;  %s65_s12 = int_to_ptr.vmem [resolvable:$true] %s64_s12 }
   0x6   :  { %s4224_s13 = scalar_lea.vmem %s37_s10, 256  ;;  %p4229_p1 = scmp.lt.s32.totalorder %s37_s10, %s37_s10 }
   0x7   :  { %p4225_p0 = scmp.ne.s32.totalorder %s37_s10, %s4224_s13  ;;  %p4230_p2 = scmp.lt.s32.totalorder %s4224_s13, %s4224_s13 }
   0x9   :  { %p4231_p3 = por %p4230_p2, %p4229_p1 }
   0xb   :  { %p4232_p4 = pnand %p4231_p3, %p4225_p0 }
   0xd   :  { %4235 = shalt.err (!%p4232_p4)
}
   0xe   :  { %s4368_s14 = smov 128   ;;  %s4369_s15 = smov 8  }
   0xf   :  { %42 = dma.hbm_to_vmem [thread:$0]  %s4852_s1, 256, %s37_s10, [#allocation6], %s4368_s14, %s4368_s14, %s4369_s15  }
  0x10   :  { %s4244_s18 = scalar_lea.vmem %s65_s12, 2048  ;;  %p4249_p6 = scmp.lt.s32.totalorder %s65_s12, %s65_s12 }
  0x11   :  { %p4245_p5 = scmp.ne.s32.totalorder %s65_s12, %s4244_s18  ;;  %p4250_p7 = scmp.lt.s32.totalorder %s4244_s18, %s4244_s18 }
  0x13   :  { %p4251_p8 = por %p4250_p7, %p4249_p6 }
  0x15   :  { %p4252_p9 = pnand %p4251_p8, %p4245_p5 }
  0x17   :  { %4255 = shalt.err (!%p4252_p9)
}
  0x18   :  { %70 = dma.hbm_to_vmem [thread:$0]  %s4856_s5, 2048, %s65_s12, [#allocation9], %s4368_s14, %s4368_s14, %s4369_s15  }
  0x19   :  { %s4370_s21 = smov [#allocation2]   ;;  %s4371_s23 = smov [#allocation7]  }
  0x1a   :  { %s24_s22 = sshll.u32 %s4370_s21, 4  ;;  %s50_s24 = sshll.u32 %s4371_s23, 4  ;;  %s25_s22 = int_to_ptr.vmem [resolvable:$true] %s24_s22  ;;  %s51_s24 = int_to_ptr.vmem [resolvable:$true] %s50_s24 }
  0x1b   :  { %s4264_s1 = scalar_lea.vmem %s25_s22, 256  ;;  %p4269_p11 = scmp.lt.s32.totalorder %s25_s22, %s25_s22 }
  0x1c   :  { %p4265_p10 = scmp.ne.s32.totalorder %s25_s22, %s4264_s1  ;;  %p4270_p12 = scmp.lt.s32.totalorder %s4264_s1, %s4264_s1 }
  0x1e   :  { %p4271_p13 = por %p4270_p12, %p4269_p11 }
  0x20   :  { %p4272_p0 = pnand %p4271_p13, %p4265_p10 }
  0x22   :  { %4275 = shalt.err (!%p4272_p0)
}
  0x23   :  { %30 = dma.hbm_to_vmem [thread:$0]  %s4851_s0, 256, %s25_s22, [#allocation3], %s4368_s14, %s4368_s14, %s4369_s15  }
  0x24   :  { %s4284_s5 = scalar_lea.vmem %s51_s24, 6144  ;;  %p4289_p2 = scmp.lt.s32.totalorder %s51_s24, %s51_s24 }
  0x25   :  { %p4285_p1 = scmp.ne.s32.totalorder %s51_s24, %s4284_s5  ;;  %p4290_p3 = scmp.lt.s32.totalorder %s4284_s5, %s4284_s5 }
  0x27   :  { %p4291_p4 = por %p4290_p3, %p4289_p2 }
  0x29   :  { %p4292_p5 = pnand %p4291_p4, %p4285_p1 }
  0x2b   :  { %4295 = shalt.err (!%p4292_p5)
}
  0x2c   :  { %s4372_s27 = smov 384   ;;  %s4373_s28 = smov 24  }
  0x2d   :  { %56 = dma.hbm_to_vmem [thread:$0]  %s4854_s3, 6144, %s51_s24, [#allocation6], %s4372_s27, %s4372_s27, %s4373_s28  }
  0x2e   :  { %s4374_s10 = smov [#allocation10]   ;;  %s4375_s12 = smov [#allocation11]  }
  0x2f   :  { %s77_s11 = sshll.u32 %s4374_s10, 4  ;;  %s89_s13 = sshll.u32 %s4375_s12, 4  ;;  %s78_s11 = int_to_ptr.vmem [resolvable:$true] %s77_s11  ;;  %s90_s13 = int_to_ptr.vmem [resolvable:$true] %s89_s13 }
  0x30   :  { %s4304_s0 = scalar_lea.vmem %s78_s11, 16  ;;  %s4308_s16 = scalar_lea.vmem %s78_s11, 32 }
  0x31   :  { %p4305_p6 = scmp.ne.s32.totalorder %s78_s11, %s4304_s0  ;;  %p4309_p7 = scmp.lt.s32.totalorder %s78_s11, %s78_s11 }
  0x32   :  { %p4310_p8 = scmp.lt.s32.totalorder %s4308_s16, %s4304_s0 }
  0x34   :  { %p4311_p9 = por %p4310_p8, %p4309_p7 }
  0x36   :  { %p4312_p10 = pnand %p4311_p9, %p4305_p6 }
  0x38   :  { %4315 = shalt.err (!%p4312_p10)
}
  0x39   :  { %80 = dma.hbm_to_vmem [thread:$0]  %s4857_s6, 16, %s78_s11, [#allocation9]  }
  0x3a   :  { %s4324_s19 = scalar_lea.vmem %s90_s13, 128  ;;  %p4329_p12 = scmp.lt.s32.totalorder %s90_s13, %s90_s13 }
  0x3b   :  { %p4325_p11 = scmp.ne.s32.totalorder %s90_s13, %s4324_s19  ;;  %p4330_p13 = scmp.lt.s32.totalorder %s4324_s19, %s4324_s19 }
  0x3d   :  { %p4331_p0 = por %p4330_p13, %p4329_p12 }
  0x3f   :  { %p4332_p1 = pnand %p4331_p0, %p4325_p11 }
  0x41   :  { %4335 = shalt.err (!%p4332_p1)
}
  0x42   :  { %92 = dma.hbm_to_vmem [thread:$0]  %s4859_s8, 128, %s90_s13, [#allocation12]  }
  0x43   :  { %4356 = dma.done.wait [#allocation3], 256  }
  0x44   :  { %4357 = vsyncadd [#allocation3], 4294967040 }
  0x45   :  { %4358 = dma.done.wait [#allocation6], 6400  }
  0x46   :  { %4359 = vsyncadd [#allocation6], 4294960896 }
  0x47   :  { %4360 = dma.done.wait [#allocation9], 2064  }
  0x48   :  { %4361 = vsyncadd [#allocation9], 4294965232 }
  0x49   :  { %4362 = dma.done.wait [#allocation12], 128  }
  0x4a   :  { %4363 = vsyncadd [#allocation12], 4294967168  ;;  %vm257_vm0 = vcmask 130048   ;;  %v112_v0 = vld [vmem:[#allocation5 + $0x8] sm:$0xff]  ;;  %v111_v1 = vld [vmem:[#allocation5] sm:$0xff]  ;;  %v4376_v52 = vmov 0.0   ;;  %v182_v61 = vlaneseq }
  0x4b   :  { %v249_v2 = vld [vmem:[#allocation2] sm:$0xff]  ;;  %3914 = vmatprep.subr.mxu1 %v112_v0  ;;  %v250_v3 = vld [vmem:[#allocation2 + $0x8] sm:$0xff]  ;;  %v159_v4 = vld [vmem:[#allocation7 + $0x170] sm:$0xff]  ;;  %vm4377_vm1 = vmmov 0   ;;  %vm830_vm12 = vcmask 64512  }
  0x4c   :  { %3918 = vmatprep.mubr.msk.f32.mxu1 %vm257_vm0, %v249_v2  ;;  %3915 = vmatpush3.msra.mxu1 %v112_v0  ;;  %v160_v5 = vld [vmem:[#allocation7 + $0x178] sm:$0xff]  ;;  %v158_v6 = vld [vmem:[#allocation7 + $0x168] sm:$0xff]  ;;  %v157_v7 = vld [vmem:[#allocation7 + $0x160] sm:$0xff]  ;;  %v4472_v62 = vshrl.u32 %v182_v61, 7 }
  0x4d   :  { %3916 = vmatprep.subr.mxu1 %v111_v1  ;;  %3921 = vmatprep.subr.mxu0 %v160_v5  ;;  %v156_v8 = vld [vmem:[#allocation7 + $0x158] sm:$0xff]  ;;  %v155_v9 = vld [vmem:[#allocation7 + $0x150] sm:$0xff]  ;;  %v154_v10 = vld [vmem:[#allocation7 + $0x148] sm:$0xff] }
  0x4e   :  { %3917 = vmatpush3.msra.mxu1 %v111_v1  ;;  %3922 = vmatpush3.msra.mxu0 %v160_v5  ;;  %v153_v11 = vld [vmem:[#allocation7 + $0x140] sm:$0xff]  ;;  %v152_v12 = vld [vmem:[#allocation7 + $0x138] sm:$0xff]  ;;  %v151_v13 = vld [vmem:[#allocation7 + $0x130] sm:$0xff]  ;;  %v344_v63 = vsub.s32 0, %v4472_v62  ;;  %v348_v1 = vsub.s32 1, %v4472_v62 }
  0x4f   :  { %3919 = vmatmul.mubr.msk.f32.vlgmr.msra.gmra.mxu1 %vm257_vm0, %v250_v3  ;;  %357 = vmatprep.subr.mxu1 %v159_v4  ;;  %v150_v14 = vld [vmem:[#allocation7 + $0x128] sm:$0xff]  ;;  %v149_v15 = vld [vmem:[#allocation7 + $0x120] sm:$0xff]  ;;  %v148_v16 = vld [vmem:[#allocation7 + $0x118] sm:$0xff] }
  0x50   :  { %358 = vmatpush1.msra.mxu1 %v158_v6  ;;  %3923 = vmatprep.subr.mxu0 %v157_v7  ;;  %v147_v17 = vld [vmem:[#allocation7 + $0x110] sm:$0xff]  ;;  %v146_v18 = vld [vmem:[#allocation7 + $0x108] sm:$0xff]  ;;  %v145_v19 = vld [vmem:[#allocation7 + $0x100] sm:$0xff] }
  0x51   :  { %359 = vmatprep.subr.mxu1 %v156_v8  ;;  %3924 = vmatpush3.msra.mxu0 %v157_v7  ;;  %v144_v20 = vld [vmem:[#allocation7 + $0xf8] sm:$0xff]  ;;  %v143_v21 = vld [vmem:[#allocation7 + $0xf0] sm:$0xff]  ;;  %v142_v22 = vld [vmem:[#allocation7 + $0xe8] sm:$0xff] }
  0x52   :  { %360 = vmatpush1.msra.mxu1 %v155_v9  ;;  %3925 = vmatprep.subr.mxu0 %v154_v10  ;;  %v141_v23 = vld [vmem:[#allocation7 + $0xe0] sm:$0xff]  ;;  %v140_v24 = vld [vmem:[#allocation7 + $0xd8] sm:$0xff]  ;;  %v139_v25 = vld [vmem:[#allocation7 + $0xd0] sm:$0xff] }
  0x53   :  { %361 = vmatprep.subr.mxu1 %v153_v11  ;;  %3926 = vmatpush3.msra.mxu0 %v154_v10  ;;  %v138_v26 = vld [vmem:[#allocation7 + $0xc8] sm:$0xff]  ;;  %v137_v27 = vld [vmem:[#allocation7 + $0xc0] sm:$0xff]  ;;  %v136_v28 = vld [vmem:[#allocation7 + $0xb8] sm:$0xff] }
  0x54   :  { %362 = vmatpush1.msra.mxu1 %v152_v12  ;;  %3927 = vmatprep.subr.mxu0 %v151_v13  ;;  %v135_v29 = vld [vmem:[#allocation7 + $0xb0] sm:$0xff]  ;;  %v134_v30 = vld [vmem:[#allocation7 + $0xa8] sm:$0xff]  ;;  %v133_v31 = vld [vmem:[#allocation7 + $0xa0] sm:$0xff] }
  0x55   :  { %363 = vmatprep.subr.mxu1 %v150_v14  ;;  %3928 = vmatpush3.msra.mxu0 %v151_v13  ;;  %v132_v32 = vld [vmem:[#allocation7 + $0x98] sm:$0xff]  ;;  %v131_v33 = vld [vmem:[#allocation7 + $0x90] sm:$0xff]  ;;  %v130_v34 = vld [vmem:[#allocation7 + $0x88] sm:$0xff] }
  0x56   :  { %364 = vmatpush1.msra.mxu1 %v149_v15  ;;  %3929 = vmatprep.subr.mxu0 %v148_v16  ;;  %v129_v35 = vld [vmem:[#allocation7 + $0x80] sm:$0xff]  ;;  %v128_v36 = vld [vmem:[#allocation7 + $0x78] sm:$0xff]  ;;  %v127_v37 = vld [vmem:[#allocation7 + $0x70] sm:$0xff] }
  0x57   :  { %365 = vmatprep.subr.mxu1 %v147_v17  ;;  %3930 = vmatpush3.msra.mxu0 %v148_v16  ;;  %v126_v38 = vld [vmem:[#allocation7 + $0x68] sm:$0xff]  ;;  %v125_v39 = vld [vmem:[#allocation7 + $0x60] sm:$0xff]  ;;  %v123_v40 = vld [vmem:[#allocation7 + $0x50] sm:$0xff]  ;;  %v185_v16 = vand.u32 127, %v182_v61 }
  0x58   :  { %366 = vmatpush1.msra.mxu1 %v146_v18  ;;  %3931 = vmatprep.subr.mxu0 %v145_v19  ;;  %v122_v41 = vld [vmem:[#allocation7 + $0x48] sm:$0xff]  ;;  %v124_v42 = vld [vmem:[#allocation7 + $0x58] sm:$0xff]  ;;  %v119_v44 = vld [vmem:[#allocation7 + $0x30] sm:$0xff] }
  0x59   :  { %367 = vmatprep.subr.mxu1 %v144_v20  ;;  %3932 = vmatpush3.msra.mxu0 %v145_v19  ;;  %v120_v43 = vld [vmem:[#allocation7 + $0x38] sm:$0xff]  ;;  %v121_v45 = vld [vmem:[#allocation7 + $0x40] sm:$0xff]  ;;  %v118_v48 = vld [vmem:[#allocation7 + $0x28] sm:$0xff]  ;;  %v186_v17 = vadd.s32 3, %v185_v16  ;;  %vm199_vm4 = vcmp.gt.s32.totalorder %v185_v16, 0  ;;  %v4378_v19 = vmov 1.0  }
  0x5a   :  { %368 = vmatpush1.msra.mxu1 %v143_v21  ;;  %3933 = vmatprep.subr.mxu0 %v142_v22  ;;  %v117_v46 = vld [vmem:[#allocation7 + $0x20] sm:$0xff]  ;;  %v116_v47 = vld [vmem:[#allocation7 + $0x18] sm:$0xff]  ;;  %v114_v49 = vld [vmem:[#allocation7 + $0x8] sm:$0xff]  ;;  %v200_v20 = vsel %vm199_vm4, %v185_v16, 0 }
  0x5b   :  { %369 = vmatprep.subr.mxu1 %v141_v23  ;;  %3934 = vmatpush3.msra.mxu0 %v142_v22  ;;  %v113_v50 = vld [vmem:[#allocation7] sm:$0xff]  ;;  %v115_v51 = vld [vmem:[#allocation7 + $0x10] sm:$0xff]  ;;  %vm209_vm2 = vcmp.lt.s32.totalorder %v186_v17, 6  ;;  %vm215_vm5 = vcmp.lt.s32.totalorder %v200_v20, 6  ;;  %v4379_v22 = vmov 1966171168  }
  0x5c   :  { %370 = vmatpush1.msra.mxu1 %v140_v24  ;;  %3935 = vmatprep.subr.mxu0 %v139_v25  ;;  %v3724_v53 = vld [vmem:[%s4853_s2] ss:$0 sm:$0xff]  ;;  %v4491_v18 = vsel %vm209_vm2, %v186_v17, 6  ;;  %v4500_v21 = vsel %vm215_vm5, %v200_v20, 6  ;;  %v734_v23 = vunpack.c.l.s4 %v4379_v22  ;;  %v3710_v24 = vadd.s32 4294967295, %v186_v17 }
  0x5d   :  { %371 = vmatprep.subr.mxu1 %v138_v26  ;;  %3936 = vmatpush3.msra.mxu0 %v139_v25  ;;  %v180_v60 = vld [vmem:[%s4858_s7] sm:$0xff]  ;;  %vm225_vm3 = vcmp.eq.s32.totalorder %v4472_v62, %v4491_v18  ;;  %vm228_vm6 = vcmp.eq.s32.totalorder %v4472_v62, %v4500_v21  ;;  %v3713_v25 = vadd.s32 4294967291, %v186_v17  ;;  %v3712_v26 = vadd.s32 4294967292, %v186_v17 }
  0x5e   :  { %372 = vmatpush1.msra.mxu1 %v137_v27  ;;  %3937 = vmatprep.subr.mxu0 %v136_v28  ;;  %v4478_v0 = vld [vmem:[%s4855_s4] sm:$0x7]  ;;  %v735_v27 = vunpack.c.0.s8 %v734_v23  ;;  %vm211_vm7 = vcmp.lt.s32.totalorder %v3710_v24, 6  ;;  %s4380_s4 = smov [#allocation13]  }
  0x5f   :  { %373 = vmatprep.subr.mxu1 %v135_v29  ;;  %3938 = vmatpush3.msra.mxu0 %v136_v28  ;;  %v345_v2 = vrot.slane %v4478_v0, %v344_v63  ;;  %v349_v4 = vrot.slane %v4478_v0, %v348_v1  ;;  %vm203_vm8 = vcmp.gt.s32.totalorder %v3713_v25, 0  ;;  %v3715_v28 = vadd.s32 4294967289, %v186_v17  ;;  %s3695_s7 = sshll.u32 %s4380_s4, 4  ;;  %s3696_s7 = int_to_ptr.vmem [resolvable:$true] %s3695_s7 }
  0x60   :  { %374 = vmatpush1.msra.mxu1 %v134_v30  ;;  %3939 = vmatprep.subr.mxu0 %v133_v31  ;;  %v3711_v30 = vadd.s32 4294967294, %v186_v17  ;;  %vm201_vm9 = vcmp.gt.s32.totalorder %v3712_v26, 0  ;;  %s4336_s24 = scalar_lea.vmem %s3696_s7, 256  ;;  %p4341_p3 = scmp.lt.s32.totalorder %s3696_s7, %s3696_s7 }
  0x61   :  { %375 = vmatprep.subr.mxu1 %v132_v32  ;;  %3940 = vmatpush3.msra.mxu0 %v133_v31  ;;  %v3714_v31 = vadd.s32 4294967290, %v186_v17  ;;  %v4512_v32 = vsub.s32 %v735_v27, %v4472_v62  ;;  %vm207_vm10 = vcmp.gt.s32.totalorder %v3715_v28, 0  ;;  %p4337_p2 = scmp.ne.s32.totalorder %s3696_s7, %s4336_s24  ;;  %p4342_p4 = scmp.lt.s32.totalorder %s4336_s24, %s4336_s24 }
  0x62   :  { %376 = vmatpush1.msra.mxu1 %v131_v33  ;;  %3941 = vmatprep.subr.mxu0 %v130_v34  ;;  %vm213_vm11 = vcmp.lt.s32.totalorder %v3711_v30, 6 }
  0x63   :  { %377 = vmatprep.subr.mxu1 %v129_v35  ;;  %3942 = vmatpush3.msra.mxu0 %v130_v34  ;;  %v4514_v34 = vsel %vm211_vm7, %v3710_v24, 6  ;;  %v204_v35 = vsel %vm203_vm8, %v3713_v25, 0  ;;  %vm205_vm15 = vcmp.gt.s32.totalorder %v3714_v31, 0  ;;  %p4343_p5 = por %p4342_p4, %p4341_p3 }
  0x64   :  { %378 = vmatpush1.msra.mxu1 %v128_v36  ;;  %3943 = vmatprep.subr.mxu0 %v127_v37  ;;  %vm226_vm13 = vcmp.eq.s32.totalorder %v4472_v62, %v4514_v34  ;;  %vm219_vm14 = vcmp.lt.s32.totalorder %v204_v35, 6 }
  0x65   :  { %379 = vmatprep.subr.mxu1 %v126_v38  ;;  %3944 = vmatpush3.msra.mxu0 %v127_v37  ;;  %p4344_p6 = pnand %p4343_p5, %p4337_p2 }
  0x66   :  { %380 = vmatpush1.msra.mxu1 %v125_v39  ;;  %3945 = vmatprep.subr.mxu0 %v124_v42  ;;  %v202_v39 = vsel %vm201_vm9, %v3712_v26, 0 }
  0x67   :  { %381 = vmatprep.subr.mxu1 %v123_v40  ;;  %3946 = vmatpush3.msra.mxu0 %v124_v42  ;;  %vm217_vm0 = vcmp.lt.s32.totalorder %v202_v39, 6 }
  0x68   :  { %382 = vmatpush1.msra.mxu1 %v122_v41  ;;  %3947 = vmatprep.subr.mxu0 %v121_v45 }
  0x69   :  { %383 = vmatprep.subr.mxu1 %v120_v43  ;;  %3948 = vmatpush3.msra.mxu0 %v121_v45  ;;  %v4523_v45 = vsel %vm213_vm11, %v3711_v30, 6  ;;  %vm2000_vm11 = vcmask 1041409  }
  0x6a   :  { %384 = vmatpush1.msra.mxu1 %v119_v44  ;;  %3949 = vmatprep.subr.mxu0 %v118_v48  ;;  %v208_v44 = vsel %vm207_vm10, %v3715_v28, 0  ;;  %vm227_vm4 = vcmp.eq.s32.totalorder %v4472_v62, %v4523_v45 }
  0x6b   :  { %385 = vmatprep.subr.mxu1 %v117_v46  ;;  %3950 = vmatpush3.msra.mxu0 %v118_v48  ;;  %v4529_v48 = vsel %vm219_vm14, %v204_v35, 6  ;;  %vm223_vm2 = vcmp.lt.s32.totalorder %v208_v44, 6  ;;  %vm2003_vm14 = vcmask 1042434   ;;  %v3718_v18 = vsel %vm227_vm4, 1.0, %v4376_v52 }
  0x6c   :  { %386 = vmatpush1.msra.mxu1 %v116_v47  ;;  %421 = vmatprep.mubr.f32.mxu1 %v4376_v52  ;;  %vm230_vm5 = vcmp.eq.s32.totalorder %v4472_v62, %v4529_v48 }
  0x6d   :  { %387 = vmatprep.subr.mxu1 %v114_v49  ;;  %3951 = vmatprep.subr.mxu0 %v115_v51  ;;  %v206_v49 = vsel %vm205_vm15, %v3714_v31, 0  ;;  %vm2006_vm15 = vcmask 1043459  }
  0x6e   :  { %388 = vmatpush1.msra.mxu1 %v113_v50  ;;  %3952 = vmatpush3.msra.mxu0 %v115_v51  ;;  %vm221_vm7 = vcmp.lt.s32.totalorder %v206_v49, 6 }
  0x6f   :  { %3986 = vmatprep.subr.mxu0 %v4376_v52  ;;  %3956 = vmatprep.subr.mxu1 %v180_v60 }
 0x10f   :  { %v3920_v54 = vpop.f32.mrf.mxu1 }
 0x110   :  { %v336_v55 = vadd.f32 %v3920_v54, %v3724_v53  ;;  %v4540_v54 = vsel %vm217_vm0, %v202_v39, 6  ;;  %vm2009_vm0 = vcmask 1044484  }
 0x111   :  { %v330_v56 = vpop.f32.mrf.mxu1  ;;  %vm229_vm8 = vcmp.eq.s32.totalorder %v4472_v62, %v4540_v54 }
 0x112   :  { %v331_v57 = vadd.f32 %v3724_v53, %v330_v56  ;;  %v340_v59 = vmax.f32 %v336_v55, 0.0  ;;  %v352_v55 = vsub.s32 2, %v4472_v62  ;;  %v4547_v56 = vsel %vm223_vm2, %v208_v44, 6 }
 0x113   :  { %vm4861_vm9 = vcmp.eq.s32.totalorder %v4472_v62, %v4547_v56  ;;  %vm2012_vm2 = vcmask 1045509  }
 0x114   :  { %v339_v58 = vmax.f32 %v331_v57, 0.0  ;;  %v353_v61 = vrot.slane %v4478_v0, %v352_v55 }
 0x116   :  { %422 = vmatmul.mubr.f32.vlgmr.msra.gmra.mxu1 %v339_v58  ;;  %3953 = vmatprep.mubr.f32.mxu0 %v339_v58 }
 0x117   :  { %3954 = vmatmul.mubr.f32.vlgmr.msra.gmra.mxu0 %v340_v59  ;;  %427 = vmatprep.mubr.f32.mxu1 %v4376_v52 }
 0x118   :  { %3957 = vmatpush3.xpose.msra.mxu1 %v180_v60  ;;  %3988 = vmatprep.mubr.msk.f32.mxu0 %vm4377_vm1, %v4376_v52  ;;  %v4565_v60 = vsel %vm221_vm7, %v206_v49, 6  ;;  %vm2015_vm7 = vcmask 1046534  }
 0x119   :  { %3961 = vmatprep.subr.mxu1 %v4376_v52  ;;  %3987 = vmatpush3.msk.msra.mxu0 %vm228_vm6, %v4378_v19  ;;  %vm231_vm10 = vcmp.eq.s32.totalorder %v4472_v62, %v4565_v60 }
 0x11a   :  { %428 = vmatmul.mubr.f32.gmra.mxu1 %v340_v59  ;;  %3996 = vmatprep.subr.mxu0 %v4376_v52 }
 0x1d6   :  { %v423_v3 = vpop.f32.mrf.mxu1 }
 0x1d7   :  { %v424_v5 = vadd.f32 %v423_v3, %v345_v2  ;;  %v3955_v63 = vpop.f32.mrf.mxu0 }
 0x1d8   :  { %v425_v6 = vpop.f32.mrf.mxu1 }
 0x1d9   :  { %4196 = vtanh.f32 %v424_v5  ;;  %v426_v7 = vadd.f32 %v425_v6, %v349_v4  ;;  %v500_v5 = vpop.f32.mrf.mxu0 }
 0x1da   :  { %v429_v8 = vpop.f32.mrf.mxu1 }
 0x1db   :  { %v430_v9 = vadd.f32 %v429_v8, %v345_v2 }
 0x1dc   :  { %v431_v10 = vpop.f32.mrf.mxu1 }
 0x1dd   :  { %4198 = vtanh.f32 %v430_v9  ;;  %v432_v11 = vadd.f32 %v431_v10, %v349_v4  ;;  %v506_v4 = vadd.f32 %v3955_v63, %v353_v61  ;;  %v501_v9 = vadd.f32 %v500_v5, %v353_v61 }
 0x1de   :  { %4200 = vtanh.f32 %v426_v7 }
 0x1df   :  { %4202 = vtanh.f32 %v432_v11 }
 0x1e0   :  { %4204 = vtanh.f32 %v506_v4 }
 0x1e1   :  { %4206 = vtanh.f32 %v501_v9 }
 0x1e6   :  { %v4197_v12 = vpop.eup %4196 }
 0x1e7   :  { %3958 = vmatprep.mubr.f32.mxu1 %v4197_v12 }
 0x1ea   :  { %v4199_v13 = vpop.eup %4198 }
 0x1eb   :  { %v4201_v14 = vpop.eup %4200  ;;  %3959 = vmatmul.mubr.f32.vlgmr.msra.gmra.mxu1 %v4199_v13 }
 0x1ec   :  { %3962 = vmatpush3.xpose.msra.mxu1 %v4201_v14  ;;  %3963 = vmatprep.mubr.msk.f32.mxu1 %vm4377_vm1, %v4376_v52  ;;  %v4203_v15 = vpop.eup %4202 }
 0x1ed   :  { %3966 = vmatprep.subr.mxu1 %v4376_v52  ;;  %v4205_v17 = vpop.eup %4204 }
 0x1ee   :  { %v4207_v22 = vpop.eup %4206 }
 0x1ef   :  { %3964 = vmatmul.mubr.f32.vlgmr.msra.gmra.mxu1 %v4197_v12 }
 0x1f0   :  { %3967 = vmatpush3.xpose.msra.mxu1 %v4203_v15  ;;  %3968 = vmatprep.mubr.msk.f32.mxu1 %vm4377_vm1, %v4376_v52 }
 0x1f1   :  { %3971 = vmatprep.subr.mxu1 %v4376_v52 }
 0x1f3   :  { %3969 = vmatmul.mubr.f32.vlgmr.msra.gmra.mxu1 %v4199_v13 }
 0x1f4   :  { %3973 = vmatprep.mubr.msk.f32.mxu1 %vm4377_vm1, %v4376_v52  ;;  %3972 = vmatpush3.msk.msra.mxu1 %vm225_vm3, %v4378_v19 }
 0x1f5   :  { %3976 = vmatprep.subr.mxu1 %v4376_v52 }
 0x2ab   :  { %v4509_v29 = vpop.f32.mrf.mxu1 }
 0x2ac   :  { %v788_v57 = vrot.slane %v4509_v29, %v4512_v32  ;;  %v781_v1 = vcombine.high %v4509_v29, %v4509_v29 }
 0x2ad   :  { %v581_v33 = vpop.f32.mrf.mxu1 }
 0x2ae   :  { %v732_v36 = vcombine.high %v581_v33, %v581_v33  ;;  %v739_v37 = vrot.slane %v581_v33, %v4512_v32  ;;  %v796_v0 = vcombine.high %v788_v57, %v788_v57  ;;  %v795_v6 = vrot.slane %v781_v1, %v4512_v32 }
 0x2af   :  { %v4517_v38 = vpop.f32.mrf.mxu1  ;;  %v804_v11 = vrot.slane %v788_v57, %v4512_v32 }
 0x2b0   :  { %v746_v40 = vrot.slane %v732_v36, %v4512_v32  ;;  %v747_v41 = vcombine.high %v739_v37, %v739_v37  ;;  %v755_v42 = vrot.slane %v739_v37, %v4512_v32  ;;  %v818_v7 = vrot.slane %v796_v0, %v4512_v32 }
 0x2b1   :  { %v3965_v43 = vpop.f32.mrf.mxu1  ;;  %v797_v10 = vcombine.high %v795_v6, %v795_v6  ;;  %v826_v14 = vcombine.high %v804_v11, %v804_v11  ;;  %v811_v15 = vrot.slane %v795_v6, %v4512_v32 }
 0x2b2   :  { %v769_v46 = vrot.slane %v747_v41, %v4512_v32  ;;  %3974 = vmatmul.mubr.msk.f32.vlgmr.msra.gmra.mxu1 %vm830_vm12, %v755_v42  ;;  %v748_v50 = vcombine.high %v746_v40, %v746_v40  ;;  %v777_v59 = vcombine.high %v755_v42, %v755_v42  ;;  %v762_v2 = vrot.slane %v746_v40, %v4512_v32 }
 0x2b3   :  { %v4527_v47 = vpop.f32.mrf.mxu1  ;;  %3977 = vmatpush3.msk.msra.mxu1 %vm226_vm13, %v4378_v19  ;;  %3978 = vmatprep.mubr.msk.f32.mxu1 %vm4377_vm1, %v4376_v52  ;;  %v828_v12 = vcombine.high %v818_v7, %v818_v7  ;;  %v825_v13 = vrot.slane %v797_v10, %v4512_v32  ;;  %v827_v20 = vcombine.high %v811_v15, %v811_v15 }
 0x2b4   :  { %v779_v51 = vcombine.high %v769_v46, %v769_v46  ;;  %3981 = vmatprep.subr.mxu1 %v4376_v52  ;;  %v776_v58 = vrot.slane %v748_v50, %v4512_v32  ;;  %v778_v8 = vcombine.high %v762_v2, %v762_v2 }
 0x2b5   :  { %v3970_v53 = vpop.f32.mrf.mxu1  ;;  %v829_v16 = vcombine.high %v825_v13, %v825_v13 }
 0x2b6   :  { %3979 = vmatmul.mubr.msk.f32.vlgmr.msra.gmra.mxu1 %vm830_vm12, %v769_v46  ;;  %3989 = vmatmul.mubr.msk.f32.vlgmr.msra.gmra.mxu0 %vm830_vm12, %v779_v51  ;;  %v780_v3 = vcombine.high %v776_v58, %v776_v58 }
 0x2b7   :  { %3982 = vmatpush3.msk.msra.mxu1 %vm227_vm4, %v4378_v19  ;;  %3983 = vmatprep.mubr.msk.f32.mxu1 %vm4377_vm1, %v4376_v52 }
 0x2b8   :  { %3991 = vmatprep.subr.mxu1 %v4376_v52  ;;  %3997 = vmatpush3.msk.msra.mxu0 %vm230_vm5, %v4378_v19 }
 0x2b9   :  { %3998 = vmatprep.mubr.msk.f32.mxu0 %vm4377_vm1, %v4376_v52  ;;  %4006 = vmatprep.subr.mxu0 %v4376_v52 }
 0x2ba   :  { %3984 = vmatmul.mubr.msk.f32.vlgmr.msra.gmra.mxu1 %vm830_vm12, %v777_v59  ;;  %3999 = vmatmul.mubr.msk.f32.vlgmr.msra.gmra.mxu0 %vm830_vm12, %v776_v58 }
 0x2bb   :  { %3992 = vmatpush3.msk.msra.mxu1 %vm229_vm8, %v4378_v19  ;;  %3993 = vmatprep.mubr.msk.f32.mxu1 %vm4377_vm1, %v4376_v52 }
 0x2bc   :  { %4001 = vmatprep.subr.mxu1 %v4376_v52  ;;  %4007 = vmatpush3.msk.msra.mxu0 %vm4861_vm9, %v4378_v19 }
 0x2bd   :  { %4008 = vmatprep.mubr.msk.f32.mxu0 %vm4377_vm1, %v4376_v52  ;;  %4016 = vmatprep.subr.mxu0 %v4376_v52 }
 0x2be   :  { %3994 = vmatmul.mubr.msk.f32.vlgmr.msra.gmra.mxu1 %vm830_vm12, %v762_v2  ;;  %4009 = vmatmul.mubr.msk.f32.vlgmr.msra.gmra.mxu0 %vm830_vm12, %v780_v3 }
 0x2bf   :  { %4002 = vmatpush3.msk.msra.mxu1 %vm231_vm10, %v4378_v19  ;;  %4003 = vmatprep.mubr.msk.f32.mxu1 %vm4377_vm1, %v4376_v52 }
 0x2c0   :  { %4011 = vmatprep.subr.mxu1 %v4376_v52  ;;  %4017 = vmatpush3.msk.msra.mxu0 %vm226_vm13, %v4378_v19 }
 0x2c1   :  { %4018 = vmatprep.mubr.msk.f32.mxu0 %vm4377_vm1, %v4376_v52  ;;  %4026 = vmatprep.subr.mxu0 %v4376_v52 }
 0x2c2   :  { %4004 = vmatmul.mubr.msk.f32.vlgmr.msra.gmra.mxu1 %vm830_vm12, %v778_v8  ;;  %4019 = vmatmul.mubr.msk.f32.vlgmr.msra.gmra.mxu0 %vm830_vm12, %v818_v7 }
 0x2c3   :  { %4012 = vmatpush3.msk.msra.mxu1 %vm225_vm3, %v4378_v19  ;;  %4013 = vmatprep.mubr.msk.f32.mxu1 %vm4377_vm1, %v4376_v52 }
 0x2c4   :  { %4021 = vmatprep.subr.mxu1 %v4376_v52  ;;  %4027 = vmatpush3.msk.msra.mxu0 %vm228_vm6, %v4378_v19 }
 0x2c5   :  { %4028 = vmatprep.mubr.msk.f32.mxu0 %vm4377_vm1, %v4376_v52  ;;  %4036 = vmatprep.subr.mxu0 %v4376_v52 }
 0x2c6   :  { %4014 = vmatmul.mubr.msk.f32.vlgmr.msra.gmra.mxu1 %vm830_vm12, %v804_v11  ;;  %4029 = vmatmul.mubr.msk.f32.vlgmr.msra.gmra.mxu0 %vm830_vm12, %v828_v12 }
 0x2c7   :  { %4022 = vmatpush3.msk.msra.mxu1 %vm227_vm4, %v4378_v19  ;;  %4023 = vmatprep.mubr.msk.f32.mxu1 %vm4377_vm1, %v4376_v52 }
 0x2c8   :  { %4031 = vmatprep.subr.mxu1 %v4376_v52  ;;  %4037 = vmatpush3.msk.msra.mxu0 %vm230_vm5, %v4378_v19 }
 0x2c9   :  { %4038 = vmatprep.mubr.msk.f32.mxu0 %vm4377_vm1, %v4376_v52  ;;  %4046 = vmatprep.subr.mxu0 %v4376_v52 }
 0x2ca   :  { %4024 = vmatmul.mubr.msk.f32.vlgmr.msra.gmra.mxu1 %vm830_vm12, %v826_v14  ;;  %4039 = vmatmul.mubr.msk.f32.vlgmr.msra.gmra.mxu0 %vm830_vm12, %v825_v13 }
 0x2cb   :  { %4032 = vmatpush3.msk.msra.mxu1 %vm229_vm8, %v4378_v19  ;;  %4047 = vmatpush3.msk.msra.mxu0 %vm4861_vm9, %v4378_v19  ;;  %vm2018_vm9 = vcmask 1047559  }
 0x2cc   :  { %4033 = vmatprep.mubr.msk.f32.mxu1 %vm4377_vm1, %v4376_v52  ;;  %4041 = vmatprep.subr.mxu1 %v4376_v52 }
 0x2cd   :  { %4048 = vmatprep.mubr.msk.f32.mxu0 %vm4377_vm1, %v4376_v52  ;;  %4056 = vmatprep.subr.mxu0 %v4376_v52 }
 0x2ce   :  { %4034 = vmatmul.mubr.msk.f32.vlgmr.msra.gmra.mxu1 %vm830_vm12, %v811_v15  ;;  %4049 = vmatmul.mubr.msk.f32.vlgmr.msra.gmra.mxu0 %vm830_vm12, %v829_v16 }
 0x2cf   :  { %4042 = vmatpush3.msk.msra.mxu1 %vm231_vm10, %v4378_v19  ;;  %4057 = vmatpush3.msra.mxu0 %v4205_v17 }
 0x2d0   :  { %4043 = vmatprep.mubr.msk.f32.mxu1 %vm4377_vm1, %v4376_v52  ;;  %4051 = vmatprep.subr.mxu1 %v4376_v52 }
 0x2d1   :  { %4058 = vmatprep.mubr.msk.f32.mxu0 %vm4377_vm1, %v4376_v52  ;;  %4066 = vmatprep.subr.mxu0 %v4376_v52 }
 0x2d2   :  { %4044 = vmatmul.mubr.msk.f32.vlgmr.msra.gmra.mxu1 %vm830_vm12, %v827_v20 }
 0x2d3   :  { %4052 = vmatpush3.msra.mxu1 %v4207_v22  ;;  %4053 = vmatprep.mubr.msk.f32.mxu1 %vm4377_vm1, %v4376_v52 }
 0x2d4   :  { %4061 = vmatprep.subr.mxu1 %v4376_v52 }
 0x372   :  { %v899_v19 = vpop.f32.mrf.mxu1 }
 0x374   :  { %v3975_v23 = vpop.f32.mrf.mxu1 }
 0x376   :  { %v971_v24 = vpop.f32.mrf.mxu1  ;;  %v1115_v25 = vpop.f32.mrf.mxu0 }
 0x377   :  { %v1999_v26 = vrot.slane %v971_v24, 7  ;;  %v2005_v39 = vrot.slane %v1115_v25, 5 }
 0x378   :  { %v3980_v27 = vpop.f32.mrf.mxu1  ;;  %v3990_v28 = vpop.f32.mrf.mxu0 }
 0x379   :  { %v2001_v33 = vsel %vm2000_vm11, %v1999_v26, %v899_v19 }
 0x37a   :  { %v1043_v29 = vpop.f32.mrf.mxu1  ;;  %v1259_v30 = vpop.f32.mrf.mxu0 }
 0x37b   :  { %v2002_v31 = vrot.slane %v1043_v29, 6  ;;  %v2011_v50 = vrot.slane %v1259_v30, 3 }
 0x37c   :  { %v3985_v35 = vpop.f32.mrf.mxu1  ;;  %v4000_v36 = vpop.f32.mrf.mxu0 }
 0x37d   :  { %v2004_v37 = vsel %vm2003_vm14, %v2002_v31, %v2001_v33 }
 0x37e   :  { %v1187_v40 = vpop.f32.mrf.mxu1  ;;  %v1403_v41 = vpop.f32.mrf.mxu0  ;;  %v2007_v43 = vsel %vm2006_vm15, %v2005_v39, %v2004_v37 }
 0x37f   :  { %v2008_v42 = vrot.slane %v1187_v40, 4  ;;  %v2017_v57 = vrot.slane %v1403_v41, 1 }
 0x380   :  { %v3995_v44 = vpop.f32.mrf.mxu1  ;;  %v4010_v46 = vpop.f32.mrf.mxu0 }
 0x381   :  { %v2010_v49 = vsel %vm2009_vm0, %v2008_v42, %v2007_v43 }
 0x382   :  { %v1331_v51 = vpop.f32.mrf.mxu1  ;;  %v1547_v53 = vpop.f32.mrf.mxu0  ;;  %v2013_v61 = vsel %vm2012_vm2, %v2011_v50, %v2010_v49 }
 0x383   :  { %v2014_v55 = vrot.slane %v1331_v51, 2  ;;  %v2020_v7 = vrot.slane %v1547_v53, 7  ;;  %v3716_v53 = vsel %vm225_vm3, 1.0, %v4376_v52  ;;  %vm4862_vm3 = vcmp.eq.s32.totalorder %v4472_v62, %v4547_v56 }
 0x384   :  { %v4005_v58 = vpop.f32.mrf.mxu1  ;;  %v4020_v59 = vpop.f32.mrf.mxu0 }
 0x385   :  { %v2016_v63 = vsel %vm2015_vm7, %v2014_v55, %v2013_v61 }
 0x386   :  { %v1475_v1 = vpop.f32.mrf.mxu1  ;;  %v1691_v0 = vpop.f32.mrf.mxu0  ;;  %v2019_v2 = vsel %vm2018_vm9, %v2017_v57, %v2016_v63  ;;  %v3720_v63 = vsel %vm229_vm8, 1.0, %v4376_v52 }
 0x387   :  { %v2036_v3 = vadd.f32 %v2019_v2, %v4517_v38  ;;  %v2021_v11 = vsel %vm2000_vm11, %v2020_v7, %v1475_v1  ;;  %v2024_v15 = vrot.slane %v1691_v0, 5  ;;  %v3722_v0 = vsel %vm231_vm10, 1.0, %v4376_v52 }
 0x388   :  { %v4015_v4 = vpop.f32.mrf.mxu1  ;;  %v4030_v5 = vpop.f32.mrf.mxu0 }
 0x389   :  { %v2038_v6 = vsel %vm830_vm12, %v2036_v3, -inf }
 0x38a   :  { %v1835_v8 = vpop.f32.mrf.mxu0  ;;  %2039 = vmax.xlane.f32.xlu0 %v2038_v6  ;;  %v1619_v9 = vpop.f32.mrf.mxu1  ;;  %v3719_v6 = vsel %vm228_vm6, 1.0, %v4376_v52 }
 0x38b   :  { %v2022_v10 = vrot.slane %v1619_v9, 6  ;;  %v2028_v24 = vrot.slane %v1835_v8, 3 }
 0x38c   :  { %v4025_v12 = vpop.f32.mrf.mxu1  ;;  %v4040_v13 = vpop.f32.mrf.mxu0 }
 0x38d   :  { %v2023_v14 = vsel %vm2003_vm14, %v2022_v10, %v2021_v11  ;;  %v3721_v10 = vsel %vm230_vm5, 1.0, %v4376_v52  ;;  %v3723_v13 = vsel %vm4862_vm3, 1.0, %v4376_v52 }
 0x38e   :  { %v1763_v16 = vpop.f32.mrf.mxu1  ;;  %v1979_v17 = vpop.f32.mrf.mxu0  ;;  %v2025_v38 = vsel %vm2006_vm15, %v2024_v15, %v2023_v14 }
 0x38f   :  { %v2026_v20 = vrot.slane %v1763_v16, 4  ;;  %v2032_v27 = vrot.slane %v1979_v17, 1 }
 0x390   :  { %v4035_v22 = vpop.f32.mrf.mxu1  ;;  %v4050_v19 = vpop.f32.mrf.mxu0 }
 0x391   :  { %v2027_v23 = vsel %vm2009_vm0, %v2026_v20, %v2025_v38  ;;  %v181_v19 = vld [vmem:[#allocation11] sm:$0xff] }
 0x392   :  { %v1907_v25 = vpop.f32.mrf.mxu1  ;;  %v2029_v28 = vsel %vm2012_vm2, %v2028_v24, %v2027_v23  ;;  %v176_v23 = vld [vmem:[#allocation8 + $0x78] sm:$0xff]  ;;  %v175_v24 = vld [vmem:[#allocation8 + $0x70] sm:$0xff] }
 0x393   :  { %v2030_v26 = vrot.slane %v1907_v25, 2  ;;  %v174_v25 = vld [vmem:[#allocation8 + $0x68] sm:$0xff] }
 0x394   :  { %v4045_v29 = vpop.f32.mrf.mxu1 }
 0x395   :  { %v2031_v30 = vsel %vm2015_vm7, %v2030_v26, %v2029_v28  ;;  %v172_v26 = vld [vmem:[#allocation8 + $0x58] sm:$0xff]  ;;  %v169_v28 = vld [vmem:[#allocation8 + $0x40] sm:$0xff] }
 0x396   :  { %v2033_v31 = vsel %vm2018_vm9, %v2032_v27, %v2031_v30  ;;  %v170_v27 = vld [vmem:[#allocation8 + $0x48] sm:$0xff]  ;;  %v168_v29 = vld [vmem:[#allocation8 + $0x38] sm:$0xff]  ;;  %v167_v30 = vld [vmem:[#allocation8 + $0x30] sm:$0xff] }
 0x397   :  { %v2037_v33 = vadd.f32 %v2033_v31, %v4527_v47  ;;  %v166_v31 = vld [vmem:[#allocation8 + $0x28] sm:$0xff] }
 0x399   :  { %v2041_v35 = vsel %vm830_vm12, %v2037_v33, -inf }
 0x39a   :  { %2042 = vmax.xlane.f32.xlu0 %v2041_v35  ;;  %v164_v35 = vld [vmem:[#allocation8 + $0x18] sm:$0xff] }
 0x413   :  { %v2040_v36 = vpop.xlane.xlu0 %2039 }
 0x414   :  { %v2044_v37 = vsub.f32 %v2036_v3, %v2040_v36  ;;  %v3717_v3 = vsel %vm226_vm13, 1.0, %v4376_v52 }
 0x416   :  { %v2046_v39 = vmul.f32 1.442695, %v2044_v37 }
 0x418   :  { %4208 = vpow2.f32 %v2046_v39 }
 0x423   :  { %v2043_v40 = vpop.xlane.xlu0 %2042 }
 0x424   :  { %v2045_v41 = vsub.f32 %v2037_v33, %v2043_v40  ;;  %v165_v33 = vld [vmem:[#allocation8 + $0x20] sm:$0xff] }
 0x425   :  { %v4209_v42 = vpop.eup %4208 }
 0x426   :  { %v2048_v43 = vmul.f32 1.442695, %v2045_v41  ;;  %v2050_v44 = vsel %vm830_vm12, %v4209_v42, 0.0 }
 0x427   :  { %2051 = vadd.xlane.f32.xlu1 %v2050_v44 }
 0x428   :  { %4210 = vpow2.f32 %v2048_v43 }
 0x435   :  { %v4211_v46 = vpop.eup %4210 }
 0x436   :  { %v2053_v49 = vsel %vm830_vm12, %v4211_v46, 0.0 }
 0x437   :  { %2054 = vadd.xlane.f32.xlu1 %v2053_v49 }
 0x4b0   :  { %v2052_v47 = vpop.xlane.xlu1 %2051 }
 0x4b1   :  { %4212 = vrcp.f32 %v2052_v47 }
 0x4be   :  { %v4213_v50 = vpop.eup %4212 }
 0x4bf   :  { %v2058_v51 = vmul.f32 %v4213_v50, %v4209_v42 }
 0x4c0   :  { %v2055_v55 = vpop.xlane.xlu1 %2054 }
 0x4c1   :  { %4214 = vrcp.f32 %v2055_v55  ;;  %4054 = vmatmul.mubr.msk.f32.vlgmr.msra.gmra.mxu1 %vm830_vm12, %v2058_v51  ;;  %v2213_v57 = vrot.slane %v2058_v51, %v4512_v32  ;;  %v2206_v59 = vcombine.high %v2058_v51, %v2058_v51 }
 0x4c2   :  { %4062 = vmatpush3.xpose.msk.msra.mxu1 %vm830_vm12, %v3716_v53  ;;  %4063 = vmatprep.mubr.msk.f32.mxu1 %vm4377_vm1, %v4376_v52 }
 0x4c3   :  { %v2229_v58 = vrot.slane %v2213_v57, %v4512_v32  ;;  %4071 = vmatprep.subr.mxu1 %v4376_v52  ;;  %v2220_v1 = vrot.slane %v2206_v59, %v4512_v32  ;;  %v2221_v5 = vcombine.high %v2213_v57, %v2213_v57 }
 0x4c5   :  { %4064 = vmatmul.mubr.msk.f32.vlgmr.msra.gmra.mxu1 %vm830_vm12, %v2229_v58  ;;  %v2251_v61 = vcombine.high %v2229_v58, %v2229_v58  ;;  %v2236_v45 = vrot.slane %v2220_v1, %v4512_v32  ;;  %v2243_v34 = vrot.slane %v2221_v5, %v4512_v32  ;;  %v2222_v9 = vcombine.high %v2220_v1, %v2220_v1 }
 0x4c6   :  { %4072 = vmatpush3.xpose.msk.msra.mxu1 %vm830_vm12, %v3718_v18  ;;  %4073 = vmatprep.mubr.msk.f32.mxu1 %vm4377_vm1, %v4376_v52 }
 0x4c7   :  { %4081 = vmatprep.subr.mxu1 %v4376_v52  ;;  %v2252_v4 = vcombine.high %v2236_v45, %v2236_v45  ;;  %v2253_v21 = vcombine.high %v2243_v34, %v2243_v34  ;;  %v2250_v48 = vrot.slane %v2222_v9, %v4512_v32 }
 0x4c9   :  { %4074 = vmatmul.mubr.msk.f32.vlgmr.msra.gmra.mxu1 %vm830_vm12, %v2251_v61  ;;  %v2254_v62 = vcombine.high %v2250_v48, %v2250_v48 }
 0x4ca   :  { %4082 = vmatpush3.xpose.msk.msra.mxu1 %vm830_vm12, %v3720_v63  ;;  %4083 = vmatprep.mubr.msk.f32.mxu1 %vm4377_vm1, %v4376_v52 }
 0x4cb   :  { %4091 = vmatprep.subr.mxu1 %v4376_v52 }
 0x4cd   :  { %4084 = vmatmul.mubr.msk.f32.vlgmr.msra.gmra.mxu1 %vm830_vm12, %v2236_v45 }
 0x4ce   :  { %v4215_v54 = vpop.eup %4214  ;;  %4092 = vmatpush3.xpose.msk.msra.mxu1 %vm830_vm12, %v3722_v0  ;;  %4093 = vmatprep.mubr.msk.f32.mxu1 %vm4377_vm1, %v4376_v52 }
 0x4cf   :  { %v2059_v2 = vmul.f32 %v4215_v54, %v4211_v46  ;;  %4101 = vmatprep.subr.mxu1 %v4376_v52 }
 0x4d1   :  { %4059 = vmatmul.mubr.msk.f32.vlgmr.msra.gmra.mxu0 %vm830_vm12, %v2059_v2  ;;  %4094 = vmatmul.mubr.msk.f32.vlgmr.msra.gmra.mxu1 %vm830_vm12, %v2252_v4  ;;  %v2262_v60 = vrot.slane %v2059_v2, %v4512_v32  ;;  %v2255_v8 = vcombine.high %v2059_v2, %v2059_v2 }
 0x4d2   :  { %4067 = vmatpush3.xpose.msk.msra.mxu0 %vm830_vm12, %v3717_v3  ;;  %4102 = vmatpush3.xpose.msk.msra.mxu1 %vm830_vm12, %v3716_v53 }
 0x4d3   :  { %4068 = vmatprep.mubr.msk.f32.mxu0 %vm4377_vm1, %v4376_v52  ;;  %4076 = vmatprep.subr.mxu0 %v4376_v52  ;;  %v2278_v7 = vrot.slane %v2262_v60, %v4512_v32  ;;  %v2269_v12 = vrot.slane %v2255_v8, %v4512_v32  ;;  %v2270_v15 = vcombine.high %v2262_v60, %v2262_v60 }
 0x4d4   :  { %4103 = vmatprep.mubr.msk.f32.mxu1 %vm4377_vm1, %v4376_v52  ;;  %4111 = vmatprep.subr.mxu1 %v4376_v52 }
 0x4d5   :  { %4069 = vmatmul.mubr.msk.f32.vlgmr.msra.gmra.mxu0 %vm830_vm12, %v2243_v34  ;;  %4104 = vmatmul.mubr.msk.f32.vlgmr.msra.gmra.mxu1 %vm830_vm12, %v2278_v7  ;;  %v2300_v11 = vcombine.high %v2278_v7, %v2278_v7  ;;  %v2285_v14 = vrot.slane %v2269_v12, %v4512_v32  ;;  %v2292_v16 = vrot.slane %v2270_v15, %v4512_v32 }
 0x4d6   :  { %4077 = vmatpush3.xpose.msk.msra.mxu0 %vm830_vm12, %v3719_v6  ;;  %4112 = vmatpush3.xpose.msk.msra.mxu1 %vm830_vm12, %v3718_v18  ;;  %v2271_v20 = vcombine.high %v2269_v12, %v2269_v12 }
 0x4d7   :  { %4078 = vmatprep.mubr.msk.f32.mxu0 %vm4377_vm1, %v4376_v52  ;;  %4086 = vmatprep.subr.mxu0 %v4376_v52  ;;  %v2301_v56 = vcombine.high %v2285_v14, %v2285_v14  ;;  %v2302_v17 = vcombine.high %v2292_v16, %v2292_v16 }
 0x4d8   :  { %4113 = vmatprep.mubr.msk.f32.mxu1 %vm4377_vm1, %v4376_v52  ;;  %4121 = vmatprep.subr.mxu1 %v4376_v52  ;;  %v2299_v38 = vrot.slane %v2271_v20, %v4512_v32  ;;  %v173_v32 = vld [vmem:[#allocation8 + $0x60] sm:$0xff] }
 0x4d9   :  { %4079 = vmatmul.mubr.msk.f32.vlgmr.msra.gmra.mxu0 %vm830_vm12, %v2253_v21  ;;  %4114 = vmatmul.mubr.msk.f32.vlgmr.msra.gmra.mxu1 %vm830_vm12, %v2300_v11 }
 0x4da   :  { %4087 = vmatpush3.xpose.msk.msra.mxu0 %vm830_vm12, %v3721_v10  ;;  %4122 = vmatpush3.xpose.msk.msra.mxu1 %vm830_vm12, %v3720_v63  ;;  %v2303_v22 = vcombine.high %v2299_v38, %v2299_v38 }
 0x4db   :  { %4088 = vmatprep.mubr.msk.f32.mxu0 %vm4377_vm1, %v4376_v52  ;;  %4096 = vmatprep.subr.mxu0 %v4376_v52 }
 0x4dc   :  { %4123 = vmatprep.mubr.msk.f32.mxu1 %vm4377_vm1, %v4376_v52  ;;  %4131 = vmatprep.subr.mxu1 %v4376_v52 }
 0x4dd   :  { %4089 = vmatmul.mubr.msk.f32.vlgmr.msra.gmra.mxu0 %vm830_vm12, %v2250_v48  ;;  %4124 = vmatmul.mubr.msk.f32.vlgmr.msra.gmra.mxu1 %vm830_vm12, %v2285_v14 }
 0x4de   :  { %4097 = vmatpush3.xpose.msk.msra.mxu0 %vm830_vm12, %v3723_v13  ;;  %4132 = vmatpush3.xpose.msk.msra.mxu1 %vm830_vm12, %v3722_v0 }
 0x4df   :  { %4098 = vmatprep.mubr.msk.f32.mxu0 %vm4377_vm1, %v4376_v52  ;;  %4106 = vmatprep.subr.mxu0 %v4376_v52 }
 0x4e0   :  { %4133 = vmatprep.mubr.msk.f32.mxu1 %vm4377_vm1, %v4376_v52  ;;  %4141 = vmatprep.subr.mxu1 %v181_v19 }
 0x4e1   :  { %4099 = vmatmul.mubr.msk.f32.vlgmr.msra.gmra.mxu0 %vm830_vm12, %v2254_v62  ;;  %4134 = vmatmul.mubr.msk.f32.vlgmr.msra.gmra.mxu1 %vm830_vm12, %v2301_v56 }
 0x4e2   :  { %4107 = vmatpush3.xpose.msk.msra.mxu0 %vm830_vm12, %v3717_v3  ;;  %4108 = vmatprep.mubr.msk.f32.mxu0 %vm4377_vm1, %v4376_v52 }
 0x4e3   :  { %4116 = vmatprep.subr.mxu0 %v4376_v52  ;;  %4142 = vmatpush3.msra.mxu1 %v181_v19 }
 0x4e5   :  { %4109 = vmatmul.mubr.msk.f32.vlgmr.msra.gmra.mxu0 %vm830_vm12, %v2292_v16 }
 0x4e6   :  { %4117 = vmatpush3.xpose.msk.msra.mxu0 %vm830_vm12, %v3719_v6  ;;  %4118 = vmatprep.mubr.msk.f32.mxu0 %vm4377_vm1, %v4376_v52 }
 0x4e7   :  { %4126 = vmatprep.subr.mxu0 %v4376_v52 }
 0x4e9   :  { %4119 = vmatmul.mubr.msk.f32.vlgmr.msra.gmra.mxu0 %vm830_vm12, %v2302_v17 }
 0x4ea   :  { %4127 = vmatpush3.xpose.msk.msra.mxu0 %vm830_vm12, %v3721_v10  ;;  %4128 = vmatprep.mubr.msk.f32.mxu0 %vm4377_vm1, %v4376_v52 }
 0x4eb   :  { %4136 = vmatprep.subr.mxu0 %v4376_v52 }
 0x4ed   :  { %4129 = vmatmul.mubr.msk.f32.vlgmr.msra.gmra.mxu0 %vm830_vm12, %v2299_v38 }
 0x4ee   :  { %4137 = vmatpush3.xpose.msk.msra.mxu0 %vm830_vm12, %v3723_v13  ;;  %4138 = vmatprep.mubr.msk.f32.mxu0 %vm4377_vm1, %v4376_v52  ;;  %v171_v52 = vld [vmem:[#allocation8 + $0x50] sm:$0xff] }
 0x4ef   :  { %4146 = vmatprep.subr.mxu0 %v176_v23 }
 0x4f1   :  { %4139 = vmatmul.mubr.msk.f32.vlgmr.msra.gmra.mxu0 %vm830_vm12, %v2303_v22 }
 0x4f2   :  { %4147 = vmatpush3.msra.mxu0 %v176_v23 }
 0x4f3   :  { %4148 = vmatprep.subr.mxu0 %v175_v24 }
 0x4f4   :  { %4149 = vmatpush3.msra.mxu0 %v175_v24 }
 0x4f5   :  { %4150 = vmatprep.subr.mxu0 %v174_v25 }
 0x4f6   :  { %4151 = vmatpush3.msra.mxu0 %v174_v25 }
 0x4f7   :  { %4152 = vmatprep.subr.mxu0 %v173_v32 }
 0x4f8   :  { %4153 = vmatpush3.msra.mxu0 %v173_v32 }
 0x4f9   :  { %4154 = vmatprep.subr.mxu0 %v172_v26 }
 0x4fa   :  { %4155 = vmatpush3.msra.mxu0 %v172_v26 }
 0x4fb   :  { %4156 = vmatprep.subr.mxu0 %v171_v52 }
 0x4fc   :  { %4157 = vmatpush3.msra.mxu0 %v171_v52 }
 0x4fd   :  { %4158 = vmatprep.subr.mxu0 %v170_v27 }
 0x4fe   :  { %4159 = vmatpush3.msra.mxu0 %v170_v27 }
 0x4ff   :  { %4160 = vmatprep.subr.mxu0 %v169_v28 }
 0x500   :  { %4161 = vmatpush3.msra.mxu0 %v169_v28 }
 0x501   :  { %4162 = vmatprep.subr.mxu0 %v168_v29 }
 0x502   :  { %4163 = vmatpush3.msra.mxu0 %v168_v29 }
 0x503   :  { %4164 = vmatprep.subr.mxu0 %v167_v30 }
 0x504   :  { %4165 = vmatpush3.msra.mxu0 %v167_v30 }
 0x505   :  { %4166 = vmatprep.subr.mxu0 %v166_v31 }
 0x506   :  { %4167 = vmatpush3.msra.mxu0 %v166_v31 }
 0x507   :  { %4168 = vmatprep.subr.mxu0 %v165_v33 }
 0x508   :  { %4169 = vmatpush3.msra.mxu0 %v165_v33 }
 0x509   :  { %4170 = vmatprep.subr.mxu0 %v164_v35 }
 0x50a   :  { %4171 = vmatpush3.msra.mxu0 %v164_v35 }
 0x581   :  { %v4823_v36 = vpop.f32.mrf.mxu1 }
 0x583   :  { %v4055_v37 = vpop.f32.mrf.mxu1 }
 0x584   :  { %v163_v37 = vld [vmem:[#allocation8 + $0x10] sm:$0xff] }
 0x585   :  { %v2375_v39 = vpop.f32.mrf.mxu1  ;;  %4172 = vmatprep.subr.mxu0 %v163_v37 }
 0x586   :  { %4173 = vmatpush3.msra.mxu0 %v163_v37 }
 0x587   :  { %v4065_v40 = vpop.f32.mrf.mxu1 }
 0x588   :  { %v161_v40 = vld [vmem:[#allocation8] sm:$0xff] }
 0x589   :  { %v2525_v41 = vpop.f32.mrf.mxu1 }
 0x58a   :  { %v3498_v59 = vrot.slane %v2525_v41, 6 }
 0x58b   :  { %v4075_v42 = vpop.f32.mrf.mxu1 }
 0x58d   :  { %v2675_v43 = vpop.f32.mrf.mxu1 }
 0x58e   :  { %v3502_v3 = vrot.slane %v2675_v43, 4 }
 0x58f   :  { %v4085_v44 = vpop.f32.mrf.mxu1 }
 0x591   :  { %v4825_v46 = vpop.f32.mrf.mxu0  ;;  %v2825_v49 = vpop.f32.mrf.mxu1 }
 0x592   :  { %v3506_v9 = vrot.slane %v2825_v49, 2  ;;  %v3795_v49 = vld [vmem:[#allocation10] ss:$0 sm:$0xff] }
 0x593   :  { %v4060_v47 = vpop.f32.mrf.mxu0  ;;  %v4095_v50 = vpop.f32.mrf.mxu1 }
 0x595   :  { %v2450_v51 = vpop.f32.mrf.mxu0  ;;  %v2972_v53 = vpop.f32.mrf.mxu1 }
 0x596   :  { %v3496_v55 = vrot.slane %v2450_v51, 7 }
 0x597   :  { %v4070_v57 = vpop.f32.mrf.mxu0  ;;  %v4105_v58 = vpop.f32.mrf.mxu1 }
 0x598   :  { %v3497_v18 = vsel %vm2000_vm11, %v3496_v55, %v2375_v39  ;;  %v162_v39 = vld [vmem:[#allocation8 + $0x8] sm:$0xff] }
 0x599   :  { %v2600_v61 = vpop.f32.mrf.mxu0  ;;  %v3116_v63 = vpop.f32.mrf.mxu1  ;;  %v3499_v45 = vsel %vm2003_vm14, %v3498_v59, %v3497_v18  ;;  %4174 = vmatprep.subr.mxu0 %v162_v39 }
 0x59a   :  { %v3500_v1 = vrot.slane %v2600_v61, 5  ;;  %v3512_v17 = vrot.slane %v3116_v63, 6  ;;  %4175 = vmatpush3.msra.mxu0 %v162_v39 }
 0x59b   :  { %v4080_v0 = vpop.f32.mrf.mxu0  ;;  %v4115_v54 = vpop.f32.mrf.mxu1  ;;  %4176 = vmatprep.subr.mxu0 %v161_v40 }
 0x59c   :  { %v3501_v2 = vsel %vm2006_vm15, %v3500_v1, %v3499_v45  ;;  %4177 = vmatpush3.msra.mxu0 %v161_v40 }
 0x59d   :  { %v2750_v4 = vpop.f32.mrf.mxu0  ;;  %v3260_v5 = vpop.f32.mrf.mxu1  ;;  %v3503_v34 = vsel %vm2009_vm0, %v3502_v3, %v3501_v2 }
 0x59e   :  { %v3504_v60 = vrot.slane %v2750_v4, 3  ;;  %v3516_v24 = vrot.slane %v3260_v5, 4 }
 0x59f   :  { %v4090_v6 = vpop.f32.mrf.mxu0  ;;  %v4125_v7 = vpop.f32.mrf.mxu1 }
 0x5a0   :  { %v3505_v8 = vsel %vm2012_vm2, %v3504_v60, %v3503_v34 }
 0x5a1   :  { %v2900_v21 = vpop.f32.mrf.mxu0  ;;  %v3404_v10 = vpop.f32.mrf.mxu1  ;;  %v3507_v13 = vsel %vm2015_vm7, %v3506_v9, %v3505_v8 }
 0x5a2   :  { %v3508_v11 = vrot.slane %v2900_v21, 1  ;;  %v3520_v28 = vrot.slane %v3404_v10, 2 }
 0x5a3   :  { %v4100_v12 = vpop.f32.mrf.mxu0  ;;  %v4135_v48 = vpop.f32.mrf.mxu1 }
 0x5a4   :  { %v3509_v14 = vsel %vm2018_vm9, %v3508_v11, %v3507_v13 }
 0x5a5   :  { %v3044_v62 = vpop.f32.mrf.mxu0  ;;  %4143 = vmatprep.mubr.msk.f32.mxu1 %vm830_vm12, %v3509_v14 }
 0x5a6   :  { %v3510_v56 = vrot.slane %v3044_v62, 7 }
 0x5a7   :  { %v4110_v15 = vpop.f32.mrf.mxu0 }
 0x5a8   :  { %v3511_v16 = vsel %vm2000_vm11, %v3510_v56, %v2972_v53 }
 0x5a9   :  { %v3188_v20 = vpop.f32.mrf.mxu0  ;;  %v3513_v22 = vsel %vm2003_vm14, %v3512_v17, %v3511_v16 }
 0x5aa   :  { %v3514_v38 = vrot.slane %v3188_v20, 5 }
 0x5ab   :  { %v4120_v19 = vpop.f32.mrf.mxu0 }
 0x5ac   :  { %v3515_v23 = vsel %vm2006_vm15, %v3514_v38, %v3513_v22 }
 0x5ad   :  { %v3332_v25 = vpop.f32.mrf.mxu0  ;;  %v3517_v26 = vsel %vm2009_vm0, %v3516_v24, %v3515_v23 }
 0x5ae   :  { %v3518_v32 = vrot.slane %v3332_v25, 3 }
 0x5af   :  { %v4130_v52 = vpop.f32.mrf.mxu0 }
 0x5b0   :  { %v3519_v27 = vsel %vm2012_vm2, %v3518_v32, %v3517_v26 }
 0x5b1   :  { %v3476_v29 = vpop.f32.mrf.mxu0  ;;  %v3521_v31 = vsel %vm2015_vm7, %v3520_v28, %v3519_v27 }
 0x5b2   :  { %v3522_v30 = vrot.slane %v3476_v29, 1 }
 0x5b3   :  { %v4140_v33 = vpop.f32.mrf.mxu0 }
 0x5b4   :  { %v3523_v35 = vsel %vm2018_vm9, %v3522_v30, %v3521_v31 }
 0x5b5   :  { %4144 = vmatmul.mubr.msk.f32.vlgmr.msra.gmra.mxu1 %vm830_vm12, %v3523_v35 }
 0x675   :  { %v4145_v41 = vpop.f32.mrf.mxu1 }
 0x676   :  { %v3604_v44 = vadd.f32 %v4145_v41, %v4825_v46 }
 0x677   :  { %v3594_v42 = vpop.f32.mrf.mxu1 }
 0x678   :  { %v3603_v43 = vadd.f32 %v3594_v42, %v4823_v36 }
 0x67a   :  { %4178 = vmatprep.mubr.f32.mxu0 %v3603_v43 }
 0x67b   :  { %4179 = vmatmul.mubr.f32.vlgmr.msra.gmra.mxu0 %v3604_v44 }
 0x73b   :  { %v4180_v47 = vpop.f32.mrf.mxu0 }
 0x73c   :  { %v3683_v50 = vadd.f32 %v4180_v47, %v3795_v49 }
 0x73d   :  { %v3677_v51 = vpop.f32.mrf.mxu0 }
 0x73e   :  { %v3687_v53 = vmax.f32 %v3683_v50, 0.0  ;;  %v3678_v55 = vadd.f32 %v3795_v49, %v3677_v51 }
 0x740   :  { %3689 = vst [vmem:[#allocation13 + $0x8] sm:$0xff] %v3687_v53  ;;  %v3686_v57 = vmax.f32 %v3678_v55, 0.0 }
 0x742   :  { %3688 = vst [vmem:[#allocation13] sm:$0xff] %v3686_v57 }
 0x743   :  { %4347 = shalt.err (!%p4344_p6)
}
 0x744   :  { %3701 = dma.vmem_to_hbm [thread:$0]  %s3696_s7, 256, %s4860_s9, [#allocation4], %s4368_s14, %s4368_s14, %s4369_s15  }
 0x745   :  { %4364 = dma.done.wait [#allocation4], 256  }
 0x746   :  { %4365 = vsyncadd [#allocation4], 4294967040 }
 0x747   :  { %3705 = vsyncpa [#allocation3], 1 }
 0x748   :  { %3706 = vsyncpa [#allocation6], 1 }
 0x749   :  { %3707 = vsyncpa [#allocation9], 1 }
 0x74a   :  { %3708 = vsyncpa [#allocation12], 1 }
 0x74b   :  { %3709 = vsyncpa [#allocation4], 1 }

// kernel: tpu_custom_call.1
= control target key start
LH: loop header
LB: loop body
LE: loop exit
PB: predicated region body
PF: predicated region fallthrough
CT: control target
= control target key end

     0   :  { %14 = vsyncpa [#allocation3], 0  ;;  %s2408_s0 = inlined_call_operand.hbm [shape: f32[2,8,16], index: 0, kind: input, shape index: {}]   ;;  %s2409_s1 = inlined_call_operand.hbm [shape: f32[16,128], index: 1, kind: input, shape index: {}]   ;;  %s2410_s2 = inlined_call_operand.vmem [shape: f32[1,128], index: 2, kind: input, shape index: {}]   ;;  %s2411_s3 = inlined_call_operand.hbm [shape: f32[128,384], index: 3, kind: input, shape index: {}]   ;;  %s2412_s4 = inlined_call_operand.vmem [shape: f32[1,384], index: 4, kind: input, shape index: {}]   ;;  %s2413_s5 = inlined_call_operand.hbm [shape: f32[128,128], index: 5, kind: input, shape index: {}]   ;;  %s2414_s6 = inlined_call_operand.hbm [shape: f32[1,128], index: 6, kind: input, shape index: {}]   ;;  %s2415_s7 = inlined_call_operand.vmem [shape: f32[8,128], index: 7, kind: input, shape index: {}]   ;;  %s2416_s8 = inlined_call_operand.hbm [shape: f32[8,128], index: 8, kind: input, shape index: {}]   ;;  %s2417_s9 = inlined_call_operand.hbm [shape: f32[2,8,128], index: 9, kind: output, shape index: {}]  }
   0x1   :  { %15 = vsyncpa [#allocation6], 0 }
   0x2   :  { %16 = vsyncpa [#allocation9], 0 }
   0x3   :  { %17 = vsyncpa [#allocation12], 0 }
   0x4   :  { %18 = vsyncpa [#allocation4], 0  ;;  %s2069_s30 = smov [#allocation5]   ;;  %s2070_s11 = smov [#allocation8]  }
   0x5   :  { %s36_s10 = sshll.u32 %s2069_s30, 4  ;;  %s64_s12 = sshll.u32 %s2070_s11, 4  ;;  %s37_s10 = int_to_ptr.vmem [resolvable:$true] %s36_s10  ;;  %s65_s12 = int_to_ptr.vmem [resolvable:$true] %s64_s12 }
   0x6   :  { %s1927_s13 = scalar_lea.vmem %s37_s10, 256  ;;  %p1932_p1 = scmp.lt.s32.totalorder %s37_s10, %s37_s10 }
   0x7   :  { %p1928_p0 = scmp.ne.s32.totalorder %s37_s10, %s1927_s13  ;;  %p1933_p2 = scmp.lt.s32.totalorder %s1927_s13, %s1927_s13 }
   0x9   :  { %p1934_p3 = por %p1933_p2, %p1932_p1 }
   0xb   :  { %p1935_p4 = pnand %p1934_p3, %p1928_p0 }
   0xd   :  { %1938 = shalt.err (!%p1935_p4)
}
   0xe   :  { %s2071_s14 = smov 128   ;;  %s2072_s15 = smov 8  }
   0xf   :  { %42 = dma.hbm_to_vmem [thread:$0]  %s2409_s1, 256, %s37_s10, [#allocation6], %s2071_s14, %s2071_s14, %s2072_s15  }
  0x10   :  { %s1947_s18 = scalar_lea.vmem %s65_s12, 2048  ;;  %p1952_p6 = scmp.lt.s32.totalorder %s65_s12, %s65_s12 }
  0x11   :  { %p1948_p5 = scmp.ne.s32.totalorder %s65_s12, %s1947_s18  ;;  %p1953_p7 = scmp.lt.s32.totalorder %s1947_s18, %s1947_s18 }
  0x13   :  { %p1954_p8 = por %p1953_p7, %p1952_p6 }
  0x15   :  { %p1955_p9 = pnand %p1954_p8, %p1948_p5 }
  0x17   :  { %1958 = shalt.err (!%p1955_p9)
}
  0x18   :  { %70 = dma.hbm_to_vmem [thread:$0]  %s2413_s5, 2048, %s65_s12, [#allocation9], %s2071_s14, %s2071_s14, %s2072_s15  }
  0x19   :  { %s2073_s21 = smov [#allocation2]   ;;  %s2074_s23 = smov [#allocation7]  }
  0x1a   :  { %s24_s22 = sshll.u32 %s2073_s21, 4  ;;  %s50_s24 = sshll.u32 %s2074_s23, 4  ;;  %s25_s22 = int_to_ptr.vmem [resolvable:$true] %s24_s22  ;;  %s51_s24 = int_to_ptr.vmem [resolvable:$true] %s50_s24 }
  0x1b   :  { %s1967_s1 = scalar_lea.vmem %s25_s22, 256  ;;  %p1972_p11 = scmp.lt.s32.totalorder %s25_s22, %s25_s22 }
  0x1c   :  { %p1968_p10 = scmp.ne.s32.totalorder %s25_s22, %s1967_s1  ;;  %p1973_p12 = scmp.lt.s32.totalorder %s1967_s1, %s1967_s1 }
  0x1e   :  { %p1974_p13 = por %p1973_p12, %p1972_p11 }
  0x20   :  { %p1975_p0 = pnand %p1974_p13, %p1968_p10 }
  0x22   :  { %1978 = shalt.err (!%p1975_p0)
}
  0x23   :  { %30 = dma.hbm_to_vmem [thread:$0]  %s2408_s0, 256, %s25_s22, [#allocation3], %s2071_s14, %s2071_s14, %s2072_s15  }
  0x24   :  { %s1987_s5 = scalar_lea.vmem %s51_s24, 6144  ;;  %p1992_p2 = scmp.lt.s32.totalorder %s51_s24, %s51_s24 }
  0x25   :  { %p1988_p1 = scmp.ne.s32.totalorder %s51_s24, %s1987_s5  ;;  %p1993_p3 = scmp.lt.s32.totalorder %s1987_s5, %s1987_s5 }
  0x27   :  { %p1994_p4 = por %p1993_p3, %p1992_p2 }
  0x29   :  { %p1995_p5 = pnand %p1994_p4, %p1988_p1 }
  0x2b   :  { %1998 = shalt.err (!%p1995_p5)
}
  0x2c   :  { %s2075_s27 = smov 384   ;;  %s2076_s28 = smov 24  }
  0x2d   :  { %56 = dma.hbm_to_vmem [thread:$0]  %s2411_s3, 6144, %s51_s24, [#allocation6], %s2075_s27, %s2075_s27, %s2076_s28  }
  0x2e   :  { %s2077_s10 = smov [#allocation10]   ;;  %s2078_s12 = smov [#allocation11]  }
  0x2f   :  { %s77_s11 = sshll.u32 %s2077_s10, 4  ;;  %s89_s13 = sshll.u32 %s2078_s12, 4  ;;  %s78_s11 = int_to_ptr.vmem [resolvable:$true] %s77_s11  ;;  %s90_s13 = int_to_ptr.vmem [resolvable:$true] %s89_s13 }
  0x30   :  { %s2007_s0 = scalar_lea.vmem %s78_s11, 16  ;;  %s2011_s16 = scalar_lea.vmem %s78_s11, 32 }
  0x31   :  { %p2008_p6 = scmp.ne.s32.totalorder %s78_s11, %s2007_s0  ;;  %p2012_p7 = scmp.lt.s32.totalorder %s78_s11, %s78_s11 }
  0x32   :  { %p2013_p8 = scmp.lt.s32.totalorder %s2011_s16, %s2007_s0 }
  0x34   :  { %p2014_p9 = por %p2013_p8, %p2012_p7 }
  0x36   :  { %p2015_p10 = pnand %p2014_p9, %p2008_p6 }
  0x38   :  { %2018 = shalt.err (!%p2015_p10)
}
  0x39   :  { %80 = dma.hbm_to_vmem [thread:$0]  %s2414_s6, 16, %s78_s11, [#allocation9]  }
  0x3a   :  { %s2027_s19 = scalar_lea.vmem %s90_s13, 128  ;;  %p2032_p12 = scmp.lt.s32.totalorder %s90_s13, %s90_s13 }
  0x3b   :  { %p2028_p11 = scmp.ne.s32.totalorder %s90_s13, %s2027_s19  ;;  %p2033_p13 = scmp.lt.s32.totalorder %s2027_s19, %s2027_s19 }
  0x3d   :  { %p2034_p0 = por %p2033_p13, %p2032_p12 }
  0x3f   :  { %p2035_p1 = pnand %p2034_p0, %p2028_p11 }
  0x41   :  { %2038 = shalt.err (!%p2035_p1)
}
  0x42   :  { %92 = dma.hbm_to_vmem [thread:$0]  %s2416_s8, 128, %s90_s13, [#allocation12]  }
  0x43   :  { %2059 = dma.done.wait [#allocation3], 256  }
  0x44   :  { %2060 = vsyncadd [#allocation3], 4294967040 }
  0x45   :  { %2061 = dma.done.wait [#allocation6], 6400  }
  0x46   :  { %2062 = vsyncadd [#allocation6], 4294960896 }
  0x47   :  { %2063 = dma.done.wait [#allocation9], 2064  }
  0x48   :  { %2064 = vsyncadd [#allocation9], 4294965232 }
  0x49   :  { %2065 = dma.done.wait [#allocation12], 128  }
  0x4a   :  { %2066 = vsyncadd [#allocation12], 4294967168  ;;  %vm257_vm0 = vcmask 130048   ;;  %v112_v0 = vld [vmem:[#allocation5 + $0x8] sm:$0xff]  ;;  %v111_v1 = vld [vmem:[#allocation5] sm:$0xff]  ;;  %v2079_v52 = vmov 0.0   ;;  %v182_v61 = vlaneseq }
  0x4b   :  { %v249_v2 = vld [vmem:[#allocation2] sm:$0xff]  ;;  %1778 = vmatprep.subr.mxu1 %v112_v0  ;;  %v250_v3 = vld [vmem:[#allocation2 + $0x8] sm:$0xff]  ;;  %v159_v4 = vld [vmem:[#allocation7 + $0x170] sm:$0xff]  ;;  %vm2080_vm1 = vmmov 0   ;;  %vm858_vm12 = vcmask 64512  }
  0x4c   :  { %1782 = vmatprep.mubr.msk.f32.mxu1 %vm257_vm0, %v249_v2  ;;  %1779 = vmatpush3.msra.mxu1 %v112_v0  ;;  %v160_v5 = vld [vmem:[#allocation7 + $0x178] sm:$0xff]  ;;  %v158_v6 = vld [vmem:[#allocation7 + $0x168] sm:$0xff]  ;;  %v157_v7 = vld [vmem:[#allocation7 + $0x160] sm:$0xff]  ;;  %v2172_v62 = vshrl.u32 %v182_v61, 7 }
  0x4d   :  { %1780 = vmatprep.subr.mxu1 %v111_v1  ;;  %1785 = vmatprep.subr.mxu0 %v160_v5  ;;  %v156_v8 = vld [vmem:[#allocation7 + $0x158] sm:$0xff]  ;;  %v155_v9 = vld [vmem:[#allocation7 + $0x150] sm:$0xff]  ;;  %v154_v10 = vld [vmem:[#allocation7 + $0x148] sm:$0xff] }
  0x4e   :  { %1781 = vmatpush3.msra.mxu1 %v111_v1  ;;  %1786 = vmatpush3.msra.mxu0 %v160_v5  ;;  %v153_v11 = vld [vmem:[#allocation7 + $0x140] sm:$0xff]  ;;  %v152_v12 = vld [vmem:[#allocation7 + $0x138] sm:$0xff]  ;;  %v151_v13 = vld [vmem:[#allocation7 + $0x130] sm:$0xff]  ;;  %v2175_v63 = vsub.s32 0, %v2172_v62  ;;  %v352_v1 = vsub.s32 2, %v2172_v62  ;;  %v2182_v2 = vsub.s32 1, %v2172_v62 }
  0x4f   :  { %1783 = vmatmul.mubr.msk.f32.vlgmr.msra.gmra.mxu1 %vm257_vm0, %v250_v3  ;;  %357 = vmatprep.subr.mxu1 %v159_v4  ;;  %v150_v14 = vld [vmem:[#allocation7 + $0x128] sm:$0xff]  ;;  %v149_v15 = vld [vmem:[#allocation7 + $0x120] sm:$0xff]  ;;  %v148_v16 = vld [vmem:[#allocation7 + $0x118] sm:$0xff] }
  0x50   :  { %358 = vmatpush1.msra.mxu1 %v158_v6  ;;  %1787 = vmatprep.subr.mxu0 %v157_v7  ;;  %v147_v17 = vld [vmem:[#allocation7 + $0x110] sm:$0xff]  ;;  %v146_v18 = vld [vmem:[#allocation7 + $0x108] sm:$0xff]  ;;  %v145_v19 = vld [vmem:[#allocation7 + $0x100] sm:$0xff] }
  0x51   :  { %359 = vmatprep.subr.mxu1 %v156_v8  ;;  %1788 = vmatpush3.msra.mxu0 %v157_v7  ;;  %v144_v20 = vld [vmem:[#allocation7 + $0xf8] sm:$0xff]  ;;  %v143_v21 = vld [vmem:[#allocation7 + $0xf0] sm:$0xff]  ;;  %v142_v22 = vld [vmem:[#allocation7 + $0xe8] sm:$0xff] }
  0x52   :  { %360 = vmatpush1.msra.mxu1 %v155_v9  ;;  %1789 = vmatprep.subr.mxu0 %v154_v10  ;;  %v141_v23 = vld [vmem:[#allocation7 + $0xe0] sm:$0xff]  ;;  %v140_v24 = vld [vmem:[#allocation7 + $0xd8] sm:$0xff]  ;;  %v139_v25 = vld [vmem:[#allocation7 + $0xd0] sm:$0xff] }
  0x53   :  { %361 = vmatprep.subr.mxu1 %v153_v11  ;;  %1790 = vmatpush3.msra.mxu0 %v154_v10  ;;  %v138_v26 = vld [vmem:[#allocation7 + $0xc8] sm:$0xff]  ;;  %v137_v27 = vld [vmem:[#allocation7 + $0xc0] sm:$0xff]  ;;  %v136_v28 = vld [vmem:[#allocation7 + $0xb8] sm:$0xff] }
  0x54   :  { %362 = vmatpush1.msra.mxu1 %v152_v12  ;;  %1791 = vmatprep.subr.mxu0 %v151_v13  ;;  %v135_v29 = vld [vmem:[#allocation7 + $0xb0] sm:$0xff]  ;;  %v134_v30 = vld [vmem:[#allocation7 + $0xa8] sm:$0xff]  ;;  %v133_v31 = vld [vmem:[#allocation7 + $0xa0] sm:$0xff] }
  0x55   :  { %363 = vmatprep.subr.mxu1 %v150_v14  ;;  %1792 = vmatpush3.msra.mxu0 %v151_v13  ;;  %v132_v32 = vld [vmem:[#allocation7 + $0x98] sm:$0xff]  ;;  %v131_v33 = vld [vmem:[#allocation7 + $0x90] sm:$0xff]  ;;  %v130_v34 = vld [vmem:[#allocation7 + $0x88] sm:$0xff] }
  0x56   :  { %364 = vmatpush1.msra.mxu1 %v149_v15  ;;  %1793 = vmatprep.subr.mxu0 %v148_v16  ;;  %v129_v35 = vld [vmem:[#allocation7 + $0x80] sm:$0xff]  ;;  %v128_v36 = vld [vmem:[#allocation7 + $0x78] sm:$0xff]  ;;  %v127_v37 = vld [vmem:[#allocation7 + $0x70] sm:$0xff] }
  0x57   :  { %365 = vmatprep.subr.mxu1 %v147_v17  ;;  %1794 = vmatpush3.msra.mxu0 %v148_v16  ;;  %v126_v38 = vld [vmem:[#allocation7 + $0x68] sm:$0xff]  ;;  %v125_v39 = vld [vmem:[#allocation7 + $0x60] sm:$0xff]  ;;  %v123_v40 = vld [vmem:[#allocation7 + $0x50] sm:$0xff] }
  0x58   :  { %366 = vmatpush1.msra.mxu1 %v146_v18  ;;  %1795 = vmatprep.subr.mxu0 %v145_v19  ;;  %v122_v41 = vld [vmem:[#allocation7 + $0x48] sm:$0xff]  ;;  %v124_v42 = vld [vmem:[#allocation7 + $0x58] sm:$0xff]  ;;  %v119_v44 = vld [vmem:[#allocation7 + $0x30] sm:$0xff] }
  0x59   :  { %367 = vmatprep.subr.mxu1 %v144_v20  ;;  %1796 = vmatpush3.msra.mxu0 %v145_v19  ;;  %v120_v43 = vld [vmem:[#allocation7 + $0x38] sm:$0xff]  ;;  %v121_v45 = vld [vmem:[#allocation7 + $0x40] sm:$0xff]  ;;  %v118_v48 = vld [vmem:[#allocation7 + $0x28] sm:$0xff] }
  0x5a   :  { %368 = vmatpush1.msra.mxu1 %v143_v21  ;;  %1797 = vmatprep.subr.mxu0 %v142_v22  ;;  %v117_v46 = vld [vmem:[#allocation7 + $0x20] sm:$0xff]  ;;  %v116_v47 = vld [vmem:[#allocation7 + $0x18] sm:$0xff]  ;;  %v114_v49 = vld [vmem:[#allocation7 + $0x8] sm:$0xff] }
  0x5b   :  { %369 = vmatprep.subr.mxu1 %v141_v23  ;;  %1798 = vmatpush3.msra.mxu0 %v142_v22  ;;  %v113_v50 = vld [vmem:[#allocation7] sm:$0xff]  ;;  %v115_v51 = vld [vmem:[#allocation7 + $0x10] sm:$0xff] }
  0x5c   :  { %370 = vmatpush1.msra.mxu1 %v140_v24  ;;  %1799 = vmatprep.subr.mxu0 %v139_v25  ;;  %v1716_v53 = vld [vmem:[%s2410_s2] ss:$0 sm:$0xff] }
  0x5d   :  { %371 = vmatprep.subr.mxu1 %v138_v26  ;;  %1800 = vmatpush3.msra.mxu0 %v139_v25  ;;  %v180_v60 = vld [vmem:[%s2415_s7] sm:$0xff] }
  0x5e   :  { %372 = vmatpush1.msra.mxu1 %v137_v27  ;;  %1801 = vmatprep.subr.mxu0 %v136_v28  ;;  %v178_v0 = vld [vmem:[%s2412_s4] sm:$0x7]  ;;  %s2082_s4 = smov [#allocation13]  }
  0x5f   :  { %373 = vmatprep.subr.mxu1 %v135_v29  ;;  %1802 = vmatpush3.msra.mxu0 %v136_v28  ;;  %v345_v3 = vrot.slane %v178_v0, %v2175_v63  ;;  %v353_v4 = vrot.slane %v178_v0, %v352_v1  ;;  %v349_v6 = vrot.slane %v178_v0, %v2182_v2  ;;  %s1687_s7 = sshll.u32 %s2082_s4, 4  ;;  %s1688_s7 = int_to_ptr.vmem [resolvable:$true] %s1687_s7 }
  0x60   :  { %374 = vmatpush1.msra.mxu1 %v134_v30  ;;  %1803 = vmatprep.subr.mxu0 %v133_v31  ;;  %v753_v30 = vsub.s32 3, %v2172_v62  ;;  %s2039_s24 = scalar_lea.vmem %s1688_s7, 256  ;;  %p2044_p3 = scmp.lt.s32.totalorder %s1688_s7, %s1688_s7 }
  0x61   :  { %375 = vmatprep.subr.mxu1 %v132_v32  ;;  %1804 = vmatpush3.msra.mxu0 %v133_v31  ;;  %p2040_p2 = scmp.ne.s32.totalorder %s1688_s7, %s2039_s24  ;;  %p2045_p4 = scmp.lt.s32.totalorder %s2039_s24, %s2039_s24 }
  0x62   :  { %376 = vmatpush1.msra.mxu1 %v131_v33  ;;  %1805 = vmatprep.subr.mxu0 %v130_v34 }
  0x63   :  { %377 = vmatprep.subr.mxu1 %v129_v35  ;;  %1806 = vmatpush3.msra.mxu0 %v130_v34  ;;  %v760_v35 = vsub.s32 4, %v2172_v62  ;;  %p2046_p5 = por %p2045_p4, %p2044_p3 }
  0x64   :  { %378 = vmatpush1.msra.mxu1 %v128_v36  ;;  %1807 = vmatprep.subr.mxu0 %v127_v37 }
  0x65   :  { %379 = vmatprep.subr.mxu1 %v126_v38  ;;  %1808 = vmatpush3.msra.mxu0 %v127_v37  ;;  %p2047_p6 = pnand %p2046_p5, %p2040_p2 }
  0x66   :  { %380 = vmatpush1.msra.mxu1 %v125_v39  ;;  %1809 = vmatprep.subr.mxu0 %v124_v42  ;;  %v767_v39 = vsub.s32 5, %v2172_v62 }
  0x67   :  { %381 = vmatprep.subr.mxu1 %v123_v40  ;;  %1810 = vmatpush3.msra.mxu0 %v124_v42  ;;  %v774_v42 = vsub.s32 6, %v2172_v62 }
  0x68   :  { %382 = vmatpush1.msra.mxu1 %v122_v41  ;;  %1811 = vmatprep.subr.mxu0 %v121_v45 }
  0x69   :  { %383 = vmatprep.subr.mxu1 %v120_v43  ;;  %1812 = vmatpush3.msra.mxu0 %v121_v45  ;;  %v781_v45 = vsub.s32 7, %v2172_v62 }
  0x6a   :  { %384 = vmatpush1.msra.mxu1 %v119_v44  ;;  %1813 = vmatprep.subr.mxu0 %v118_v48 }
  0x6b   :  { %385 = vmatprep.subr.mxu1 %v117_v46  ;;  %1814 = vmatpush3.msra.mxu0 %v118_v48 }
  0x6c   :  { %386 = vmatpush1.msra.mxu1 %v116_v47  ;;  %421 = vmatprep.mubr.f32.mxu1 %v2079_v52 }
  0x6d   :  { %387 = vmatprep.subr.mxu1 %v114_v49  ;;  %1815 = vmatprep.subr.mxu0 %v115_v51 }
  0x6e   :  { %388 = vmatpush1.msra.mxu1 %v113_v50  ;;  %1816 = vmatpush3.msra.mxu0 %v115_v51  ;;  %v2211_v50 = vand.u32 127, %v182_v61 }
  0x6f   :  { %1820 = vmatprep.subr.mxu1 %v180_v60 }
  0x70   :  { %v186_v51 = vadd.s32 3, %v2211_v50  ;;  %vm199_vm4 = vcmp.gt.s32.totalorder %v2211_v50, 0 }
  0x72   :  { %vm209_vm3 = vcmp.lt.s32.totalorder %v186_v51, 6 }
 0x10f   :  { %v1784_v54 = vpop.f32.mrf.mxu1 }
 0x110   :  { %v336_v55 = vadd.f32 %v1784_v54, %v1716_v53  ;;  %v1703_v54 = vadd.s32 4294967294, %v186_v51 }
 0x111   :  { %v330_v56 = vpop.f32.mrf.mxu1 }
 0x112   :  { %v331_v57 = vadd.f32 %v1716_v53, %v330_v56  ;;  %v340_v59 = vmax.f32 %v336_v55, 0.0  ;;  %v1702_v53 = vadd.s32 4294967295, %v186_v51  ;;  %v1704_v55 = vadd.s32 4294967292, %v186_v51 }
 0x113   :  { %vm213_vm5 = vcmp.lt.s32.totalorder %v1703_v54, 6 }
 0x114   :  { %v339_v58 = vmax.f32 %v331_v57, 0.0  ;;  %vm211_vm2 = vcmp.lt.s32.totalorder %v1702_v53, 6  ;;  %v210_v57 = vsel %vm209_vm3, %v186_v51, 6  ;;  %vm201_vm8 = vcmp.gt.s32.totalorder %v1704_v55, 0 }
 0x115   :  { %v212_v56 = vsel %vm211_vm2, %v1702_v53, 6  ;;  %vm225_vm7 = vcmp.eq.s32.totalorder %v2172_v62, %v210_v57 }
 0x116   :  { %422 = vmatmul.mubr.f32.vlgmr.msra.gmra.mxu1 %v339_v58  ;;  %1817 = vmatprep.mubr.f32.mxu0 %v339_v58  ;;  %v200_v58 = vsel %vm199_vm4, %v2211_v50, 0  ;;  %vm226_vm6 = vcmp.eq.s32.totalorder %v2172_v62, %v212_v56  ;;  %v2222_v0 = vsel %vm225_vm7, 1.0, %v2079_v52 }
 0x117   :  { %1818 = vmatmul.mubr.f32.vlgmr.msra.gmra.mxu0 %v340_v59  ;;  %427 = vmatprep.mubr.f32.mxu1 %v2079_v52  ;;  %vm215_vm9 = vcmp.lt.s32.totalorder %v200_v58, 6  ;;  %v2219_v61 = vsel %vm226_vm6, 1.0, %v2079_v52 }
 0x118   :  { %1821 = vmatpush3.xpose.msra.mxu1 %v180_v60  ;;  %v214_v60 = vsel %vm213_vm5, %v1703_v54, 6 }
 0x119   :  { %1825 = vmatprep.subr.mxu1 %v2079_v52  ;;  %vm227_vm11 = vcmp.eq.s32.totalorder %v2172_v62, %v214_v60 }
 0x11a   :  { %428 = vmatmul.mubr.f32.gmra.mxu1 %v340_v59  ;;  %v1705_v59 = vadd.s32 4294967291, %v186_v51 }
 0x11c   :  { %vm203_vm10 = vcmp.gt.s32.totalorder %v1705_v59, 0 }
 0x1d6   :  { %v423_v5 = vpop.f32.mrf.mxu1 }
 0x1d7   :  { %v424_v7 = vadd.f32 %v423_v5, %v345_v3  ;;  %v1819_v8 = vpop.f32.mrf.mxu0 }
 0x1d8   :  { %v2186_v9 = vadd.f32 %v1819_v8, %v353_v4  ;;  %v425_v10 = vpop.f32.mrf.mxu1  ;;  %v204_v8 = vsel %vm203_vm10, %v1705_v59, 0  ;;  %vm989_vm10 = vcmask 1042434  }
 0x1d9   :  { %1899 = vtanh.f32 %v424_v7  ;;  %v426_v11 = vadd.f32 %v425_v10, %v349_v6  ;;  %v500_v16 = vpop.f32.mrf.mxu0  ;;  %v2228_v10 = vsel %vm227_vm11, 1.0, %v2079_v52  ;;  %vm219_vm0 = vcmp.lt.s32.totalorder %v204_v8, 6 }
 0x1da   :  { %v429_v12 = vpop.f32.mrf.mxu1  ;;  %v501_v17 = vadd.f32 %v500_v16, %v353_v4  ;;  %vm991_vm11 = vcmask 1043459  }
 0x1db   :  { %v430_v13 = vadd.f32 %v429_v12, %v345_v3  ;;  %v1706_v3 = vadd.s32 4294967290, %v186_v51 }
 0x1dc   :  { %v431_v14 = vpop.f32.mrf.mxu1 }
 0x1dd   :  { %1901 = vtanh.f32 %v430_v13  ;;  %v432_v15 = vadd.f32 %v431_v14, %v349_v6  ;;  %vm205_vm15 = vcmp.gt.s32.totalorder %v1706_v3, 0 }
 0x1de   :  { %1903 = vtanh.f32 %v426_v11  ;;  %v1707_v11 = vadd.s32 4294967289, %v186_v51 }
 0x1df   :  { %1905 = vtanh.f32 %v432_v15 }
 0x1e0   :  { %1907 = vtanh.f32 %v501_v17  ;;  %vm207_vm2 = vcmp.gt.s32.totalorder %v1707_v11, 0 }
 0x1e6   :  { %v1900_v18 = vpop.eup %1899 }
 0x1e7   :  { %1822 = vmatprep.mubr.f32.mxu1 %v1900_v18 }
 0x1ea   :  { %v1902_v19 = vpop.eup %1901 }
 0x1eb   :  { %v1904_v20 = vpop.eup %1903  ;;  %1823 = vmatmul.mubr.f32.vlgmr.msra.gmra.mxu1 %v1902_v19 }
 0x1ec   :  { %1826 = vmatpush3.xpose.msra.mxu1 %v1904_v20  ;;  %1827 = vmatprep.mubr.msk.f32.mxu1 %vm2080_vm1, %v2079_v52  ;;  %v1906_v21 = vpop.eup %1905 }
 0x1ed   :  { %1830 = vmatprep.subr.mxu1 %v2079_v52  ;;  %v1908_v22 = vpop.eup %1907 }
 0x1ef   :  { %1828 = vmatmul.mubr.f32.vlgmr.msra.gmra.mxu1 %v1900_v18 }
 0x1f0   :  { %1831 = vmatpush3.xpose.msra.mxu1 %v1906_v21  ;;  %1832 = vmatprep.mubr.msk.f32.mxu1 %vm2080_vm1, %v2079_v52 }
 0x1f1   :  { %1835 = vmatprep.subr.mxu1 %v2079_v52 }
 0x1f3   :  { %1833 = vmatmul.mubr.f32.vlgmr.msra.gmra.mxu1 %v1902_v19 }
 0x1f4   :  { %1836 = vmatpush3.msra.mxu1 %v1908_v22  ;;  %1837 = vmatprep.mubr.msk.f32.mxu1 %vm2080_vm1, %v2079_v52 }
 0x1f5   :  { %1840 = vmatprep.subr.mxu1 %v2079_v52 }
 0x2ab   :  { %v1824_v23 = vpop.f32.mrf.mxu1 }
 0x2ac   :  { %v796_v24 = vrot.slane %v1824_v23, %v2182_v2  ;;  %v789_v25 = vrot.slane %v1824_v23, %v2175_v63  ;;  %v803_v28 = vrot.slane %v1824_v23, %v352_v1  ;;  %v810_v33 = vrot.slane %v1824_v23, %v753_v30 }
 0x2ad   :  { %v581_v26 = vpop.f32.mrf.mxu1  ;;  %v817_v37 = vrot.slane %v1824_v23, %v760_v35  ;;  %v824_v47 = vrot.slane %v1824_v23, %v767_v39  ;;  %v838_v48 = vrot.slane %v1824_v23, %v781_v45  ;;  %v831_v49 = vrot.slane %v1824_v23, %v774_v42 }
 0x2ae   :  { %798 = vbcast.lane.b32.xlu0 %v796_v24, 256  ;;  %791 = vbcast.lane.b32.xlu1 %v789_v25, 256  ;;  %v747_v29 = vrot.slane %v581_v26, %v352_v1  ;;  %v754_v34 = vrot.slane %v581_v26, %v753_v30  ;;  %v761_v38 = vrot.slane %v581_v26, %v760_v35  ;;  %v202_v1 = vsel %vm201_vm8, %v1704_v55, 0 }
 0x2af   :  { %v2199_v27 = vpop.f32.mrf.mxu1  ;;  %v768_v40 = vrot.slane %v581_v26, %v767_v39  ;;  %v733_v41 = vrot.slane %v581_v26, %v2175_v63  ;;  %v775_v43 = vrot.slane %v581_v26, %v774_v42  ;;  %v740_v44 = vrot.slane %v581_v26, %v2182_v2 }
 0x2b0   :  { %v782_v46 = vrot.slane %v581_v26, %v781_v45  ;;  %v216_v2 = vsel %vm215_vm9, %v200_v58, 6  ;;  %vm217_vm13 = vcmp.lt.s32.totalorder %v202_v1, 6  ;;  %v206_v24 = vsel %vm205_vm15, %v1706_v3, 0 }
 0x2b1   :  { %v1829_v31 = vpop.f32.mrf.mxu1  ;;  %vm228_vm14 = vcmp.eq.s32.totalorder %v2172_v62, %v216_v2  ;;  %v218_v18 = vsel %vm217_vm13, %v202_v1, 6  ;;  %vm221_vm4 = vcmp.lt.s32.totalorder %v206_v24, 6  ;;  %vm987_vm9 = vcmask 1041409  }
 0x2b2   :  { %805 = vbcast.lane.b32.xlu0 %v803_v28, 256  ;;  %749 = vbcast.lane.b32.xlu1 %v747_v29, 256  ;;  %v2236_v21 = vsel %vm228_vm14, 1.0, %v2079_v52  ;;  %vm229_vm3 = vcmp.eq.s32.totalorder %v2172_v62, %v218_v18  ;;  %v220_v28 = vsel %vm219_vm0, %v204_v8, 6  ;;  %vm995_vm13 = vcmask 1045509  }
 0x2b3   :  { %v2202_v32 = vpop.f32.mrf.mxu1  ;;  %vm230_vm5 = vcmp.eq.s32.totalorder %v2172_v62, %v220_v28  ;;  %vm993_vm14 = vcmask 1044484   ;;  %vm997_vm15 = vcmask 1046534   ;;  %vm999_vm0 = vcmask 1047559  }
 0x2b4   :  { %v2252_v56 = vsel %vm230_vm5, 1.0, %v2079_v52 }
 0x2b5   :  { %v1834_v36 = vpop.f32.mrf.mxu1 }
 0x2b6   :  { %812 = vbcast.lane.b32.xlu0 %v810_v33, 256  ;;  %756 = vbcast.lane.b32.xlu1 %v754_v34, 256 }
 0x2ba   :  { %819 = vbcast.lane.b32.xlu0 %v817_v37, 256  ;;  %763 = vbcast.lane.b32.xlu1 %v761_v38, 256  ;;  %v208_v38 = vsel %vm207_vm2, %v1707_v11, 0 }
 0x2bb   :  { %vm223_vm6 = vcmp.lt.s32.totalorder %v208_v38, 6 }
 0x2be   :  { %770 = vbcast.lane.b32.xlu1 %v768_v40, 256  ;;  %735 = vbcast.lane.b32.xlu0 %v733_v41, 256  ;;  %v2244_v40 = vsel %vm229_vm3, 1.0, %v2079_v52 }
 0x2c2   :  { %777 = vbcast.lane.b32.xlu1 %v775_v43, 256  ;;  %742 = vbcast.lane.b32.xlu0 %v740_v44, 256 }
 0x2c6   :  { %784 = vbcast.lane.b32.xlu1 %v782_v46, 256  ;;  %826 = vbcast.lane.b32.xlu0 %v824_v47, 256 }
 0x2ca   :  { %840 = vbcast.lane.b32.xlu1 %v838_v48, 256  ;;  %833 = vbcast.lane.b32.xlu0 %v831_v49, 256  ;;  %v222_v48 = vsel %vm221_vm4, %v206_v24, 6 }
 0x2cb   :  { %vm231_vm7 = vcmp.eq.s32.totalorder %v2172_v62, %v222_v48 }
 0x320   :  { %v799_v4 = vpop.permute.xlu0 %798  ;;  %v792_v5 = vpop.permute.xlu1 %791 }
 0x321   :  { %v851_v6 = vmul.f32 %v2219_v61, %v799_v4  ;;  %v850_v7 = vmul.f32 %v2222_v0, %v792_v5  ;;  %v224_v4 = vsel %vm223_vm6, %v208_v38, 6 }
 0x322   :  { %vm232_vm8 = vcmp.eq.s32.totalorder %v2172_v62, %v224_v4 }
 0x323   :  { %v922_v12 = vsel %vm858_vm12, %v851_v6, 0.0  ;;  %v915_v13 = vsel %vm858_vm12, %v850_v7, 0.0 }
 0x324   :  { %v923_v14 = vrot.slane %v922_v12, 4  ;;  %v916_v15 = vrot.slane %v915_v13, 4  ;;  %v806_v16 = vpop.permute.xlu0 %805  ;;  %v750_v17 = vpop.permute.xlu1 %749 }
 0x325   :  { %v852_v19 = vmul.f32 %v2228_v10, %v806_v16  ;;  %v844_v20 = vmul.f32 %v2228_v10, %v750_v17 }
 0x326   :  { %v924_v22 = vadd.f32 %v923_v14, %v922_v12  ;;  %v917_v23 = vadd.f32 %v916_v15, %v915_v13  ;;  %v2260_v13 = vsel %vm231_vm7, 1.0, %v2079_v52 }
 0x327   :  { %v929_v25 = vsel %vm858_vm12, %v852_v19, 0.0  ;;  %v873_v26 = vsel %vm858_vm12, %v844_v20, 0.0 }
 0x328   :  { %v925_v29 = vrot.slane %v924_v22, 2  ;;  %v918_v30 = vrot.slane %v917_v23, 2  ;;  %v930_v31 = vrot.slane %v929_v25, 4  ;;  %v874_v33 = vrot.slane %v873_v26, 4  ;;  %v813_v34 = vpop.permute.xlu0 %812  ;;  %v757_v35 = vpop.permute.xlu1 %756 }
 0x329   :  { %v853_v36 = vmul.f32 %v2236_v21, %v813_v34  ;;  %v845_v37 = vmul.f32 %v2236_v21, %v757_v35 }
 0x32a   :  { %v931_v39 = vadd.f32 %v930_v31, %v929_v25  ;;  %v926_v41 = vadd.f32 %v925_v29, %v924_v22  ;;  %v919_v44 = vadd.f32 %v918_v30, %v917_v23  ;;  %v875_v45 = vadd.f32 %v874_v33, %v873_v26 }
 0x32b   :  { %v936_v42 = vsel %vm858_vm12, %v853_v36, 0.0  ;;  %v880_v43 = vsel %vm858_vm12, %v845_v37, 0.0  ;;  %v2272_v36 = vsel %vm232_vm8, 1.0, %v2079_v52 }
 0x32c   :  { %v820_v46 = vpop.permute.xlu0 %819  ;;  %v764_v47 = vpop.permute.xlu1 %763  ;;  %v937_v49 = vrot.slane %v936_v42, 4  ;;  %v881_v51 = vrot.slane %v880_v43, 4  ;;  %v932_v55 = vrot.slane %v931_v39, 2  ;;  %v927_v57 = vrot.slane %v926_v41, 1 }
 0x32d   :  { %v854_v53 = vmul.f32 %v2244_v40, %v820_v46  ;;  %v846_v54 = vmul.f32 %v2244_v40, %v764_v47  ;;  %v920_v59 = vrot.slane %v919_v44, 1  ;;  %v876_v5 = vrot.slane %v875_v45, 2 }
 0x32e   :  { %v938_v60 = vadd.f32 %v937_v49, %v936_v42  ;;  %v882_v6 = vadd.f32 %v881_v51, %v880_v43  ;;  %v933_v8 = vadd.f32 %v932_v55, %v931_v39  ;;  %v928_v14 = vadd.f32 %v927_v57, %v926_v41 }
 0x32f   :  { %v943_v58 = vsel %vm858_vm12, %v854_v53, 0.0  ;;  %v887_v1 = vsel %vm858_vm12, %v846_v54, 0.0  ;;  %v921_v17 = vadd.f32 %v920_v59, %v919_v44  ;;  %v2265_v24 = vadd.f32 %v876_v5, %v875_v45 }
 0x330   :  { %v771_v2 = vpop.permute.xlu1 %770  ;;  %v736_v3 = vpop.permute.xlu0 %735  ;;  %v944_v11 = vrot.slane %v943_v58, 4  ;;  %v888_v15 = vrot.slane %v887_v1, 4  ;;  %v939_v18 = vrot.slane %v938_v60, 2  ;;  %v883_v25 = vrot.slane %v882_v6, 2 }
 0x331   :  { %v847_v7 = vmul.f32 %v2252_v56, %v771_v2  ;;  %v842_v12 = vmul.f32 %v2222_v0, %v736_v3  ;;  %v934_v28 = vrot.slane %v933_v8, 1  ;;  %v2275_v37 = vsel %vm987_vm9, %v928_v14, %v921_v17 }
 0x332   :  { %v945_v29 = vadd.f32 %v944_v11, %v943_v58  ;;  %v889_v33 = vadd.f32 %v888_v15, %v887_v1  ;;  %v2277_v38 = vadd.f32 %v939_v18, %v938_v60  ;;  %v878_v44 = vrot.slane %v2265_v24, 1 }
 0x333   :  { %v894_v16 = vsel %vm858_vm12, %v847_v7, 0.0  ;;  %v859_v20 = vsel %vm858_vm12, %v842_v12, 0.0  ;;  %v884_v45 = vadd.f32 %v883_v25, %v882_v6  ;;  %v2282_v48 = vadd.f32 %v934_v28, %v933_v8 }
 0x334   :  { %v895_v19 = vrot.slane %v894_v16, 4  ;;  %v778_v22 = vpop.permute.xlu1 %777  ;;  %v743_v23 = vpop.permute.xlu0 %742  ;;  %v860_v26 = vrot.slane %v859_v20, 4  ;;  %v946_v49 = vrot.slane %v945_v29, 2  ;;  %v890_v54 = vrot.slane %v889_v33, 2 }
 0x335   :  { %v848_v30 = vmul.f32 %v2260_v13, %v778_v22  ;;  %v843_v31 = vmul.f32 %v2219_v61, %v743_v23  ;;  %v941_v59 = vrot.slane %v2277_v38, 1  ;;  %v885_v5 = vrot.slane %v884_v45, 1 }
 0x336   :  { %v896_v34 = vadd.f32 %v895_v19, %v894_v16  ;;  %v861_v35 = vadd.f32 %v860_v26, %v859_v20  ;;  %v947_v11 = vadd.f32 %v946_v49, %v945_v29  ;;  %v891_v16 = vadd.f32 %v890_v54, %v889_v33 }
 0x337   :  { %v901_v39 = vsel %vm858_vm12, %v848_v30, 0.0  ;;  %v866_v41 = vsel %vm858_vm12, %v843_v31, 0.0  ;;  %v886_v54 = vadd.f32 %v885_v5, %v884_v45 }
 0x338   :  { %v785_v42 = vpop.permute.xlu1 %784  ;;  %v827_v43 = vpop.permute.xlu0 %826  ;;  %v862_v46 = vrot.slane %v861_v35, 2  ;;  %v902_v47 = vrot.slane %v901_v39, 4  ;;  %v867_v51 = vrot.slane %v866_v41, 4  ;;  %v897_v55 = vrot.slane %v896_v34, 2 }
 0x339   :  { %v849_v53 = vmul.f32 %v2272_v36, %v785_v42  ;;  %v855_v58 = vmul.f32 %v2252_v56, %v827_v43  ;;  %v948_v31 = vrot.slane %v947_v11, 1 }
 0x33a   :  { %v903_v57 = vadd.f32 %v902_v47, %v901_v39  ;;  %v863_v60 = vadd.f32 %v862_v46, %v861_v35  ;;  %v868_v1 = vadd.f32 %v867_v51, %v866_v41  ;;  %v898_v17 = vadd.f32 %v897_v55, %v896_v34 }
 0x33b   :  { %v908_v2 = vsel %vm858_vm12, %v849_v53, 0.0  ;;  %v950_v8 = vsel %vm858_vm12, %v855_v58, 0.0  ;;  %v892_v39 = vrot.slane %v891_v16, 1  ;;  %v879_v53 = vadd.f32 %v878_v44, %v2265_v24 }
 0x33c   :  { %v841_v3 = vpop.permute.xlu1 %840  ;;  %v834_v4 = vpop.permute.xlu0 %833  ;;  %v904_v6 = vrot.slane %v903_v57, 2  ;;  %v909_v7 = vrot.slane %v908_v2, 4  ;;  %v869_v12 = vrot.slane %v868_v1, 2  ;;  %v951_v14 = vrot.slane %v950_v8, 4 }
 0x33d   :  { %v857_v15 = vmul.f32 %v2272_v36, %v841_v3  ;;  %v856_v19 = vmul.f32 %v2260_v13, %v834_v4  ;;  %v864_v20 = vrot.slane %v863_v60, 1  ;;  %v899_v41 = vrot.slane %v898_v17, 1 }
 0x33e   :  { %v910_v18 = vadd.f32 %v909_v7, %v908_v2  ;;  %v870_v22 = vadd.f32 %v869_v12, %v868_v1  ;;  %v952_v23 = vadd.f32 %v951_v14, %v950_v8  ;;  %v905_v26 = vadd.f32 %v904_v6, %v903_v57 }
 0x33f   :  { %v964_v25 = vsel %vm858_vm12, %v857_v15, 0.0  ;;  %v957_v30 = vsel %vm858_vm12, %v856_v19, 0.0  ;;  %v865_v46 = vadd.f32 %v864_v20, %v863_v60  ;;  %v942_v4 = vadd.f32 %v941_v59, %v2277_v38 }
 0x340   :  { %v911_v28 = vrot.slane %v910_v18, 2  ;;  %v965_v29 = vrot.slane %v964_v25, 4  ;;  %v871_v33 = vrot.slane %v870_v22, 1  ;;  %v953_v34 = vrot.slane %v952_v23, 2 }
 0x341   :  { %v958_v35 = vrot.slane %v957_v30, 4  ;;  %v906_v55 = vrot.slane %v905_v26, 1  ;;  %v893_v6 = vadd.f32 %v892_v39, %v891_v16  ;;  %v949_v60 = vadd.f32 %v948_v31, %v947_v11 }
 0x342   :  { %v912_v42 = vadd.f32 %v911_v28, %v910_v18  ;;  %v966_v43 = vadd.f32 %v965_v29, %v964_v25  ;;  %v872_v47 = vadd.f32 %v871_v33, %v870_v22  ;;  %v954_v49 = vadd.f32 %v953_v34, %v952_v23 }
 0x343   :  { %v959_v51 = vadd.f32 %v958_v35, %v957_v30  ;;  %v900_v12 = vadd.f32 %v899_v41, %v898_v17  ;;  %v907_v24 = vadd.f32 %v906_v55, %v905_v26  ;;  %v1002_v18 = vsel %vm989_vm10, %v2282_v48, %v2275_v37 }
 0x344   :  { %v967_v57 = vrot.slane %v966_v43, 2  ;;  %v988_v58 = vsel %vm987_vm9, %v872_v47, %v865_v46  ;;  %v913_v1 = vrot.slane %v912_v42, 1  ;;  %v955_v2 = vrot.slane %v954_v49, 1 }
 0x345   :  { %v960_v3 = vrot.slane %v959_v51, 2  ;;  %v990_v7 = vsel %vm989_vm10, %v879_v53, %v988_v58  ;;  %v1003_v16 = vsel %vm991_vm11, %v942_v4, %v1002_v18 }
 0x346   :  { %v968_v8 = vadd.f32 %v967_v57, %v966_v43  ;;  %v992_v15 = vsel %vm991_vm11, %v886_v54, %v990_v7  ;;  %v956_v44 = vadd.f32 %v955_v2, %v954_v49  ;;  %v914_v19 = vadd.f32 %v913_v1, %v912_v42 }
 0x347   :  { %v961_v14 = vadd.f32 %v960_v3, %v959_v51  ;;  %v994_v5 = vsel %vm993_vm14, %v893_v6, %v992_v15  ;;  %v1004_v23 = vsel %vm993_vm14, %v949_v60, %v1003_v16  ;;  %v2081_v49 = vmov 1966171168  }
 0x348   :  { %v969_v45 = vrot.slane %v968_v8, 1  ;;  %v996_v59 = vsel %vm995_vm13, %v900_v12, %v994_v5  ;;  %v1005_v26 = vsel %vm995_vm13, %v956_v44, %v1004_v23  ;;  %v1182_v51 = vunpack.c.l.s4 %v2081_v49 }
 0x349   :  { %v962_v38 = vrot.slane %v961_v14, 1  ;;  %v998_v17 = vsel %vm997_vm15, %v907_v24, %v996_v59 }
 0x34a   :  { %v970_v11 = vadd.f32 %v969_v45, %v968_v8  ;;  %v1000_v22 = vsel %vm999_vm0, %v914_v19, %v998_v17  ;;  %v1183_v53 = vunpack.c.0.s8 %v1182_v51 }
 0x34b   :  { %v963_v20 = vadd.f32 %v962_v38, %v961_v14  ;;  %v1010_v25 = vadd.f32 %v1000_v22, %v2199_v27 }
 0x34c   :  { %v2318_v54 = vsub.s32 %v1183_v53, %v2172_v62 }
 0x34d   :  { %v1006_v37 = vsel %vm997_vm15, %v963_v20, %v1005_v26  ;;  %v1012_v48 = vsel %vm858_vm12, %v1010_v25, -inf }
 0x34e   :  { %v1007_v28 = vsel %vm999_vm0, %v970_v11, %v1006_v37  ;;  %1013 = vmax.xlane.f32.xlu0 %v1012_v48 }
 0x34f   :  { %v1011_v29 = vadd.f32 %v1007_v28, %v2202_v32 }
 0x351   :  { %v1015_v30 = vsel %vm858_vm12, %v1011_v29, -inf }
 0x352   :  { %1016 = vmax.xlane.f32.xlu1 %v1015_v30 }
 0x3d7   :  { %v1014_v31 = vpop.xlane.xlu0 %1013 }
 0x3d8   :  { %v1018_v33 = vsub.f32 %v1010_v25, %v1014_v31 }
 0x3da   :  { %v1020_v34 = vmul.f32 1.442695, %v1018_v33 }
 0x3db   :  { %v1017_v35 = vpop.xlane.xlu1 %1016 }
 0x3dc   :  { %v1019_v39 = vsub.f32 %v1011_v29, %v1017_v35  ;;  %1909 = vpow2.f32 %v1020_v34 }
 0x3de   :  { %v1022_v27 = vmul.f32 1.442695, %v1019_v39 }
 0x3e0   :  { %1911 = vpow2.f32 %v1022_v27 }
 0x3e9   :  { %v1910_v41 = vpop.eup %1909 }
 0x3ea   :  { %v1024_v42 = vsel %vm858_vm12, %v1910_v41, 0.0 }
 0x3eb   :  { %1025 = vadd.xlane.f32.xlu0 %v1024_v42 }
 0x3ed   :  { %v1912_v43 = vpop.eup %1911 }
 0x3ee   :  { %v1027_v46 = vsel %vm858_vm12, %v1912_v43, 0.0 }
 0x3ef   :  { %1028 = vadd.xlane.f32.xlu0 %v1027_v46 }
 0x474   :  { %v1026_v32 = vpop.xlane.xlu0 %1025 }
 0x475   :  { %1913 = vrcp.f32 %v1026_v32 }
 0x476   :  { %1915 = vtanh.f32 %v2186_v9 }
 0x478   :  { %v1029_v47 = vpop.xlane.xlu0 %1028 }
 0x479   :  { %1917 = vrcp.f32 %v1029_v47 }
 0x482   :  { %v1914_v55 = vpop.eup %1913 }
 0x483   :  { %v1032_v57 = vmul.f32 %v1914_v55, %v1910_v41  ;;  %v1916_v58 = vpop.eup %1915 }
 0x485   :  { %1838 = vmatmul.mubr.msk.f32.vlgmr.msra.gmra.mxu1 %vm858_vm12, %v1032_v57  ;;  %v1187_v1 = vrot.slane %v1032_v57, %v2318_v54  ;;  %v1180_v2 = vcombine.high %v1032_v57, %v1032_v57 }
 0x486   :  { %v1918_v3 = vpop.eup %1917  ;;  %1841 = vmatpush3.msra.mxu1 %v1916_v58  ;;  %1842 = vmatprep.mubr.msk.f32.mxu1 %vm2080_vm1, %v2079_v52 }
 0x487   :  { %v1033_v9 = vmul.f32 %v1918_v3, %v1912_v43  ;;  %v1203_v4 = vrot.slane %v1187_v1, %v2318_v54  ;;  %v1195_v6 = vcombine.high %v1187_v1, %v1187_v1  ;;  %v1194_v7 = vrot.slane %v1180_v2, %v2318_v54 }
 0x489   :  { %1843 = vmatmul.mubr.msk.f32.vlgmr.msra.gmra.mxu1 %vm858_vm12, %v1033_v9  ;;  %v1281_v8 = vrot.slane %v1203_v4, %v2175_v63  ;;  %v1236_v60 = vrot.slane %v1033_v9, %v2318_v54  ;;  %v1217_v12 = vrot.slane %v1195_v6, %v2318_v54  ;;  %v1229_v14 = vcombine.high %v1033_v9, %v1033_v9 }
 0x48a   :  { %v1210_v44 = vrot.slane %v1194_v7, %v2318_v54  ;;  %v1196_v23 = vcombine.high %v1194_v7, %v1194_v7  ;;  %v1225_v28 = vcombine.high %v1203_v4, %v1203_v4 }
 0x48b   :  { %v1358_v15 = vmul.f32 %v2222_v0, %v1281_v8  ;;  %v1252_v24 = vrot.slane %v1236_v60, %v2318_v54  ;;  %v1244_v52 = vcombine.high %v1236_v60, %v1236_v60  ;;  %v1243_v45 = vrot.slane %v1229_v14, %v2318_v54 }
 0x48c   :  { %v1285_v38 = vrot.slane %v1217_v12, %v2175_v63  ;;  %v1297_v22 = vrot.slane %v1210_v44, %v2175_v63  ;;  %v1227_v48 = vcombine.high %v1217_v12, %v1217_v12  ;;  %v1224_v35 = vrot.slane %v1196_v23, %v2318_v54  ;;  %v165_v23 = vld [vmem:[#allocation8 + $0x20] sm:$0xff] }
 0x48d   :  { %v1374_v5 = vsel %vm858_vm12, %v1358_v15, 0.0  ;;  %v1313_v18 = vrot.slane %v1252_v24, %v2175_v63  ;;  %v1266_v19 = vrot.slane %v1244_v52, %v2318_v54  ;;  %v1274_v59 = vcombine.high %v1252_v24, %v1252_v24 }
 0x48e   :  { %1375 = vadd.xlane.f32.xlu1 %v1374_v5  ;;  %v1259_v17 = vrot.slane %v1243_v45, %v2318_v54  ;;  %v1359_v37 = vmul.f32 %v2219_v61, %v1285_v38  ;;  %v1362_v33 = vmul.f32 %v2244_v40, %v1297_v22  ;;  %v1293_v34 = vrot.slane %v1227_v48, %v2175_v63  ;;  %v173_v38 = vld [vmem:[#allocation8 + $0x60] sm:$0xff]  ;;  %v166_v22 = vld [vmem:[#allocation8 + $0x28] sm:$0xff] }
 0x48f   :  { %v1366_v16 = vmul.f32 %v2222_v0, %v1313_v18  ;;  %v1317_v11 = vrot.slane %v1266_v19, %v2175_v63  ;;  %v1321_v20 = vrot.slane %v1274_v59, %v2175_v63  ;;  %v1276_v41 = vcombine.high %v1266_v19, %v1266_v19  ;;  %v181_v18 = vld [vmem:[#allocation11] sm:$0xff]  ;;  %v175_v19 = vld [vmem:[#allocation8 + $0x70] sm:$0xff] }
 0x490   :  { %v1329_v30 = vrot.slane %v1259_v17, %v2175_v63  ;;  %v1377_v31 = vsel %vm858_vm12, %v1359_v37, 0.0  ;;  %v1245_v42 = vcombine.high %v1243_v45, %v1243_v45  ;;  %v1386_v43 = vsel %vm858_vm12, %v1362_v33, 0.0  ;;  %1845 = vmatprep.subr.mxu1 %v181_v18  ;;  %v171_v59 = vld [vmem:[#allocation8 + $0x50] sm:$0xff] }
 0x491   :  { %v1398_v25 = vsel %vm858_vm12, %v1366_v16, 0.0  ;;  %v1367_v26 = vmul.f32 %v2219_v61, %v1317_v11  ;;  %v1368_v29 = vmul.f32 %v2228_v10, %v1321_v20  ;;  %v1289_v61 = vrot.slane %v1225_v28, %v2175_v63  ;;  %1846 = vmatpush3.msra.mxu1 %v181_v18  ;;  %v170_v16 = vld [vmem:[#allocation8 + $0x48] sm:$0xff]  ;;  %v169_v11 = vld [vmem:[#allocation8 + $0x40] sm:$0xff]  ;;  %v167_v20 = vld [vmem:[#allocation8 + $0x30] sm:$0xff] }
 0x492   :  { %1399 = vadd.xlane.f32.xlu0 %v1398_v25  ;;  %v1370_v27 = vmul.f32 %v2244_v40, %v1329_v30  ;;  %v1361_v46 = vmul.f32 %v2236_v21, %v1293_v34  ;;  %v1301_v32 = vrot.slane %v1224_v35, %v2175_v63  ;;  %v1226_v47 = vcombine.high %v1210_v44, %v1210_v44  ;;  %v164_v25 = vld [vmem:[#allocation8 + $0x18] sm:$0xff] }
 0x493   :  { %v1401_v0 = vsel %vm858_vm12, %v1367_v26, 0.0  ;;  %v1404_v39 = vsel %vm858_vm12, %v1368_v29, 0.0  ;;  %v1360_v51 = vmul.f32 %v2228_v10, %v1289_v61  ;;  %v1325_v53 = vrot.slane %v1276_v41, %v2175_v63 }
 0x494   :  { %1402 = vadd.xlane.f32.xlu1 %v1401_v0  ;;  %v1410_v49 = vsel %vm858_vm12, %v1370_v27, 0.0  ;;  %v1273_v55 = vrot.slane %v1245_v42, %v2318_v54  ;;  %v1383_v40 = vsel %vm858_vm12, %v1361_v46, 0.0  ;;  %v1363_v57 = vmul.f32 %v2252_v56, %v1301_v32 }
 0x495   :  { %v1305_v58 = vrot.slane %v1226_v47, %v2175_v63  ;;  %v1228_v1 = vcombine.high %v1224_v35, %v1224_v35  ;;  %v1380_v2 = vsel %vm858_vm12, %v1360_v51, 0.0  ;;  %v1369_v3 = vmul.f32 %v2236_v21, %v1325_v53 }
 0x496   :  { %1378 = vadd.xlane.f32.xlu0 %v1377_v31  ;;  %v1333_v9 = vrot.slane %v1273_v55, %v2175_v63  ;;  %v1275_v10 = vcombine.high %v1259_v17, %v1259_v17  ;;  %v1389_v4 = vsel %vm858_vm12, %v1363_v57, 0.0  ;;  %v1277_v7 = vcombine.high %v1273_v55, %v1273_v55  ;;  %v168_v17 = vld [vmem:[#allocation8 + $0x38] sm:$0xff] }
 0x497   :  { %v1364_v54 = vmul.f32 %v2260_v13, %v1305_v58  ;;  %v1309_v6 = vrot.slane %v1228_v1, %v2175_v63  ;;  %v1407_v8 = vsel %vm858_vm12, %v1369_v3, 0.0  ;;  %v1440_v30 = vsub.s32 %v2211_v50, %v2172_v62 }
 0x498   :  { %1405 = vadd.xlane.f32.xlu1 %v1404_v39  ;;  %v1371_v60 = vmul.f32 %v2252_v56, %v1333_v9  ;;  %v1337_v12 = vrot.slane %v1275_v10, %v2175_v63  ;;  %v1341_v15 = vrot.slane %v1277_v7, %v2175_v63  ;;  %v176_v63 = vld [vmem:[#allocation8 + $0x78] sm:$0xff] }
 0x499   :  { %v1392_v21 = vsel %vm858_vm12, %v1364_v54, 0.0  ;;  %v1365_v14 = vmul.f32 %v2272_v36, %v1309_v6  ;;  %1850 = vmatprep.subr.mxu0 %v176_v63 }
 0x49a   :  { %1387 = vadd.xlane.f32.xlu0 %v1386_v43  ;;  %v1413_v24 = vsel %vm858_vm12, %v1371_v60, 0.0  ;;  %v1372_v52 = vmul.f32 %v2260_v13, %v1337_v12  ;;  %v1373_v45 = vmul.f32 %v2272_v36, %v1341_v15  ;;  %1851 = vmatpush3.msra.mxu0 %v176_v63  ;;  %v174_v13 = vld [vmem:[#allocation8 + $0x68] sm:$0xff]  ;;  %v172_v36 = vld [vmem:[#allocation8 + $0x58] sm:$0xff]  ;;  %v163_v63 = vld [vmem:[#allocation8 + $0x10] sm:$0xff] }
 0x49b   :  { %v1395_v44 = vsel %vm858_vm12, %v1365_v14, 0.0  ;;  %1852 = vmatprep.subr.mxu0 %v175_v19 }
 0x49c   :  { %1411 = vadd.xlane.f32.xlu1 %v1410_v49  ;;  %v1416_v56 = vsel %vm858_vm12, %v1372_v52, 0.0  ;;  %v1419_v5 = vsel %vm858_vm12, %v1373_v45, 0.0  ;;  %1853 = vmatpush3.msra.mxu0 %v175_v19  ;;  %v162_v19 = vld [vmem:[#allocation8 + $0x8] sm:$0xff] }
 0x49d   :  { %1854 = vmatprep.subr.mxu0 %v174_v13 }
 0x49e   :  { %1384 = vadd.xlane.f32.xlu0 %v1383_v40  ;;  %1855 = vmatpush3.msra.mxu0 %v174_v13  ;;  %v161_v13 = vld [vmem:[#allocation8] sm:$0xff] }
 0x49f   :  { %1856 = vmatprep.subr.mxu0 %v173_v38 }
 0x4a0   :  { %1381 = vadd.xlane.f32.xlu1 %v1380_v2  ;;  %1857 = vmatpush3.msra.mxu0 %v173_v38 }
 0x4a1   :  { %1858 = vmatprep.subr.mxu0 %v172_v36 }
 0x4a2   :  { %1390 = vadd.xlane.f32.xlu0 %v1389_v4  ;;  %1859 = vmatpush3.msra.mxu0 %v172_v36 }
 0x4a3   :  { %1860 = vmatprep.subr.mxu0 %v171_v59 }
 0x4a4   :  { %1408 = vadd.xlane.f32.xlu1 %v1407_v8  ;;  %1861 = vmatpush3.msra.mxu0 %v171_v59 }
 0x4a5   :  { %1862 = vmatprep.subr.mxu0 %v170_v16 }
 0x4a6   :  { %1393 = vadd.xlane.f32.xlu0 %v1392_v21  ;;  %1863 = vmatpush3.msra.mxu0 %v170_v16 }
 0x4a7   :  { %1864 = vmatprep.subr.mxu0 %v169_v11 }
 0x4a8   :  { %1414 = vadd.xlane.f32.xlu1 %v1413_v24  ;;  %1865 = vmatpush3.msra.mxu0 %v169_v11  ;;  %v1723_v11 = vld [vmem:[#allocation10] ss:$0 sm:$0xff] }
 0x4a9   :  { %1866 = vmatprep.subr.mxu0 %v168_v17 }
 0x4aa   :  { %1396 = vadd.xlane.f32.xlu0 %v1395_v44  ;;  %1867 = vmatpush3.msra.mxu0 %v168_v17 }
 0x4ab   :  { %1868 = vmatprep.subr.mxu0 %v167_v20 }
 0x4ac   :  { %1417 = vadd.xlane.f32.xlu1 %v1416_v56  ;;  %1869 = vmatpush3.msra.mxu0 %v167_v20 }
 0x4ad   :  { %1870 = vmatprep.subr.mxu0 %v166_v22 }
 0x4ae   :  { %1420 = vadd.xlane.f32.xlu0 %v1419_v5  ;;  %1871 = vmatpush3.msra.mxu0 %v166_v22 }
 0x4af   :  { %1872 = vmatprep.subr.mxu0 %v165_v23 }
 0x4b0   :  { %1873 = vmatpush3.msra.mxu0 %v165_v23 }
 0x4b1   :  { %1874 = vmatprep.subr.mxu0 %v164_v25 }
 0x4b2   :  { %1875 = vmatpush3.msra.mxu0 %v164_v25 }
 0x4b3   :  { %1876 = vmatprep.subr.mxu0 %v163_v63 }
 0x4b4   :  { %1877 = vmatpush3.msra.mxu0 %v163_v63 }
 0x4b5   :  { %1878 = vmatprep.subr.mxu0 %v162_v19 }
 0x4b6   :  { %1879 = vmatpush3.msra.mxu0 %v162_v19 }
 0x4b7   :  { %1880 = vmatprep.subr.mxu0 %v161_v13 }
 0x4b8   :  { %1881 = vmatpush3.msra.mxu0 %v161_v13 }
 0x517   :  { %v1376_v26 = vpop.xlane.xlu1 %1375 }
 0x518   :  { %v1441_v35 = vrot.slane %v1376_v26, %v1440_v30 }
 0x51b   :  { %v1400_v37 = vpop.xlane.xlu0 %1399 }
 0x51c   :  { %v1473_v51 = vrot.slane %v1400_v37, %v1440_v30 }
 0x51d   :  { %v1403_v48 = vpop.xlane.xlu1 %1402 }
 0x51e   :  { %v1477_v46 = vrot.slane %v1403_v48, %v1440_v30 }
 0x51f   :  { %v1379_v28 = vpop.xlane.xlu0 %1378 }
 0x520   :  { %v1445_v33 = vrot.slane %v1379_v28, %v1440_v30  ;;  %v1509_v40 = vsel %vm987_vm9, %v1477_v46, %v1473_v51 }
 0x521   :  { %v1406_v0 = vpop.xlane.xlu1 %1405 }
 0x522   :  { %v1502_v27 = vsel %vm987_vm9, %v1445_v33, %v1441_v35  ;;  %v1481_v47 = vrot.slane %v1406_v0, %v1440_v30 }
 0x523   :  { %v1388_v29 = vpop.xlane.xlu0 %1387 }
 0x524   :  { %v1457_v53 = vrot.slane %v1388_v29, %v1440_v30  ;;  %v1510_v2 = vsel %vm989_vm10, %v1481_v47, %v1509_v40 }
 0x525   :  { %v1412_v31 = vpop.xlane.xlu1 %1411 }
 0x526   :  { %v1489_v4 = vrot.slane %v1412_v31, %v1440_v30 }
 0x527   :  { %v1385_v34 = vpop.xlane.xlu0 %1384 }
 0x528   :  { %v1453_v42 = vrot.slane %v1385_v34, %v1440_v30 }
 0x529   :  { %v1382_v61 = vpop.xlane.xlu1 %1381 }
 0x52a   :  { %v1449_v39 = vrot.slane %v1382_v61, %v1440_v30 }
 0x52b   :  { %v1391_v41 = vpop.xlane.xlu0 %1390 }
 0x52c   :  { %v1503_v43 = vsel %vm989_vm10, %v1449_v39, %v1502_v27  ;;  %v1461_v55 = vrot.slane %v1391_v41, %v1440_v30 }
 0x52d   :  { %v1409_v32 = vpop.xlane.xlu1 %1408  ;;  %v1504_v49 = vsel %vm991_vm11, %v1453_v42, %v1503_v43 }
 0x52e   :  { %v1485_v62 = vrot.slane %v1409_v32, %v1440_v30  ;;  %v1505_v57 = vsel %vm993_vm14, %v1457_v53, %v1504_v49 }
 0x52f   :  { %v1394_v50 = vpop.xlane.xlu0 %1393  ;;  %v1506_v54 = vsel %vm995_vm13, %v1461_v55, %v1505_v57 }
 0x530   :  { %v1465_v58 = vrot.slane %v1394_v50, %v1440_v30  ;;  %v1511_v3 = vsel %vm991_vm11, %v1485_v62, %v1510_v2 }
 0x531   :  { %v1415_v1 = vpop.xlane.xlu1 %1414  ;;  %v1512_v60 = vsel %vm993_vm14, %v1489_v4, %v1511_v3 }
 0x532   :  { %v1493_v9 = vrot.slane %v1415_v1, %v1440_v30  ;;  %v1507_v7 = vsel %vm997_vm15, %v1465_v58, %v1506_v54 }
 0x533   :  { %v1397_v10 = vpop.xlane.xlu0 %1396 }
 0x534   :  { %v1469_v6 = vrot.slane %v1397_v10, %v1440_v30  ;;  %v1513_v14 = vsel %vm995_vm13, %v1493_v9, %v1512_v60 }
 0x535   :  { %v1418_v8 = vpop.xlane.xlu1 %1417 }
 0x536   :  { %v1497_v12 = vrot.slane %v1418_v8, %v1440_v30  ;;  %v1508_v21 = vsel %vm999_vm0, %v1469_v6, %v1507_v7 }
 0x537   :  { %v1421_v15 = vpop.xlane.xlu0 %1420  ;;  %1847 = vmatprep.mubr.msk.f32.mxu1 %vm858_vm12, %v1508_v21 }
 0x538   :  { %v1514_v24 = vsel %vm997_vm15, %v1497_v12, %v1513_v14  ;;  %v1501_v52 = vrot.slane %v1421_v15, %v1440_v30 }
 0x53a   :  { %v1515_v44 = vsel %vm999_vm0, %v1501_v52, %v1514_v24 }
 0x53b   :  { %1848 = vmatmul.mubr.msk.f32.vlgmr.msra.gmra.mxu1 %vm858_vm12, %v1515_v44 }
 0x545   :  { %v1103_v45 = vpop.f32.mrf.mxu1 }
 0x547   :  { %v1839_v56 = vpop.f32.mrf.mxu1 }
 0x549   :  { %v1176_v5 = vpop.f32.mrf.mxu1 }
 0x54b   :  { %v1844_v18 = vpop.f32.mrf.mxu1 }
 0x5fb   :  { %v1849_v38 = vpop.f32.mrf.mxu1 }
 0x5fc   :  { %v1596_v16 = vadd.f32 %v1849_v38, %v1176_v5 }
 0x5fd   :  { %v1586_v36 = vpop.f32.mrf.mxu1 }
 0x5fe   :  { %v1595_v59 = vadd.f32 %v1586_v36, %v1103_v45 }
 0x600   :  { %1882 = vmatprep.mubr.f32.mxu0 %v1595_v59 }
 0x601   :  { %1883 = vmatmul.mubr.f32.vlgmr.msra.gmra.mxu0 %v1596_v16 }
 0x6c1   :  { %v1884_v17 = vpop.f32.mrf.mxu0 }
 0x6c2   :  { %v1675_v20 = vadd.f32 %v1884_v17, %v1723_v11 }
 0x6c3   :  { %v1669_v22 = vpop.f32.mrf.mxu0 }
 0x6c4   :  { %v1679_v23 = vmax.f32 %v1675_v20, 0.0  ;;  %v1670_v25 = vadd.f32 %v1723_v11, %v1669_v22 }
 0x6c6   :  { %1681 = vst [vmem:[#allocation13 + $0x8] sm:$0xff] %v1679_v23  ;;  %v1678_v26 = vmax.f32 %v1670_v25, 0.0 }
 0x6c8   :  { %1680 = vst [vmem:[#allocation13] sm:$0xff] %v1678_v26 }
 0x6c9   :  { %2050 = shalt.err (!%p2047_p6)
}
 0x6ca   :  { %1693 = dma.vmem_to_hbm [thread:$0]  %s1688_s7, 256, %s2417_s9, [#allocation4], %s2071_s14, %s2071_s14, %s2072_s15  }
 0x6cb   :  { %2067 = dma.done.wait [#allocation4], 256  }
 0x6cc   :  { %2068 = vsyncadd [#allocation4], 4294967040 }
 0x6cd   :  { %1697 = vsyncpa [#allocation3], 1 }
 0x6ce   :  { %1698 = vsyncpa [#allocation6], 1 }
 0x6cf   :  { %1699 = vsyncpa [#allocation9], 1 }
 0x6d0   :  { %1700 = vsyncpa [#allocation12], 1 }
 0x6d1   :  { %1701 = vsyncpa [#allocation4], 1 }

</bundles_post_ra>
